<compile_context>
chip_gen: v5e
topology: v5e:2x2
jax: 0.10.0
libtpu: 0.0.40
codegen_flags: <defaults>
</compile_context>

<pallas_src>
import math
import jax
import jax.numpy as jnp
from jax import lax
from jax.experimental import pallas as pl
from jax.experimental.pallas import tpu as pltpu


def _cdiv(a, b):
    return (a + b - 1) // b


def _round_up(n, m):
    return _cdiv(n, m) * m


def _make_kernel(identity, fuse, mxu_dtype):
    def epilogue(h, x_ref, g_ref, beta_ref, w2_ref, b2_ref, o_ref):
        # LayerNorm (torch eps=1e-5, biased variance), stats in f32.
        hid = h.shape[-1]
        inv_n = 1.0 / hid
        mean = jnp.sum(h, axis=-1, keepdims=True) * inv_n
        msq = jnp.sum(h * h, axis=-1, keepdims=True) * inv_n
        var = msq - mean * mean                      # keep in f32 (cancellation)
        rstd = lax.rsqrt(var + 1e-5)                 # (tm, 1)
        scale = g_ref[...] * rstd                    # gamma folded into rsqrt
        shift = beta_ref[...] - mean * scale         # beta folded with mean
        hn = jnp.maximum(h * scale + shift, 0.0)     # LN affine + ReLU, one sweep

        # Linear 2 (MXU dtype inputs, f32 accumulation).
        out = jnp.dot(hn.astype(mxu_dtype), w2_ref[...],
                      preferred_element_type=jnp.float32) + b2_ref[...]
        if identity:
            # Re-read x from its VMEM input buffer (vld slot has slack); avoids
            # keeping a (tm, f) value live across the whole LN epilogue.
            out = out + x_ref[...].astype(jnp.float32)
        o_ref[...] = out.astype(o_ref.dtype)

    if fuse:
        # Single K-aligned dot: xc = [x | c_pad], W1 zero-row-padded in wrapper.
        def kernel(x_ref, c_ref, w1_ref, b1_ref, g_ref, beta_ref, w2_ref, b2_ref,
                   o_ref):
            xc = jnp.concatenate(
                [x_ref[...].astype(mxu_dtype), c_ref[...]], axis=-1)
            h = jnp.dot(xc, w1_ref[...],
                        preferred_element_type=jnp.float32) + b1_ref[...]
            epilogue(h, x_ref, g_ref, beta_ref, w2_ref, b2_ref, o_ref)
    else:
        # Split weights (concat never materializes in HBM): h = x@W1x + c@W1c.
        def kernel(x_ref, c_ref, w1x_ref, w1c_ref, b1_ref, g_ref, beta_ref,
                   w2_ref, b2_ref, o_ref):
            h = (jnp.dot(x_ref[...].astype(mxu_dtype), w1x_ref[...],
                         preferred_element_type=jnp.float32)
                 + jnp.dot(c_ref[...], w1c_ref[...],
                           preferred_element_type=jnp.float32)
                 + b1_ref[...])
            epilogue(h, x_ref, g_ref, beta_ref, w2_ref, b2_ref, o_ref)

    return kernel


def motion_mlp(x, c, params, *, identity=True, tm=512, mxu_bf16=True):
    """x: (..., f_dim), c: (..., c_dim). Returns (..., f_dim) in x.dtype.

    mxu_bf16=True feeds the MXU bf16 inputs even for f32 storage (f32 accumulation
    and f32 LayerNorm/bias epilogue are kept); set False for true-f32 matmuls.
    """
    w1, b1, gamma, beta, w2, b2 = params
    f_dim = x.shape[-1]
    c_dim = c.shape[-1]
    hid = 2 * f_dim
    assert w1.shape == (c_dim + f_dim, hid)
    assert w2.shape == (hid, f_dim)
    assert f_dim % 128 == 0, "f_dim must be a multiple of 128 (lane-dense I/O)"

    lead = x.shape[:-1]
    N = int(math.prod(lead)) if lead else 1
    x2 = x.reshape(N, f_dim)
    c2 = c.reshape(N, c_dim)

    # MXU input dtype.
    mxu_dtype = jnp.bfloat16 if (x.dtype == jnp.bfloat16 or mxu_bf16) else jnp.float32

    # Fuse Linear-1 into one dot only when it reduces 256-deep MXU passes
    # (e.g. f_dim=128, c_dim=16 -> K=256: 1 pass instead of 2). For f_dim=512
    # it does not, so the split/concat-free path is kept.
    c_pad = _round_up(c_dim, 128)
    k_fused = f_dim + c_pad
    fuse = _cdiv(k_fused, 256) < _cdiv(f_dim, 256) + _cdiv(c_dim, 256)

    if fuse:
        w1p = jnp.pad(w1, ((0, k_fused - (f_dim + c_dim)), (0, 0)))
        w_first = (w1p.astype(mxu_dtype),)
        if c_pad != c_dim:
            c2 = jnp.pad(c2, ((0, 0), (0, c_pad - c_dim)))
        c_lanes = c_pad
    else:
        w_first = (w1[:f_dim].astype(mxu_dtype), w1[f_dim:].astype(mxu_dtype))
        c_lanes = c_dim
    c2 = c2.astype(mxu_dtype)
    w2m = w2.astype(mxu_dtype)

    # Small epilogue params stay f32 regardless of I/O dtype.
    b1 = b1.reshape(1, hid).astype(jnp.float32)
    gamma = gamma.reshape(1, hid).astype(jnp.float32)
    beta = beta.reshape(1, hid).astype(jnp.float32)
    b2 = b2.reshape(1, f_dim).astype(jnp.float32)

    io_size = jnp.dtype(x.dtype).itemsize
    mxu_size = jnp.dtype(mxu_dtype).itemsize

    def vmem_estimate(tm_):
        io = 2 * tm_ * f_dim * io_size * 2                 # x + out (double-buffered)
        io += 2 * tm_ * c_lanes * mxu_size                 # c (double-buffered)
        wb = (k_fused if fuse else (f_dim + c_dim)) * hid * mxu_size  # W1 (single)
        wb += hid * f_dim * mxu_size                       # W2 (single)
        inter = 4 * tm_ * hid * 4                          # f32 LN intermediates
        if fuse:
            inter += tm_ * k_fused * mxu_size              # xc staging
        return io + wb + inter

    # Row tile: start big, trim padding waste, then shrink to the VMEM budget
    # (~24 MiB working set, well under the 32 MiB scoped limit set below and
    # under v7x's per-core VMEM).
    VMEM_BUDGET = 24 << 20
    tm = max(8, min(int(tm), _round_up(N, 8)))
    tm = min(tm, _round_up(_cdiv(N, _cdiv(N, tm)), 8))     # same #steps, less waste
    while vmem_estimate(tm) > VMEM_BUDGET and tm > 8:
        tm = tm // 2
    tm = max(8, (tm // 8) * 8)

    n_pad = _round_up(N, tm)
    if n_pad != N:
        x2 = jnp.pad(x2, ((0, n_pad - N), (0, 0)))
        c2 = jnp.pad(c2, ((0, n_pad - N), (0, 0)))

    # Grid-invariant operands -> single pipeline buffer (saves ~half their VMEM).
    single = dict(pipeline_mode=pl.Buffered(1))
    if fuse:
        w_specs = [pl.BlockSpec((k_fused, hid), lambda i: (0, 0), **single)]
    else:
        w_specs = [pl.BlockSpec((f_dim, hid), lambda i: (0, 0), **single),
                   pl.BlockSpec((c_dim, hid), lambda i: (0, 0), **single)]

    in_specs = (
        [pl.BlockSpec((tm, f_dim), lambda i: (i, 0)),      # x (matmul + residual)
         pl.BlockSpec((tm, c_lanes), lambda i: (i, 0))]    # c
        + w_specs                                          # W1 (fused or split)
        + [pl.BlockSpec((1, hid), lambda i: (0, 0), **single),     # b1
           pl.BlockSpec((1, hid), lambda i: (0, 0), **single),     # gamma
           pl.BlockSpec((1, hid), lambda i: (0, 0), **single),     # beta
           pl.BlockSpec((hid, f_dim), lambda i: (0, 0), **single), # W2
           pl.BlockSpec((1, f_dim), lambda i: (0, 0), **single)]   # b2
    )

    out = pl.pallas_call(
        _make_kernel(identity, fuse, mxu_dtype),
        out_shape=jax.ShapeDtypeStruct((n_pad, f_dim), x.dtype),
        grid=(n_pad // tm,),
        in_specs=in_specs,
        out_specs=pl.BlockSpec((tm, f_dim), lambda i: (i, 0)),
        compiler_params=pltpu.CompilerParams(
            # TODO(synk): on v7x use pltpu.CORE_PARALLEL (or pl.core_map) on this
            # axis to guarantee both TensorCores are engaged; "parallel" is safe
            # on all generations.
            dimension_semantics=("parallel",),
            vmem_limit_bytes=32 * 1024 * 1024),
    )(x2, c2, *w_first, b1, gamma, beta, w2m, b2)

    if n_pad != N:
        out = out[:N]
    return out.reshape(*lead, f_dim)


def init_params(key, c_dim, f_dim):
    """Deterministic synthetic init (Xavier-like weights so the matmul path is
    exercised; LayerNorm gamma=1, beta=0 as in torch defaults)."""
    in_dim = c_dim + f_dim
    hid = 2 * f_dim
    k1, k2, k3, k4 = jax.random.split(key, 4)

    def xavier(k, fan_in, fan_out):
        lim = math.sqrt(6.0 / (fan_in + fan_out))
        return jax.random.uniform(k, (fan_in, fan_out), jnp.float32, -lim, lim)

    w1 = xavier(k1, in_dim, hid)
    b1 = jax.random.uniform(k2, (1, hid), jnp.float32,
                            -1.0 / math.sqrt(in_dim), 1.0 / math.sqrt(in_dim))
    gamma = jnp.ones((1, hid), jnp.float32)
    beta = jnp.zeros((1, hid), jnp.float32)
    w2 = xavier(k3, hid, f_dim)
    b2 = jax.random.uniform(k4, (1, f_dim), jnp.float32,
                            -1.0 / math.sqrt(hid), 1.0 / math.sqrt(hid))
    return (w1, b1, gamma, beta, w2, b2)


def motion_mlp_ref(x, c, params, identity=True):
    """Pure-JAX (f32) reference of the PyTorch forward."""
    w1, b1, gamma, beta, w2, b2 = params
    xc = jnp.concatenate([x, c], axis=-1)
    h = xc @ w1 + b1.reshape(1, -1)
    mean = jnp.mean(h, axis=-1, keepdims=True)
    var = jnp.mean((h - mean) ** 2, axis=-1, keepdims=True)
    hn = (h - mean) / jnp.sqrt(var + 1e-5) * gamma.reshape(1, -1) + beta.reshape(1, -1)
    hn = jnp.maximum(hn, 0.0)
    out = hn @ w2 + b2.reshape(1, -1)
    return out + x if identity else out


if __name__ == "__main__":
    key = jax.random.PRNGKey(0)
    kx, kc, kp, kx2, kc2, kp2 = jax.random.split(key, 6)

    # ---- Config A: f_dim=128 (lane-dense, Linear-1 fuses to one K=256 dot),
    # N=600 tokens exercises the token-padding path.
    batch, seq, c_dim, f_dim = 2, 300, 16, 128
    x = jax.random.normal(kx, (batch, seq, f_dim), jnp.float32)
    c = jax.random.normal(kc, (batch, seq, c_dim), jnp.float32)
    params = init_params(kp, c_dim, f_dim)
    ref = motion_mlp_ref(x.reshape(-1, f_dim), c.reshape(-1, c_dim),
                         params).reshape(batch, seq, f_dim)

    # exact f32 matmul path
    out_f32 = jax.block_until_ready(
        motion_mlp(x, c, params, identity=True, mxu_bf16=False))
    assert out_f32.shape == (batch, seq, f_dim)
    assert jnp.allclose(out_f32, ref, atol=1e-4, rtol=1e-4), "f32 mismatch vs ref"

    # default fast path: f32 storage, bf16 MXU inputs, f32 accumulation
    out_fast = jax.block_until_ready(motion_mlp(x, c, params, identity=True))
    err_fast = float(jnp.max(jnp.abs(out_fast - ref)))
    assert err_fast < 5e-2, f"bf16-MXU fast path mismatch (max err {err_fast})"

    # bf16 storage path (halves HBM traffic)
    w1, b1, gamma, beta, w2, b2 = params
    params_bf16 = (w1.astype(jnp.bfloat16), b1, gamma, beta,
                   w2.astype(jnp.bfloat16), b2)
    xb, cb = x.astype(jnp.bfloat16), c.astype(jnp.bfloat16)
    out_bf16 = jax.block_until_ready(motion_mlp(xb, cb, params_bf16, identity=True))
    ref_b = motion_mlp_ref(
        xb.astype(jnp.float32).reshape(-1, f_dim),
        cb.astype(jnp.float32).reshape(-1, c_dim),
        tuple(p.astype(jnp.float32) for p in params_bf16),
    ).reshape(batch, seq, f_dim)
    err_b = float(jnp.max(jnp.abs(out_bf16.astype(jnp.float32) - ref_b)))
    assert out_bf16.dtype == jnp.bfloat16
    assert err_b < 5e-2, f"bf16 storage mismatch (max err {err_b})"

    # ---- Config B: f_dim=256 -> split-weight (no-fuse) path, identity=False.
    f_dim2, c_dim2, n2 = 256, 16, 200
    x_b = jax.random.normal(kx2, (n2, f_dim2), jnp.float32)
    c_b = jax.random.normal(kc2, (n2, c_dim2), jnp.float32)
    params2 = init_params(kp2, c_dim2, f_dim2)
    out2 = jax.block_until_ready(motion_mlp(x_b, c_b, params2, identity=False))
    ref2 = motion_mlp_ref(x_b, c_b, params2, identity=False)
    err2 = float(jnp.max(jnp.abs(out2 - ref2)))
    assert err2 < 1e-1, f"split-path mismatch (max err {err2})"

    print("KERNEL_OK")
</pallas_src>

<mosaic_0001>
module attributes {stable_mosaic.version = 11 : i64} {
  func.func @kernel(%arg0: i32, %arg1: memref<304x128xf32, #tpu.memory_space<vmem>>, %arg2: memref<304x128xf32, #tpu.memory_space<vmem>>, %arg3: memref<256x256xf32, #tpu.memory_space<vmem>>, %arg4: memref<1x256xf32, #tpu.memory_space<vmem>>, %arg5: memref<1x256xf32, #tpu.memory_space<vmem>>, %arg6: memref<1x256xf32, #tpu.memory_space<vmem>>, %arg7: memref<256x128xf32, #tpu.memory_space<vmem>>, %arg8: memref<1x128xf32, #tpu.memory_space<vmem>>, %arg9: memref<304x128xf32, #tpu.memory_space<vmem>>) attributes {dimension_semantics = [#tpu.dimension_semantics<parallel>], iteration_bounds = array<i64: 2>, scalar_prefetch = 0 : i64, scratch_operands = 0 : i64, tpu.core_type = #tpu.core_type<tc>, window_params = [{transform_indices = @transform_0, window_bounds = array<i64: 304, 128>}, {transform_indices = @transform_1, window_bounds = array<i64: 304, 128>}, {pipeline_mode = #tpu.pipeline_mode<synchronous>, transform_indices = @transform_2, window_bounds = array<i64: 256, 256>}, {pipeline_mode = #tpu.pipeline_mode<synchronous>, transform_indices = @transform_3, window_bounds = array<i64: 1, 256>}, {pipeline_mode = #tpu.pipeline_mode<synchronous>, transform_indices = @transform_4, window_bounds = array<i64: 1, 256>}, {pipeline_mode = #tpu.pipeline_mode<synchronous>, transform_indices = @transform_5, window_bounds = array<i64: 1, 256>}, {pipeline_mode = #tpu.pipeline_mode<synchronous>, transform_indices = @transform_6, window_bounds = array<i64: 256, 128>}, {pipeline_mode = #tpu.pipeline_mode<synchronous>, transform_indices = @transform_7, window_bounds = array<i64: 1, 128>}, {transform_indices = @transform_8, window_bounds = array<i64: 304, 128>}]} {
    %c0 = arith.constant 0 : index
    %c0_0 = arith.constant 0 : index
    %0 = vector.load %arg1[%c0, %c0_0] : memref<304x128xf32, #tpu.memory_space<vmem>>, vector<304x128xf32>
    %c0_1 = arith.constant 0 : index
    %c0_2 = arith.constant 0 : index
    %1 = vector.load %arg2[%c0_1, %c0_2] : memref<304x128xf32, #tpu.memory_space<vmem>>, vector<304x128xf32>
    %2 = tpu.concatenate %0, %1 in 1 : vector<304x128xf32>, vector<304x128xf32> -> vector<304x256xf32>
    %c0_3 = arith.constant 0 : index
    %c0_4 = arith.constant 0 : index
    %3 = vector.load %arg3[%c0_3, %c0_4] : memref<256x256xf32, #tpu.memory_space<vmem>>, vector<256x256xf32>
    %cst = arith.constant dense<0.000000e+00> : vector<304x256xf32>
    %4 = tpu.matmul %2, %3, %cst {dimension_numbers = #tpu.dot_dimension_numbers<[1], [0], [0], [1], [0, 0, 1, 1], [], []>} : vector<304x256xf32>, vector<256x256xf32>, vector<304x256xf32> -> vector<304x256xf32>
    %c0_5 = arith.constant 0 : index
    %c0_6 = arith.constant 0 : index
    %5 = vector.load %arg4[%c0_5, %c0_6] : memref<1x256xf32, #tpu.memory_space<vmem>>, vector<1x256xf32>
    %6 = vector.broadcast %5 : vector<1x256xf32> to vector<304x256xf32>
    %7 = arith.addf %4, %6 : vector<304x256xf32>
    %cst_7 = arith.constant dense<0.000000e+00> : vector<304xf32>
    %8 = vector.multi_reduction <add>, %7, %cst_7 [1] : vector<304x256xf32> to vector<304xf32>
    %9 = vector.shape_cast %8 : vector<304xf32> to vector<304x1xf32>
    %cst_8 = arith.constant 3.906250e-03 : f32
    %10 = vector.broadcast %cst_8 : f32 to vector<304x1xf32>
    %11 = arith.mulf %9, %10 : vector<304x1xf32>
    %12 = arith.mulf %7, %7 : vector<304x256xf32>
    %cst_9 = arith.constant dense<0.000000e+00> : vector<304xf32>
    %13 = vector.multi_reduction <add>, %12, %cst_9 [1] : vector<304x256xf32> to vector<304xf32>
    %14 = vector.shape_cast %13 : vector<304xf32> to vector<304x1xf32>
    %cst_10 = arith.constant 3.906250e-03 : f32
    %15 = vector.broadcast %cst_10 : f32 to vector<304x1xf32>
    %16 = arith.mulf %14, %15 : vector<304x1xf32>
    %17 = arith.mulf %11, %11 : vector<304x1xf32>
    %18 = arith.subf %16, %17 : vector<304x1xf32>
    %cst_11 = arith.constant 9.99999974E-6 : f32
    %19 = vector.broadcast %cst_11 : f32 to vector<304x1xf32>
    %20 = arith.addf %18, %19 : vector<304x1xf32>
    %21 = math.rsqrt %20 : vector<304x1xf32>
    %c0_12 = arith.constant 0 : index
    %c0_13 = arith.constant 0 : index
    %22 = vector.load %arg5[%c0_12, %c0_13] : memref<1x256xf32, #tpu.memory_space<vmem>>, vector<1x256xf32>
    %23 = vector.broadcast %22 : vector<1x256xf32> to vector<304x256xf32>
    %24 = vector.broadcast %21 : vector<304x1xf32> to vector<304x256xf32>
    %25 = arith.mulf %23, %24 : vector<304x256xf32>
    %c0_14 = arith.constant 0 : index
    %c0_15 = arith.constant 0 : index
    %26 = vector.load %arg6[%c0_14, %c0_15] : memref<1x256xf32, #tpu.memory_space<vmem>>, vector<1x256xf32>
    %27 = vector.broadcast %11 : vector<304x1xf32> to vector<304x256xf32>
    %28 = arith.mulf %27, %25 : vector<304x256xf32>
    %29 = vector.broadcast %26 : vector<1x256xf32> to vector<304x256xf32>
    %30 = arith.subf %29, %28 : vector<304x256xf32>
    %31 = arith.mulf %7, %25 : vector<304x256xf32>
    %32 = arith.addf %31, %30 : vector<304x256xf32>
    %cst_16 = arith.constant 0.000000e+00 : f32
    %33 = vector.broadcast %cst_16 : f32 to vector<304x256xf32>
    %34 = arith.maximumf %32, %33 : vector<304x256xf32>
    %c0_17 = arith.constant 0 : index
    %c0_18 = arith.constant 0 : index
    %35 = vector.load %arg7[%c0_17, %c0_18] : memref<256x128xf32, #tpu.memory_space<vmem>>, vector<256x128xf32>
    %cst_19 = arith.constant dense<0.000000e+00> : vector<304x128xf32>
    %36 = tpu.matmul %34, %35, %cst_19 {dimension_numbers = #tpu.dot_dimension_numbers<[1], [0], [0], [1], [0, 0, 1, 1], [], []>} : vector<304x256xf32>, vector<256x128xf32>, vector<304x128xf32> -> vector<304x128xf32>
    %c0_20 = arith.constant 0 : index
    %c0_21 = arith.constant 0 : index
    %37 = vector.load %arg8[%c0_20, %c0_21] : memref<1x128xf32, #tpu.memory_space<vmem>>, vector<1x128xf32>
    %38 = vector.broadcast %37 : vector<1x128xf32> to vector<304x128xf32>
    %39 = arith.addf %36, %38 : vector<304x128xf32>
    %c0_22 = arith.constant 0 : index
    %c0_23 = arith.constant 0 : index
    %40 = vector.load %arg1[%c0_22, %c0_23] : memref<304x128xf32, #tpu.memory_space<vmem>>, vector<304x128xf32>
    %41 = arith.addf %39, %40 : vector<304x128xf32>
    %c0_24 = arith.constant 0 : index
    %c0_25 = arith.constant 0 : index
    %42 = vector.load %arg9[%c0_24, %c0_25] : memref<304x128xf32, #tpu.memory_space<vmem>>, vector<304x128xf32>
    tpu.vector_store %arg9[%c0_24, %c0_25], %41 {strides = array<i32>} : memref<304x128xf32, #tpu.memory_space<vmem>>, vector<304x128xf32>,
    return
  }
  func.func @transform_0(%arg0: i32) -> (i32, i32) {
    %c0_i32 = arith.constant 0 : i32
    %c0_i32_0 = arith.constant 0 : i32
    return %arg0, %c0_i32 : i32, i32
  }
  func.func @transform_1(%arg0: i32) -> (i32, i32) {
    %c0_i32 = arith.constant 0 : i32
    %c0_i32_0 = arith.constant 0 : i32
    return %arg0, %c0_i32 : i32, i32
  }
  func.func @transform_2(%arg0: i32) -> (i32, i32) {
    %c0_i32 = arith.constant 0 : i32
    %c0_i32_0 = arith.constant 0 : i32
    %c0_i32_1 = arith.constant 0 : i32
    return %c0_i32, %c0_i32_0 : i32, i32
  }
  func.func @transform_3(%arg0: i32) -> (i32, i32) {
    %c0_i32 = arith.constant 0 : i32
    %c0_i32_0 = arith.constant 0 : i32
    %c0_i32_1 = arith.constant 0 : i32
    return %c0_i32, %c0_i32_0 : i32, i32
  }
  func.func @transform_4(%arg0: i32) -> (i32, i32) {
    %c0_i32 = arith.constant 0 : i32
    %c0_i32_0 = arith.constant 0 : i32
    %c0_i32_1 = arith.constant 0 : i32
    return %c0_i32, %c0_i32_0 : i32, i32
  }
  func.func @transform_5(%arg0: i32) -> (i32, i32) {
    %c0_i32 = arith.constant 0 : i32
    %c0_i32_0 = arith.constant 0 : i32
    %c0_i32_1 = arith.constant 0 : i32
    return %c0_i32, %c0_i32_0 : i32, i32
  }
  func.func @transform_6(%arg0: i32) -> (i32, i32) {
    %c0_i32 = arith.constant 0 : i32
    %c0_i32_0 = arith.constant 0 : i32
    %c0_i32_1 = arith.constant 0 : i32
    return %c0_i32, %c0_i32_0 : i32, i32
  }
  func.func @transform_7(%arg0: i32) -> (i32, i32) {
    %c0_i32 = arith.constant 0 : i32
    %c0_i32_0 = arith.constant 0 : i32
    %c0_i32_1 = arith.constant 0 : i32
    return %c0_i32, %c0_i32_0 : i32, i32
  }
  func.func @transform_8(%arg0: i32) -> (i32, i32) {
    %c0_i32 = arith.constant 0 : i32
    %c0_i32_0 = arith.constant 0 : i32
    return %arg0, %c0_i32 : i32, i32
  }
}

</mosaic_0001>

<bundles_post_ra>
// kernel: tpu_custom_call.1
= control target key start
LH: loop header
LB: loop body
LE: loop exit
PB: predicated region body
PF: predicated region fallthrough
CT: control target
= control target key end

     0   :  { %s5525_s0 = inlined_call_operand.hbm [shape: f32[608,128], index: 0, kind: input, shape index: {}]   ;;  %s5526_s1 = inlined_call_operand.hbm [shape: f32[608,128], index: 1, kind: input, shape index: {}]   ;;  %s5527_s2 = inlined_call_operand.hbm [shape: f32[256,256], index: 2, kind: input, shape index: {}]   ;;  %s5528_s3 = inlined_call_operand.vmem [shape: f32[1,256], index: 3, kind: input, shape index: {}]   ;;  %s5529_s4 = inlined_call_operand.hbm [shape: f32[1,256], index: 4, kind: input, shape index: {}]   ;;  %s5530_s5 = inlined_call_operand.vmem [shape: f32[1,256], index: 5, kind: input, shape index: {}]   ;;  %s5531_s6 = inlined_call_operand.hbm [shape: f32[256,128], index: 6, kind: input, shape index: {}]   ;;  %s5532_s7 = inlined_call_operand.vmem [shape: f32[1,128], index: 7, kind: input, shape index: {}]   ;;  %s5533_s8 = inlined_call_operand.hbm [shape: f32[608,128], index: 8, kind: output, shape index: {}]  }
   0x1   :  { %5590 = sst [smem:[#allocation58_spill]] %s5527_s2 }
   0x2   :  { %5591 = sst [smem:[#allocation59_spill]] %s5529_s4 }
   0x3   :  { %5592 = sst [smem:[#allocation60_spill]] %s5531_s6 }
   0x4   :  { %13 = vsyncpa [#allocation3], 0 }
   0x5   :  { %15 = vsyncpa [#allocation3 + $0x1], 0 }
   0x6   :  { %16 = vsyncpa [#allocation6], 0 }
   0x7   :  { %18 = vsyncpa [#allocation6 + $0x1], 0 }
   0x8   :  { %19 = vsyncpa [#allocation9], 0 }
   0x9   :  { %20 = vsyncpa [#allocation4], 0 }
   0xa   :  { %22 = vsyncpa [#allocation4 + $0x1], 0  ;;  %s3499_s27 = smov 0   ;;  %s3501_s28 = smov 0  }
   0xb   :  { %s3503_s29 = smov 0   ;;  %s3505_s30 = smov 0  }
   0xc LB: > { %5593 = sst [smem:[#allocation17_spill]] %s3439_s29  ;;  %s3520_s9 = sadd.s32 4294967295, %s3443_s30   ;;  %s3443_s30 = sphi %s3505_s30, %s5702_s30   ;;  %s3439_s29 = sphi %s3503_s29, %s5704_s29   ;;  %s3435_s28 = sphi %s3501_s28, %s5706_s28   ;;  %s3431_s27 = sphi %s3499_s27, %s5705_s27  }
   0xd   : > { %s2944_s10 = sadd.s32 4294967294, %s3443_s30   ;;  %p48_p0 = scmp.ne.s32.totalorder %s3435_s28, %s3431_s27 }
   0xe   : > { %p49_p1 = scmp.eq.s32.totalorder %s3520_s9, 0  ;;  %p224_p2 = scmp.eq.s32.totalorder %s3520_s9, 1 }
   0xf   : > { %p230_p3 = scmp.eq.s32.totalorder %s2944_s10, 1  ;;  %p2945_p5 = scmp.ge.s32.totalorder %s3443_s30, 1 }
  0x10   : > { %p3529_p4 = por %p49_p1, %p48_p0  ;;  %p237_p7 = scmp.lt.s32.totalorder %s3443_s30, 3 }
  0x11   : > { %p3534_p6 = por %p230_p3, %p48_p0  ;;  %s5597_s2 = sld [smem:[#allocation58_spill]] }
  0x12   : > { %p3542_p8 = pnand %p2945_p5, %p237_p7  ;;  %s3445_s17 = smov [#allocation7]  }
  0x13   : > { %s5595_s12 = scalar_select %p3534_p6, 1, 0 }
  0x14   : > { %p3015_p9 = pneg %p3542_p8  ;;  %s250_s18 = sshll.u32 %s3445_s17, 4  ;;  %s251_s18 = int_to_ptr.vmem [resolvable:$true] %s250_s18 }
  0x15   : > { %5596 = sst [smem:[#allocation18_spill]] %s5595_s12  ;;  %s3446_s23 = smov 256  }
  0x16   : > { %p3550_p10 = pnand %p3015_p9, %p49_p1  ;;  %s5600_s4 = sld [smem:[#allocation59_spill]] }
  0x17   : > { %s248_s15 = sshll.u32 %s5597_s2, 4  ;;  %s3447_s24 = smov 16   ;;  %s249_s15 = int_to_ptr.hbm [resolvable:$true] %s248_s15 }
  0x18   : > { %3018 = dma.hbm_to_vmem [thread:$0]  (!%p3550_p10), %s249_s15, 8192, %s251_s18, [#allocation6], %s3446_s23, %s3446_s23, %s3447_s24  }
  0x19   : > { %s3448_s25 = smov [#allocation8]   ;;  %s5601_s6 = sld [smem:[#allocation60_spill]] }
  0x1a   : > { %s268_s26 = sshll.u32 %s3448_s25, 4  ;;  %s3449_s17 = smov [#allocation10]   ;;  %s269_s26 = int_to_ptr.vmem [resolvable:$true] %s268_s26 }
  0x1b   : > { %s282_s20 = sshll.u32 %s3449_s17, 4  ;;  %s5534_s15 = smov 128   ;;  %s283_s20 = int_to_ptr.vmem [resolvable:$true] %s282_s20 }
  0x1c   : > { %s266_s22 = sshll.u32 %s5600_s4, 4  ;;  %s5536_s18 = smov 8   ;;  %s267_s22 = int_to_ptr.hbm [resolvable:$true] %s266_s22 }
  0x1d   : > { %3021 = dma.hbm_to_vmem [thread:$0]  (!%p3550_p10), %s267_s22, 32, %s269_s26, [#allocation9]  }
  0x1e   : > { %s3571_s21 = sadd.s32 1, %s3443_s30   ;;  %s35_s24 = sadd.s32 1, %s3439_s29 }
  0x1f   : > { %s280_s14 = sshll.u32 %s5601_s6, 4  ;;  %5602 = sst [smem:[#allocation19_spill]] %s3571_s21  ;;  %s281_s14 = int_to_ptr.hbm [resolvable:$true] %s280_s14 }
  0x20   : > { %3024 = dma.hbm_to_vmem [thread:$0]  (!%p3550_p10), %s281_s14, 4096, %s283_s20, [#allocation9], %s5534_s15, %s5534_s15, %s5536_s18  }
  0x21   : > { %s32_s23 = ssub.s32 %s3443_s30, %s3571_s21  ;;  %p42_p13 = scmp.ne.s32.totalorder %s3439_s29, %s3435_s28 }
  0x22   : > { %p33_p12 = scmp.eq.s32.totalorder %s32_s23, 0  ;;  %p43_p0 = scmp.eq.s32.totalorder %s3443_s30, 0 }
  0x23   : > { %p3039_p3 = scmp.lt.s32.totalorder %s3443_s30, 2  ;;  %p3585_p7 = por %p224_p2, %p42_p13 }
  0x24   : > { %s3581_s22 = scalar_select %p33_p12, %s3439_s29, %s35_s24  }
  0x25   : > { %p44_p5 = por %p43_p0, %p42_p13  ;;  %s299_s19 = sand.u32 1, %s3439_s29  }
  0x26   : > { %5603 = sst [smem:[#allocation20_spill]] %s3581_s22  ;;  %s2959_s26 = smul.u32 304, %s3443_s30 }
  0x27   : > { %s2994_s10 = smul.u32 304, %s299_s19  ;;  %p3594_p9 = pnand %p3039_p3, %p44_p5 }
  0x28   : > { %s308_s17 = scalar_lea.hbm %s5525_s0, %s2959_s26  ;;  %s300_s18 = scalar_lea.sflag [#allocation3], %s299_s19 }
  0x29   : > { %s309_s23 = sshll.u32 %s308_s17, 4  ;;  %s303_s24 = scalar_lea.vmem [#allocation2], %s2994_s10  ;;  %s310_s23 = int_to_ptr.hbm [resolvable:$true] %s309_s23 }
  0x2a   : > { %s311_s15 = sshll.u32 %s303_s24, 4  ;;  %s3305_s2 = sshra.s32 %s310_s23, 4  ;;  %s312_s15 = int_to_ptr.vmem [resolvable:$true] %s311_s15  ;;  %s3306_s2 = int_to_ptr.hbm [resolvable:$true] %s3305_s2 }
  0x2b   : > { %s3307_s4 = scalar_lea.hbm %s3306_s2, 304  ;;  %p3309_p10 = pneg %p3594_p9 }
  0x2c   : > { %p3308_p2 = scmp.ne.s32.totalorder %s3306_s2, %s3307_s4  ;;  %s3312_s6 = scalar_lea.hbm %s5525_s0, 608 }
  0x2d   : > { %p3313_p0 = scmp.lt.s32.totalorder %s3306_s2, %s5525_s0  ;;  %p3314_p3 = scmp.lt.s32.totalorder %s3312_s6, %s3307_s4 }
  0x2e   : > { %p3310_p12 = pnand %p3309_p10, %p3308_p2 }
  0x2f   : > { %p3315_p5 = por %p3314_p3, %p3313_p0 }
  0x30   : > { %p3311_p13 = pneg %p3310_p12 }
  0x32   : > { %p3316_p11 = pnand %p3315_p5, %p3311_p13 }
  0x34   : > { %3319 = shalt.err (!%p3316_p11)
}
  0x35   : > { %s5606_s19 = smov 8   ;;  %s5607_s24 = smov 128  }
  0x36   : > { %3028 = dma.hbm_to_vmem [thread:$0]  (!%p3594_p9), %s310_s23, 4864, %s312_s15, %s300_s18, %s5607_s24, %s5607_s24, %s5606_s19  }
  0x37   : > { %s321_s29 = sand.u32 1, %s3443_s30   ;;  %s330_s14 = scalar_lea.hbm %s5526_s1, %s2959_s26 }
  0x38   : > { %s331_s12 = sshll.u32 %s330_s14, 4  ;;  %s325_s22 = scalar_lea.vmem [#allocation5], %s2994_s10  ;;  %s332_s12 = int_to_ptr.hbm [resolvable:$true] %s331_s12 }
  0x39   : > { %s333_s2 = sshll.u32 %s325_s22, 4  ;;  %s322_s4 = scalar_lea.sflag [#allocation6], %s321_s29  ;;  %s334_s2 = int_to_ptr.vmem [resolvable:$true] %s333_s2 }
  0x3a   : > { %s3335_s6 = sshra.s32 %s332_s12, 4  ;;  %s3342_s23 = scalar_lea.hbm %s5526_s1, 608  ;;  %s3336_s6 = int_to_ptr.hbm [resolvable:$true] %s3335_s6 }
  0x3b   : > { %s3337_s17 = scalar_lea.hbm %s3336_s6, 304  ;;  %p3343_p13 = scmp.lt.s32.totalorder %s3336_s6, %s5526_s1 }
  0x3c   : > { %p3338_p11 = scmp.ne.s32.totalorder %s3336_s6, %s3337_s17  ;;  %p3344_p0 = scmp.lt.s32.totalorder %s3342_s23, %s3337_s17 }
  0x3e   : > { %p3340_p2 = pnand %p3338_p11, %p3309_p10  ;;  %p3345_p3 = por %p3344_p0, %p3343_p13 }
  0x40   : > { %p3341_p12 = pneg %p3340_p2 }
  0x42   : > { %p3346_p5 = pnand %p3345_p3, %p3341_p12 }
  0x44   : > { %3349 = shalt.err (!%p3346_p5)
}
  0x45   : > { %3031 = dma.hbm_to_vmem [thread:$0]  (!%p3594_p9), %s332_s12, 4864, %s334_s2, %s322_s4, %s5607_s24, %s5607_s24, %s5606_s19  }
  0x46   : > { %345 = sbr.rel (%p3542_p8) target bundleno = 1002 (0x3ea), region = 52 }
  0x4b   : > { %s3635_s29 = sand.u32 1, %s3435_s28  }
  0x4c   : > { %s3638_s10 = smul.u32 304, %s3635_s29  ;;  %s348_s13 = scalar_lea.sflag [#allocation3], %s3635_s29 }
  0x4e   : > { %s3642_s14 = scalar_lea.vmem [#allocation2], %s3638_s10 }
  0x4f   : > { %3410 = dma.done.wait (%p3529_p4), %s348_s13, 4864  }
  0x50   : > { %3412 = vsyncadd (%p3529_p4), %s348_s13, 4294962432  ;;  %s357_s12 = sand.u32 1, %s3520_s9   ;;  %s3650_s20 = scalar_lea.vmem [#allocation5], %s3638_s10 }
  0x51   : > { %s358_s16 = scalar_lea.sflag [#allocation6], %s357_s12 }
  0x52   : > { %3414 = dma.done.wait (%p3529_p4), %s358_s16, 4864  }
  0x53   : > { %3416 = vsyncadd (%p3529_p4), %s358_s16, 4294962432 }
  0x54   : > { %3418 = dma.done.wait (%p49_p1), [#allocation6], 8192  }
  0x55   : > { %3420 = vsyncadd (%p49_p1), [#allocation6], 4294959104 }
  0x56   : > { %3422 = dma.done.wait (%p49_p1), [#allocation9], 4128  }
  0x57   : > { %3424 = vsyncadd (%p49_p1), [#allocation9], 4294963168  ;;  %v524_v0 = vld [vmem:[#allocation7 + $0xf0] sm:$0xff]  ;;  %v522_v1 = vld [vmem:[#allocation7 + $0xe0] sm:$0xff]  ;;  %s4941_s6 = scalar_lea.vmem [#allocation11], %s3638_s10  ;;  %s2961_s18 = smul.u32 304, %s3520_s9 }
  0x58   : > { %v556_v2 = vld [vmem:[#allocation7 + $0x1f0] sm:$0xff]  ;;  %2962 = vmatpush.msra.mxu2 %v524_v0  ;;  %v554_v3 = vld [vmem:[#allocation7 + $0x1e0] sm:$0xff]  ;;  %564 = vmatpush.msra.mxu0 %v524_v0  ;;  %v3665_v32 = vld [vmem:[%s3642_s14 + $0x98] sm:$0xff]  ;;  %s2817_s10 = sshll.u32 %s4941_s6, 4  ;;  %s2805_s9 = scalar_lea.sflag [#allocation4], %s3635_s29  ;;  %s2818_s10 = int_to_ptr.vmem [resolvable:$true] %s2817_s10 }
  0x59   : > { %2978 = vmatpush.msra.mxu3 %v556_v2  ;;  %v520_v4 = vld [vmem:[#allocation7 + $0xd0] sm:$0xff]  ;;  %695 = vmatpush.msra.mxu1 %v556_v2  ;;  %v518_v6 = vld [vmem:[#allocation7 + $0xc0] sm:$0xff]  ;;  %v3668_v33 = vld [vmem:[%s3650_s20 + $0x98] sm:$0xff]  ;;  %s2816_s26 = scalar_lea.hbm %s5533_s8, %s2961_s18  ;;  %s3385_s19 = scalar_lea.hbm %s5533_s8, 608 }
  0x5a   : > { %v552_v5 = vld [vmem:[#allocation7 + $0x1d0] sm:$0xff]  ;;  %2963 = vmatpush.msra.mxu2 %v522_v1  ;;  %v550_v7 = vld [vmem:[#allocation7 + $0x1c0] sm:$0xff]  ;;  %565 = vmatpush.msra.mxu0 %v522_v1  ;;  %v525_v34 = vld [vmem:[#allocation7 + $0xf8] sm:$0xff]  ;;  %s2819_s13 = sshll.u32 %s2816_s26, 4  ;;  %s2820_s13 = int_to_ptr.hbm [resolvable:$true] %s2819_s13 }
  0x5b   : > { %2979 = vmatpush.msra.mxu3 %v554_v3  ;;  %696 = vmatpush.msra.mxu1 %v554_v3  ;;  %v516_v8 = vld [vmem:[#allocation7 + $0xb0] sm:$0xff]  ;;  %v514_v10 = vld [vmem:[#allocation7 + $0xa0] sm:$0xff]  ;;  %v557_v35 = vld [vmem:[#allocation7 + $0x1f8] sm:$0xff]  ;;  %s3379_s12 = sshra.s32 %s2820_s13, 4  ;;  %s3380_s12 = int_to_ptr.hbm [resolvable:$true] %s3379_s12 }
  0x5c   : > { %2964 = vmatpush.msra.mxu2 %v520_v4  ;;  %v548_v9 = vld [vmem:[#allocation7 + $0x1b0] sm:$0xff]  ;;  %566 = vmatpush.msra.mxu0 %v520_v4  ;;  %v546_v11 = vld [vmem:[#allocation7 + $0x1a0] sm:$0xff]  ;;  %v523_v36 = vld [vmem:[#allocation7 + $0xe8] sm:$0xff]  ;;  %s3381_s16 = scalar_lea.hbm %s3380_s12, 304  ;;  %p3386_p9 = scmp.lt.s32.totalorder %s3380_s12, %s5533_s8 }
  0x5d   : > { %2980 = vmatpush.msra.mxu3 %v552_v5  ;;  %697 = vmatpush.msra.mxu1 %v552_v5  ;;  %v512_v12 = vld [vmem:[#allocation7 + $0x90] sm:$0xff]  ;;  %v510_v14 = vld [vmem:[#allocation7 + $0x80] sm:$0xff]  ;;  %v555_v37 = vld [vmem:[#allocation7 + $0x1e8] sm:$0xff]  ;;  %p3382_p1 = scmp.ne.s32.totalorder %s3380_s12, %s3381_s16  ;;  %p3387_p10 = scmp.lt.s32.totalorder %s3385_s19, %s3381_s16 }
  0x5e   : > { %2965 = vmatpush.msra.mxu2 %v518_v6  ;;  %567 = vmatpush.msra.mxu0 %v518_v6  ;;  %v544_v13 = vld [vmem:[#allocation7 + $0x190] sm:$0xff]  ;;  %v542_v15 = vld [vmem:[#allocation7 + $0x180] sm:$0xff]  ;;  %v521_v38 = vld [vmem:[#allocation7 + $0xd8] sm:$0xff] }
  0x5f   : > { %2981 = vmatpush.msra.mxu3 %v550_v7  ;;  %698 = vmatpush.msra.mxu1 %v550_v7  ;;  %v508_v16 = vld [vmem:[#allocation7 + $0x70] sm:$0xff]  ;;  %v506_v18 = vld [vmem:[#allocation7 + $0x60] sm:$0xff]  ;;  %v553_v39 = vld [vmem:[#allocation7 + $0x1d8] sm:$0xff]  ;;  %p3383_p4 = pnand %p3382_p1, %p3585_p7  ;;  %p3388_p11 = por %p3387_p10, %p3386_p9 }
  0x60   : > { %2966 = vmatpush.msra.mxu2 %v516_v8  ;;  %568 = vmatpush.msra.mxu0 %v516_v8  ;;  %v540_v17 = vld [vmem:[#allocation7 + $0x170] sm:$0xff]  ;;  %v538_v19 = vld [vmem:[#allocation7 + $0x160] sm:$0xff]  ;;  %v519_v40 = vld [vmem:[#allocation7 + $0xc8] sm:$0xff] }
  0x61   : > { %2982 = vmatpush.msra.mxu3 %v548_v9  ;;  %699 = vmatpush.msra.mxu1 %v548_v9  ;;  %v504_v20 = vld [vmem:[#allocation7 + $0x50] sm:$0xff]  ;;  %v502_v22 = vld [vmem:[#allocation7 + $0x40] sm:$0xff]  ;;  %v551_v41 = vld [vmem:[#allocation7 + $0x1c8] sm:$0xff]  ;;  %p3384_p8 = pneg %p3383_p4 }
  0x62   : > { %2967 = vmatpush.msra.mxu2 %v514_v10  ;;  %569 = vmatpush.msra.mxu0 %v514_v10  ;;  %v536_v21 = vld [vmem:[#allocation7 + $0x150] sm:$0xff]  ;;  %v534_v23 = vld [vmem:[#allocation7 + $0x140] sm:$0xff]  ;;  %v517_v44 = vld [vmem:[#allocation7 + $0xb8] sm:$0xff] }
  0x63   : > { %2983 = vmatpush.msra.mxu3 %v546_v11  ;;  %700 = vmatpush.msra.mxu1 %v546_v11  ;;  %v500_v24 = vld [vmem:[#allocation7 + $0x30] sm:$0xff]  ;;  %v498_v26 = vld [vmem:[#allocation7 + $0x20] sm:$0xff]  ;;  %v549_v45 = vld [vmem:[#allocation7 + $0x1b8] sm:$0xff]  ;;  %p3389_p2 = pnand %p3388_p11, %p3384_p8 }
  0x64   : > { %2968 = vmatpush.msra.mxu2 %v512_v12  ;;  %570 = vmatpush.msra.mxu0 %v512_v12  ;;  %v532_v25 = vld [vmem:[#allocation7 + $0x130] sm:$0xff]  ;;  %v530_v27 = vld [vmem:[#allocation7 + $0x120] sm:$0xff]  ;;  %v3681_v46 = vld [vmem:[%s3642_s14 + $0xa8] sm:$0xff] }
  0x65   : > { %2984 = vmatpush.msra.mxu3 %v544_v13  ;;  %701 = vmatpush.msra.mxu1 %v544_v13  ;;  %v496_v28 = vld [vmem:[#allocation7 + $0x10] sm:$0xff]  ;;  %v494_v30 = vld [vmem:[#allocation7] sm:$0xff]  ;;  %v3684_v47 = vld [vmem:[%s3650_s20 + $0xa8] sm:$0xff] }
  0x66   : > { %2969 = vmatpush.msra.mxu2 %v510_v14  ;;  %571 = vmatpush.msra.mxu0 %v510_v14  ;;  %v528_v29 = vld [vmem:[#allocation7 + $0x110] sm:$0xff]  ;;  %v526_v31 = vld [vmem:[#allocation7 + $0x100] sm:$0xff]  ;;  %v515_v48 = vld [vmem:[#allocation7 + $0xa8] sm:$0xff] }
  0x67   : > { %2985 = vmatpush.msra.mxu3 %v542_v15  ;;  %702 = vmatpush.msra.mxu1 %v542_v15  ;;  %v3673_v42 = vld [vmem:[%s3642_s14 + $0xa0] sm:$0xff]  ;;  %v547_v49 = vld [vmem:[#allocation7 + $0x1a8] sm:$0xff]  ;;  %v3689_v50 = vld [vmem:[%s3642_s14 + $0xb0] sm:$0xff] }
  0x68   : > { %2970 = vmatpush.msra.mxu2 %v508_v16  ;;  %572 = vmatpush.msra.mxu0 %v508_v16  ;;  %v3676_v43 = vld [vmem:[%s3650_s20 + $0xa0] sm:$0xff]  ;;  %v3692_v51 = vld [vmem:[%s3650_s20 + $0xb0] sm:$0xff]  ;;  %v513_v52 = vld [vmem:[#allocation7 + $0x98] sm:$0xff] }
  0x69   : > { %2986 = vmatpush.msra.mxu3 %v540_v17  ;;  %703 = vmatpush.msra.mxu1 %v540_v17  ;;  %v545_v53 = vld [vmem:[#allocation7 + $0x198] sm:$0xff]  ;;  %v511_v56 = vld [vmem:[#allocation7 + $0x88] sm:$0xff]  ;;  %v3705_v58 = vld [vmem:[%s3642_s14 + $0xc0] sm:$0xff] }
  0x6a   : > { %2971 = vmatpush.msra.mxu2 %v506_v18  ;;  %573 = vmatpush.msra.mxu0 %v506_v18  ;;  %v3697_v54 = vld [vmem:[%s3642_s14 + $0xb8] sm:$0xff]  ;;  %v3708_v59 = vld [vmem:[%s3650_s20 + $0xc0] sm:$0xff]  ;;  %v3713_v62 = vld [vmem:[%s3642_s14 + $0xc8] sm:$0xff] }
  0x6b   : > { %2987 = vmatpush.msra.mxu3 %v538_v19  ;;  %704 = vmatpush.msra.mxu1 %v538_v19  ;;  %v3700_v55 = vld [vmem:[%s3650_s20 + $0xb8] sm:$0xff]  ;;  %v3716_v63 = vld [vmem:[%s3650_s20 + $0xc8] sm:$0xff]  ;;  %v3721_v1 = vld [vmem:[%s3642_s14 + $0xd0] sm:$0xff] }
  0x6c   : > { %2972 = vmatpush.msra.mxu2 %v504_v20  ;;  %574 = vmatpush.msra.mxu0 %v504_v20  ;;  %v543_v57 = vld [vmem:[#allocation7 + $0x188] sm:$0xff]  ;;  %v509_v60 = vld [vmem:[#allocation7 + $0x78] sm:$0xff]  ;;  %v3724_v2 = vld [vmem:[%s3650_s20 + $0xd0] sm:$0xff] }
  0x6d   : > { %2988 = vmatpush.msra.mxu3 %v536_v21  ;;  %705 = vmatpush.msra.mxu1 %v536_v21  ;;  %v541_v61 = vld [vmem:[#allocation7 + $0x178] sm:$0xff]  ;;  %v507_v0 = vld [vmem:[#allocation7 + $0x68] sm:$0xff]  ;;  %v3737_v8 = vld [vmem:[%s3642_s14 + $0xe0] sm:$0xff] }
  0x6e   : > { %2973 = vmatpush.msra.mxu2 %v502_v22  ;;  %575 = vmatpush.msra.mxu0 %v502_v22  ;;  %v539_v3 = vld [vmem:[#allocation7 + $0x168] sm:$0xff]  ;;  %v505_v4 = vld [vmem:[#allocation7 + $0x58] sm:$0xff]  ;;  %v3740_v9 = vld [vmem:[%s3650_s20 + $0xe0] sm:$0xff] }
  0x6f   : > { %2989 = vmatpush.msra.mxu3 %v534_v23  ;;  %706 = vmatpush.msra.mxu1 %v534_v23  ;;  %v3729_v5 = vld [vmem:[%s3642_s14 + $0xd8] sm:$0xff]  ;;  %v3745_v12 = vld [vmem:[%s3642_s14 + $0xe8] sm:$0xff]  ;;  %v3753_v16 = vld [vmem:[%s3642_s14 + $0xf0] sm:$0xff] }
  0x70   : > { %2974 = vmatpush.msra.mxu2 %v500_v24  ;;  %576 = vmatpush.msra.mxu0 %v500_v24  ;;  %v3732_v6 = vld [vmem:[%s3650_s20 + $0xd8] sm:$0xff]  ;;  %v3748_v13 = vld [vmem:[%s3650_s20 + $0xe8] sm:$0xff]  ;;  %v3756_v17 = vld [vmem:[%s3650_s20 + $0xf0] sm:$0xff] }
  0x71   : > { %2990 = vmatpush.msra.mxu3 %v532_v25  ;;  %707 = vmatpush.msra.mxu1 %v532_v25  ;;  %v537_v7 = vld [vmem:[#allocation7 + $0x158] sm:$0xff]  ;;  %v503_v10 = vld [vmem:[#allocation7 + $0x48] sm:$0xff]  ;;  %v450_v22 = vld [vmem:[%s3642_s14 + $0x100] sm:$0xff] }
  0x72   : > { %2975 = vmatpush.msra.mxu2 %v498_v26  ;;  %577 = vmatpush.msra.mxu0 %v498_v26  ;;  %v535_v11 = vld [vmem:[#allocation7 + $0x148] sm:$0xff]  ;;  %v501_v14 = vld [vmem:[#allocation7 + $0x38] sm:$0xff]  ;;  %v488_v23 = vld [vmem:[%s3650_s20 + $0x100] sm:$0xff] }
  0x73   : > { %2991 = vmatpush.msra.mxu3 %v530_v27  ;;  %708 = vmatpush.msra.mxu1 %v530_v27  ;;  %v533_v15 = vld [vmem:[#allocation7 + $0x138] sm:$0xff]  ;;  %v499_v18 = vld [vmem:[#allocation7 + $0x28] sm:$0xff] }
  0x74   : > { %2976 = vmatpush.msra.mxu2 %v496_v28  ;;  %578 = vmatpush.msra.mxu0 %v496_v28  ;;  %v531_v19 = vld [vmem:[#allocation7 + $0x128] sm:$0xff]  ;;  %v497_v24 = vld [vmem:[#allocation7 + $0x18] sm:$0xff] }
  0x75   : > { %2992 = vmatpush.msra.mxu3 %v528_v29  ;;  %709 = vmatpush.msra.mxu1 %v528_v29  ;;  %v449_v20 = vld [vmem:[%s3642_s14 + $0xf8] sm:$0xff]  ;;  %v451_v26 = vld [vmem:[%s3642_s14 + $0x108] sm:$0xff] }
  0x76   : > { %2977 = vmatpush.msra.mxu2 %v494_v30  ;;  %579 = vmatpush.msra.mxu0 %v494_v30  ;;  %v487_v21 = vld [vmem:[%s3650_s20 + $0xf8] sm:$0xff]  ;;  %v489_v27 = vld [vmem:[%s3650_s20 + $0x108] sm:$0xff]  ;;  %v452_v30 = vld [vmem:[%s3642_s14 + $0x110] sm:$0xff] }
  0x77   : > { %2993 = vmatpush.msra.mxu3 %v526_v31  ;;  %637 = vmatmul.f32.vlgmr.msra.gmra.mxu2 %v3665_v32  ;;  %v529_v25 = vld [vmem:[#allocation7 + $0x118] sm:$0xff]  ;;  %v495_v28 = vld [vmem:[#allocation7 + $0x8] sm:$0xff] }
  0x78   : > { %768 = vmatmul.f32.vlgmr.msra.gmra.mxu3 %v3668_v33  ;;  %826 = vmatpush.msrb.mxu2 %v525_v34  ;;  %v527_v29 = vld [vmem:[#allocation7 + $0x108] sm:$0xff]  ;;  %v418_v34 = vld [vmem:[%s3642_s14] sm:$0xff] }
  0x79   : > { %957 = vmatpush.msrb.mxu3 %v557_v35  ;;  %710 = vmatpush.msra.mxu1 %v526_v31  ;;  %v490_v31 = vld [vmem:[%s3650_s20 + $0x110] sm:$0xff]  ;;  %v456_v35 = vld [vmem:[%s3650_s20] sm:$0xff] }
  0x7a   : > { %827 = vmatpush.msrb.mxu2 %v523_v36  ;;  %580 = vmatmul.f32.vlgmr.msra.gmra.mxu0 %v418_v34  ;;  %v453_v36 = vld [vmem:[%s3642_s14 + $0x118] sm:$0xff] }
  0x7b   : > { %958 = vmatpush.msrb.mxu3 %v555_v37  ;;  %711 = vmatmul.f32.vlgmr.msra.gmra.mxu1 %v456_v35  ;;  %v491_v37 = vld [vmem:[%s3650_s20 + $0x118] sm:$0xff] }
  0x7c   : > { %828 = vmatpush.msrb.mxu2 %v521_v38  ;;  %v3775_v38 = vld [vmem:[%s5528_s3] sm:$0x3] }
  0x7d   : > { %959 = vmatpush.msrb.mxu3 %v553_v39  ;;  %v419_v39 = vld [vmem:[%s3642_s14 + $0x8] sm:$0xff] }
  0x7e   : > { %829 = vmatpush.msrb.mxu2 %v519_v40  ;;  %v3779_v40 = vperm.slane %v3775_v38, 0 }
  0x7f   : > { %960 = vmatpush.msrb.mxu3 %v551_v41  ;;  %640 = vmatmul.f32.gmra.mxu2 %v3673_v42  ;;  %v457_v41 = vld [vmem:[%s3650_s20 + $0x8] sm:$0xff] }
  0x80   : > { %771 = vmatmul.f32.gmra.mxu3 %v3676_v43  ;;  %830 = vmatpush.msrb.mxu2 %v517_v44 }
  0x81   : > { %961 = vmatpush.msrb.mxu3 %v549_v45 }
  0x82   : > { %831 = vmatpush.msrb.mxu2 %v515_v48  ;;  %583 = vmatmul.f32.gmra.mxu0 %v419_v39 }
  0x83   : > { %962 = vmatpush.msrb.mxu3 %v547_v49  ;;  %714 = vmatmul.f32.gmra.mxu1 %v457_v41  ;;  %v454_v49 = vld [vmem:[%s3642_s14 + $0x120] sm:$0xff] }
  0x84   : > { %832 = vmatpush.msrb.mxu2 %v513_v52  ;;  %v492_v52 = vld [vmem:[%s3650_s20 + $0x120] sm:$0xff] }
  0x85   : > { %963 = vmatpush.msrb.mxu3 %v545_v53 }
  0x86   : > { %833 = vmatpush.msrb.mxu2 %v511_v56  ;;  %v420_v56 = vld [vmem:[%s3642_s14 + $0x10] sm:$0xff] }
  0x87   : > { %643 = vmatmul.f32.gmra.mxu2 %v3681_v46  ;;  %964 = vmatpush.msrb.mxu3 %v543_v57  ;;  %v458_v57 = vld [vmem:[%s3650_s20 + $0x10] sm:$0xff] }
  0x88   : > { %774 = vmatmul.f32.gmra.mxu3 %v3684_v47  ;;  %834 = vmatpush.msrb.mxu2 %v509_v60 }
  0x89   : > { %965 = vmatpush.msrb.mxu3 %v541_v61 }
  0x8a   : > { %835 = vmatpush.msrb.mxu2 %v507_v0  ;;  %586 = vmatmul.f32.gmra.mxu0 %v420_v56 }
  0x8b   : > { %966 = vmatpush.msrb.mxu3 %v539_v3  ;;  %717 = vmatmul.f32.gmra.mxu1 %v458_v57  ;;  %v455_v3 = vld [vmem:[%s3642_s14 + $0x128] sm:$0xff] }
  0x8c   : > { %836 = vmatpush.msrb.mxu2 %v505_v4  ;;  %v493_v4 = vld [vmem:[%s3650_s20 + $0x128] sm:$0xff] }
  0x8d   : > { %967 = vmatpush.msrb.mxu3 %v537_v7 }
  0x8e   : > { %837 = vmatpush.msrb.mxu2 %v503_v10  ;;  %v421_v10 = vld [vmem:[%s3642_s14 + $0x18] sm:$0xff] }
  0x8f   : > { %646 = vmatmul.f32.gmra.mxu2 %v3689_v50  ;;  %968 = vmatpush.msrb.mxu3 %v535_v11  ;;  %v459_v11 = vld [vmem:[%s3650_s20 + $0x18] sm:$0xff] }
  0x90   : > { %777 = vmatmul.f32.gmra.mxu3 %v3692_v51  ;;  %838 = vmatpush.msrb.mxu2 %v501_v14 }
  0x91   : > { %969 = vmatpush.msrb.mxu3 %v533_v15 }
  0x92   : > { %839 = vmatpush.msrb.mxu2 %v499_v18  ;;  %589 = vmatmul.f32.gmra.mxu0 %v421_v10 }
  0x93   : > { %970 = vmatpush.msrb.mxu3 %v531_v19  ;;  %720 = vmatmul.f32.gmra.mxu1 %v459_v11 }
  0x94   : > { %840 = vmatpush.msrb.mxu2 %v497_v24 }
  0x95   : > { %971 = vmatpush.msrb.mxu3 %v529_v25 }
  0x96   : > { %841 = vmatpush.msrb.mxu2 %v495_v28 }
  0x97   : > { %649 = vmatmul.f32.gmra.mxu2 %v3697_v54  ;;  %972 = vmatpush.msrb.mxu3 %v527_v29 }
  0x98   : > { %780 = vmatmul.f32.gmra.mxu3 %v3700_v55 }
  0x9f   : > { %652 = vmatmul.f32.gmra.mxu2 %v3705_v58 }
  0xa0   : > { %783 = vmatmul.f32.gmra.mxu3 %v3708_v59 }
  0xa7   : > { %655 = vmatmul.f32.gmra.mxu2 %v3713_v62 }
  0xa8   : > { %786 = vmatmul.f32.gmra.mxu3 %v3716_v63 }
  0xaf   : > { %658 = vmatmul.f32.gmra.mxu2 %v3721_v1 }
  0xb0   : > { %789 = vmatmul.f32.gmra.mxu3 %v3724_v2 }
  0xb7   : > { %661 = vmatmul.f32.gmra.mxu2 %v3729_v5 }
  0xb8   : > { %792 = vmatmul.f32.gmra.mxu3 %v3732_v6 }
  0xbf   : > { %664 = vmatmul.f32.gmra.mxu2 %v3737_v8 }
  0xc0   : > { %795 = vmatmul.f32.gmra.mxu3 %v3740_v9 }
  0xc7   : > { %667 = vmatmul.f32.gmra.mxu2 %v3745_v12 }
  0xc8   : > { %798 = vmatmul.f32.gmra.mxu3 %v3748_v13 }
  0xcf   : > { %670 = vmatmul.f32.gmra.mxu2 %v3753_v16 }
  0xd0   : > { %801 = vmatmul.f32.gmra.mxu3 %v3756_v17 }
  0xd7   : > { %673 = vmatmul.f32.gmra.mxu2 %v449_v20  ;;  %v422_v20 = vld [vmem:[%s3642_s14 + $0x20] sm:$0xff] }
  0xd8   : > { %804 = vmatmul.f32.gmra.mxu3 %v487_v21  ;;  %592 = vmatmul.f32.gmra.mxu0 %v422_v20  ;;  %v460_v21 = vld [vmem:[%s3650_s20 + $0x20] sm:$0xff] }
  0xd9   : > { %723 = vmatmul.f32.gmra.mxu1 %v460_v21 }
  0xdf   : > { %676 = vmatmul.f32.gmra.mxu2 %v450_v22 }
  0xe0   : > { %807 = vmatmul.f32.gmra.mxu3 %v488_v23 }
  0xe7   : > { %679 = vmatmul.f32.gmra.mxu2 %v451_v26  ;;  %v423_v26 = vld [vmem:[%s3642_s14 + $0x28] sm:$0xff] }
  0xe8   : > { %810 = vmatmul.f32.gmra.mxu3 %v489_v27  ;;  %595 = vmatmul.f32.gmra.mxu0 %v423_v26  ;;  %v461_v27 = vld [vmem:[%s3650_s20 + $0x28] sm:$0xff] }
  0xe9   : > { %726 = vmatmul.f32.gmra.mxu1 %v461_v27 }
  0xef   : > { %682 = vmatmul.f32.gmra.mxu2 %v452_v30 }
  0xf0   : > { %813 = vmatmul.f32.gmra.mxu3 %v490_v31 }
  0xf7   : > { %685 = vmatmul.f32.gmra.mxu2 %v453_v36 }
  0xf8   : > { %816 = vmatmul.f32.gmra.mxu3 %v491_v37 }
  0xfa   : > { %v638_v44 = vpop.f32.mrf.mxu2 }
  0xfb   : > { %v769_v45 = vpop.f32.mrf.mxu3  ;;  %v639_v48 = vadd.f32 %v638_v44, %v3779_v40  ;;  %v425_v44 = vld [vmem:[%s3642_s14 + $0x38] sm:$0xff] }
  0xfd   : > { %v3785_v53 = vadd.f32 %v769_v45, %v639_v48  ;;  %v463_v45 = vld [vmem:[%s3650_s20 + $0x38] sm:$0xff] }
  0xff   : > { %5608 = vst [vmem:[#allocation21_spill] sm:$0xff] %v3785_v53  ;;  %688 = vmatmul.f32.gmra.mxu2 %v454_v49 }
 0x100   : > { %819 = vmatmul.f32.gmra.mxu3 %v492_v52 }
 0x102   : > { %v641_v60 = vpop.f32.mrf.mxu2 }
 0x103   : > { %v772_v61 = vpop.f32.mrf.mxu3  ;;  %v642_v0 = vadd.f32 %v641_v60, %v3779_v40  ;;  %v464_v60 = vld [vmem:[%s3650_s20 + $0x40] sm:$0xff] }
 0x105   : > { %v3792_v7 = vadd.f32 %v772_v61, %v642_v0 }
 0x107   : > { %691 = vmatmul.f32.gmra.mxu2 %v455_v3 }
 0x108   : > { %822 = vmatmul.f32.gmra.mxu3 %v493_v4 }
 0x10a   : > { %v644_v14 = vpop.f32.mrf.mxu2 }
 0x10b   : > { %v775_v15 = vpop.f32.mrf.mxu3  ;;  %v645_v18 = vadd.f32 %v644_v14, %v3779_v40 }
 0x10d   : > { %v3797_v19 = vadd.f32 %v775_v15, %v645_v18 }
 0x10f   : > { %5609 = vst [vmem:[#allocation22_spill] sm:$0xff] %v3797_v19  ;;  %842 = vmatmul.f32.vlgmr.msrb.gmra.mxu2 %v418_v34  ;;  %v424_v34 = vld [vmem:[%s3642_s14 + $0x30] sm:$0xff] }
 0x110   : > { %973 = vmatmul.f32.vlgmr.msrb.gmra.mxu3 %v456_v35  ;;  %598 = vmatmul.f32.gmra.mxu0 %v424_v34  ;;  %v462_v35 = vld [vmem:[%s3650_s20 + $0x30] sm:$0xff] }
 0x111   : > { %729 = vmatmul.f32.gmra.mxu1 %v462_v35 }
 0x112   : > { %v647_v22 = vpop.f32.mrf.mxu2 }
 0x113   : > { %v778_v23 = vpop.f32.mrf.mxu3  ;;  %v648_v24 = vadd.f32 %v647_v22, %v3779_v40  ;;  %v466_v22 = vld [vmem:[%s3650_s20 + $0x50] sm:$0xff] }
 0x115   : > { %v3802_v25 = vadd.f32 %v778_v23, %v648_v24 }
 0x117   : > { %845 = vmatmul.f32.gmra.mxu2 %v419_v39 }
 0x118   : > { %976 = vmatmul.f32.gmra.mxu3 %v457_v41  ;;  %601 = vmatmul.f32.gmra.mxu0 %v425_v44 }
 0x119   : > { %732 = vmatmul.f32.gmra.mxu1 %v463_v45 }
 0x11a   : > { %v650_v28 = vpop.f32.mrf.mxu2 }
 0x11b   : > { %v781_v29 = vpop.f32.mrf.mxu3  ;;  %v651_v30 = vadd.f32 %v650_v28, %v3779_v40  ;;  %v429_v28 = vld [vmem:[%s3642_s14 + $0x58] sm:$0xff] }
 0x11d   : > { %v3807_v31 = vadd.f32 %v781_v29, %v651_v30  ;;  %v467_v29 = vld [vmem:[%s3650_s20 + $0x58] sm:$0xff] }
 0x11f   : > { %848 = vmatmul.f32.gmra.mxu2 %v420_v56 }
 0x120   : > { %979 = vmatmul.f32.gmra.mxu3 %v458_v57  ;;  %v426_v57 = vld [vmem:[%s3642_s14 + $0x40] sm:$0xff] }
 0x121   : > { %604 = vmatmul.f32.gmra.mxu0 %v426_v57  ;;  %735 = vmatmul.f32.gmra.mxu1 %v464_v60 }
 0x122   : > { %v653_v36 = vpop.f32.mrf.mxu2 }
 0x123   : > { %v784_v37 = vpop.f32.mrf.mxu3  ;;  %v654_v39 = vadd.f32 %v653_v36, %v3779_v40 }
 0x125   : > { %v3812_v41 = vadd.f32 %v784_v37, %v654_v39  ;;  %v430_v37 = vld [vmem:[%s3642_s14 + $0x60] sm:$0xff] }
 0x126   : > { %v468_v39 = vld [vmem:[%s3650_s20 + $0x60] sm:$0xff] }
 0x127   : > { %851 = vmatmul.f32.gmra.mxu2 %v421_v10  ;;  %v427_v10 = vld [vmem:[%s3642_s14 + $0x48] sm:$0xff] }
 0x128   : > { %982 = vmatmul.f32.gmra.mxu3 %v459_v11  ;;  %v465_v11 = vld [vmem:[%s3650_s20 + $0x48] sm:$0xff] }
 0x129   : > { %607 = vmatmul.f32.gmra.mxu0 %v427_v10  ;;  %738 = vmatmul.f32.gmra.mxu1 %v465_v11 }
 0x12a   : > { %v656_v48 = vpop.f32.mrf.mxu2 }
 0x12b   : > { %v787_v49 = vpop.f32.mrf.mxu3  ;;  %v657_v52 = vadd.f32 %v656_v48, %v3779_v40 }
 0x12d   : > { %v3817_v56 = vadd.f32 %v787_v49, %v657_v52  ;;  %v431_v52 = vld [vmem:[%s3642_s14 + $0x68] sm:$0xff] }
 0x12f   : > { %854 = vmatmul.f32.gmra.mxu2 %v422_v20 }
 0x130   : > { %985 = vmatmul.f32.gmra.mxu3 %v460_v21  ;;  %v428_v21 = vld [vmem:[%s3642_s14 + $0x50] sm:$0xff] }
 0x131   : > { %610 = vmatmul.f32.gmra.mxu0 %v428_v21  ;;  %741 = vmatmul.f32.gmra.mxu1 %v466_v22 }
 0x132   : > { %v659_v61 = vpop.f32.mrf.mxu2 }
 0x133   : > { %v790_v0 = vpop.f32.mrf.mxu3  ;;  %v660_v3 = vadd.f32 %v659_v61, %v3779_v40  ;;  %v469_v61 = vld [vmem:[%s3650_s20 + $0x68] sm:$0xff] }
 0x135   : > { %v3822_v4 = vadd.f32 %v790_v0, %v660_v3 }
 0x137   : > { %857 = vmatmul.f32.gmra.mxu2 %v423_v26 }
 0x138   : > { %988 = vmatmul.f32.gmra.mxu3 %v461_v27 }
 0x139   : > { %613 = vmatmul.f32.gmra.mxu0 %v429_v28  ;;  %744 = vmatmul.f32.gmra.mxu1 %v467_v29 }
 0x13a   : > { %v662_v14 = vpop.f32.mrf.mxu2 }
 0x13b   : > { %v793_v15 = vpop.f32.mrf.mxu3  ;;  %v663_v18 = vadd.f32 %v662_v14, %v3779_v40  ;;  %v432_v14 = vld [vmem:[%s3642_s14 + $0x70] sm:$0xff] }
 0x13d   : > { %v3827_v20 = vadd.f32 %v793_v15, %v663_v18  ;;  %v470_v15 = vld [vmem:[%s3650_s20 + $0x70] sm:$0xff] }
 0x13f   : > { %5610 = vst [vmem:[#allocation23_spill] sm:$0xff] %v3827_v20  ;;  %860 = vmatmul.f32.gmra.mxu2 %v424_v34 }
 0x140   : > { %991 = vmatmul.f32.gmra.mxu3 %v462_v35 }
 0x141   : > { %616 = vmatmul.f32.gmra.mxu0 %v430_v37  ;;  %747 = vmatmul.f32.gmra.mxu1 %v468_v39 }
 0x142   : > { %v665_v23 = vpop.f32.mrf.mxu2 }
 0x143   : > { %v796_v24 = vpop.f32.mrf.mxu3  ;;  %v666_v26 = vadd.f32 %v665_v23, %v3779_v40 }
 0x145   : > { %v3832_v27 = vadd.f32 %v796_v24, %v666_v26  ;;  %v433_v24 = vld [vmem:[%s3642_s14 + $0x78] sm:$0xff] }
 0x146   : > { %v471_v26 = vld [vmem:[%s3650_s20 + $0x78] sm:$0xff] }
 0x147   : > { %863 = vmatmul.f32.gmra.mxu2 %v425_v44 }
 0x148   : > { %994 = vmatmul.f32.gmra.mxu3 %v463_v45 }
 0x149   : > { %619 = vmatmul.f32.gmra.mxu0 %v431_v52  ;;  %750 = vmatmul.f32.gmra.mxu1 %v469_v61 }
 0x14a   : > { %v668_v30 = vpop.f32.mrf.mxu2 }
 0x14b   : > { %v799_v34 = vpop.f32.mrf.mxu3  ;;  %v669_v35 = vadd.f32 %v668_v30, %v3779_v40 }
 0x14d   : > { %v3837_v36 = vadd.f32 %v799_v34, %v669_v35  ;;  %v434_v35 = vld [vmem:[%s3642_s14 + $0x80] sm:$0xff] }
 0x14f   : > { %866 = vmatmul.f32.gmra.mxu2 %v426_v57 }
 0x150   : > { %997 = vmatmul.f32.gmra.mxu3 %v464_v60 }
 0x151   : > { %622 = vmatmul.f32.gmra.mxu0 %v432_v14  ;;  %753 = vmatmul.f32.gmra.mxu1 %v470_v15 }
 0x152   : > { %v671_v48 = vpop.f32.mrf.mxu2 }
 0x153   : > { %v802_v44 = vpop.f32.mrf.mxu3  ;;  %v672_v45 = vadd.f32 %v671_v48, %v3779_v40  ;;  %v472_v48 = vld [vmem:[%s3650_s20 + $0x80] sm:$0xff] }
 0x155   : > { %v3842_v49 = vadd.f32 %v802_v44, %v672_v45  ;;  %v581_v44 = vpop.f32.mrf.mxu0 }
 0x157   : > { %5611 = vst [vmem:[#allocation24_spill] sm:$0xff] %v3842_v49  ;;  %869 = vmatmul.f32.gmra.mxu2 %v427_v10 }
 0x158   : > { %1000 = vmatmul.f32.gmra.mxu3 %v465_v11 }
 0x159   : > { %625 = vmatmul.f32.gmra.mxu0 %v433_v24  ;;  %756 = vmatmul.f32.gmra.mxu1 %v471_v26 }
 0x15a   : > { %v674_v0 = vpop.f32.mrf.mxu2 }
 0x15b   : > { %v805_v57 = vpop.f32.mrf.mxu3  ;;  %v675_v60 = vadd.f32 %v674_v0, %v3779_v40  ;;  %v712_v0 = vpop.f32.mrf.mxu1 }
 0x15d   : > { %v3847_v3 = vadd.f32 %v805_v57, %v675_v60  ;;  %v435_v60 = vld [vmem:[%s3642_s14 + $0x88] sm:$0xff] }
 0x15f   : > { %5612 = vst [vmem:[#allocation25_spill] sm:$0xff] %v3847_v3  ;;  %872 = vmatmul.f32.gmra.mxu2 %v428_v21 }
 0x160   : > { %1003 = vmatmul.f32.gmra.mxu3 %v466_v22 }
 0x161   : > { %628 = vmatmul.f32.gmra.mxu0 %v434_v35  ;;  %759 = vmatmul.f32.gmra.mxu1 %v472_v48 }
 0x162   : > { %v677_v18 = vpop.f32.mrf.mxu2 }
 0x163   : > { %v808_v10 = vpop.f32.mrf.mxu3  ;;  %v678_v11 = vadd.f32 %v677_v18, %v3779_v40  ;;  %v473_v18 = vld [vmem:[%s3650_s20 + $0x88] sm:$0xff] }
 0x165   : > { %v3852_v23 = vadd.f32 %v808_v10, %v678_v11 }
 0x167   : > { %5613 = vst [vmem:[#allocation26_spill] sm:$0xff] %v3852_v23  ;;  %875 = vmatmul.f32.gmra.mxu2 %v429_v28 }
 0x168   : > { %1006 = vmatmul.f32.gmra.mxu3 %v467_v29 }
 0x169   : > { %631 = vmatmul.f32.gmra.mxu0 %v435_v60  ;;  %762 = vmatmul.f32.gmra.mxu1 %v473_v18 }
 0x16a   : > { %v680_v30 = vpop.f32.mrf.mxu2 }
 0x16b   : > { %v811_v21 = vpop.f32.mrf.mxu3  ;;  %v681_v22 = vadd.f32 %v680_v30, %v3779_v40  ;;  %v715_v30 = vpop.f32.mrf.mxu1 }
 0x16d   : > { %v3857_v34 = vadd.f32 %v811_v21, %v681_v22  ;;  %v436_v22 = vld [vmem:[%s3642_s14 + $0x90] sm:$0xff] }
 0x16f   : > { %5614 = vst [vmem:[#allocation27_spill] sm:$0xff] %v3857_v34  ;;  %878 = vmatmul.f32.gmra.mxu2 %v430_v37  ;;  %v584_v37 = vpop.f32.mrf.mxu0 }
 0x170   : > { %1009 = vmatmul.f32.gmra.mxu3 %v468_v39 }
 0x171   : > { %634 = vmatmul.f32.gmra.mxu0 %v436_v22 }
 0x172   : > { %v683_v45 = vpop.f32.mrf.mxu2 }
 0x173   : > { %v814_v28 = vpop.f32.mrf.mxu3  ;;  %v684_v29 = vadd.f32 %v683_v45, %v3779_v40  ;;  %v2445_v45 = vld [vmem:[#allocation10 + $0x78] sm:$0xff]  ;;  %v718_v23 = vpop.f32.mrf.mxu1 }
 0x174   : > { %2466 = vmatpush.msrb.mxu0 %v2445_v45 }
 0x175   : > { %v3862_v57 = vadd.f32 %v814_v28, %v684_v29  ;;  %v2461_v28 = vld [vmem:[#allocation10 + $0xf8] sm:$0xff] }
 0x176   : > { %2597 = vmatpush.msrb.mxu1 %v2461_v28 }
 0x177   : > { %5615 = vst [vmem:[#allocation28_spill] sm:$0xff] %v3862_v57  ;;  %881 = vmatmul.f32.gmra.mxu2 %v431_v52  ;;  %v474_v52 = vld [vmem:[%s3650_s20 + $0x90] sm:$0xff] }
 0x178   : > { %1012 = vmatmul.f32.gmra.mxu3 %v469_v61  ;;  %v587_v61 = vpop.f32.mrf.mxu0  ;;  %765 = vmatmul.f32.gmra.mxu1 %v474_v52 }
 0x17a   : > { %v686_v39 = vpop.f32.mrf.mxu2 }
 0x17b   : > { %v817_v10 = vpop.f32.mrf.mxu3  ;;  %v687_v11 = vadd.f32 %v686_v39, %v3779_v40  ;;  %v3875_v28 = vpop.f32.mrf.mxu1 }
 0x17d   : > { %v3867_v21 = vadd.f32 %v817_v10, %v687_v11  ;;  %v2444_v10 = vld [vmem:[#allocation10 + $0x70] sm:$0xff] }
 0x17e   : > { %2467 = vmatpush.msrb.mxu0 %v2444_v10 }
 0x17f   : > { %5616 = vst [vmem:[#allocation29_spill] sm:$0xff] %v3867_v21  ;;  %884 = vmatmul.f32.gmra.mxu2 %v432_v14  ;;  %v2460_v21 = vld [vmem:[#allocation10 + $0xf0] sm:$0xff] }
 0x180   : > { %1015 = vmatmul.f32.gmra.mxu3 %v470_v15  ;;  %v590_v14 = vpop.f32.mrf.mxu0  ;;  %2598 = vmatpush.msrb.mxu1 %v2460_v21 }
 0x182   : > { %v689_v29 = vpop.f32.mrf.mxu2 }
 0x183   : > { %v820_v57 = vpop.f32.mrf.mxu3  ;;  %v690_v34 = vadd.f32 %v689_v29, %v3779_v40  ;;  %v3888_v49 = vpop.f32.mrf.mxu1 }
 0x185   : > { %v3872_v39 = vadd.f32 %v820_v57, %v690_v34  ;;  %v582_v34 = vadd.f32 %v581_v44, %v3779_v40 }
 0x187   : > { %5617 = vst [vmem:[#allocation30_spill] sm:$0xff] %v3872_v39  ;;  %887 = vmatmul.f32.gmra.mxu2 %v433_v24  ;;  %v3881_v24 = vperm.slane %v3775_v38, 1  ;;  %v2443_v39 = vld [vmem:[#allocation10 + $0x68] sm:$0xff] }
 0x188   : > { %1018 = vmatmul.f32.gmra.mxu3 %v471_v26  ;;  %v3883_v26 = vpop.f32.mrf.mxu0  ;;  %2468 = vmatpush.msrb.mxu0 %v2443_v39 }
 0x18a   : > { %v692_v15 = vpop.f32.mrf.mxu2 }
 0x18b   : > { %v823_v11 = vpop.f32.mrf.mxu3  ;;  %v693_v45 = vadd.f32 %v692_v15, %v3779_v40  ;;  %v3886_v15 = vadd.f32 %v712_v0, %v582_v34 }
 0x18d   : > { %v3877_v3 = vadd.f32 %v823_v11, %v693_v45  ;;  %v1240_v39 = vmul.f32 %v3886_v15, %v3886_v15 }
 0x18f   : > { %5618 = vst [vmem:[#allocation31_spill] sm:$0xff] %v3877_v3  ;;  %890 = vmatmul.f32.gmra.mxu2 %v434_v35  ;;  %v2459_v35 = vld [vmem:[#allocation10 + $0xe8] sm:$0xff] }
 0x190   : > { %1021 = vmatmul.f32.gmra.mxu3 %v472_v48  ;;  %2599 = vmatpush.msrb.mxu1 %v2459_v35  ;;  %v585_v48 = vadd.f32 %v584_v37, %v3779_v40  ;;  %v3895_v44 = vpop.f32.mrf.mxu0  ;;  %v2442_v37 = vld [vmem:[#allocation10 + $0x60] sm:$0xff]  ;;  %v588_v35 = vadd.f32 %v587_v61, %v3779_v40  ;;  %v591_v61 = vadd.f32 %v590_v14, %v3779_v40 }
 0x191   : > { %2469 = vmatpush.msrb.mxu0 %v2442_v37  ;;  %v3167_v3 = vld [vmem:[%s3650_s20 + $0x108] sm:$0xff] }
 0x192   : > { %v843_v57 = vpop.f32.mrf.mxu2  ;;  %v3898_v34 = vadd.f32 %v715_v30, %v585_v48 }
 0x193   : > { %v974_v29 = vpop.f32.mrf.mxu3  ;;  %v844_v10 = vadd.f32 %v843_v57, %v3881_v24  ;;  %v3906_v57 = vpop.f32.mrf.mxu1 }
 0x195   : > { %v3890_v21 = vadd.f32 %v974_v29, %v844_v10  ;;  %v2458_v29 = vld [vmem:[#allocation10 + $0xe0] sm:$0xff] }
 0x196   : > { %2600 = vmatpush.msrb.mxu1 %v2458_v29 }
 0x197   : > { %893 = vmatmul.f32.gmra.mxu2 %v435_v60  ;;  %v1088_v38 = vadd.f32 %v3890_v21, %v3886_v15  ;;  %v1241_v60 = vmul.f32 %v3890_v21, %v3890_v21 }
 0x198   : > { %1024 = vmatmul.f32.gmra.mxu3 %v473_v18 }
 0x199   : > { %1089 = vadd.xlane.f32.xlu0 %v1088_v38  ;;  %v1316_v10 = vadd.f32 %v1241_v60, %v1240_v39  ;;  %v2441_v39 = vld [vmem:[#allocation10 + $0x58] sm:$0xff] }
 0x19a   : > { %v846_v0 = vpop.f32.mrf.mxu2  ;;  %2470 = vmatpush.msrb.mxu0 %v2441_v39 }
 0x19b   : > { %v977_v11 = vpop.f32.mrf.mxu3  ;;  %v847_v45 = vadd.f32 %v846_v0, %v3881_v24  ;;  %v730_v29 = vpop.f32.mrf.mxu1 }
 0x19d   : > { %v3904_v18 = vadd.f32 %v977_v11, %v847_v45  ;;  %v3912_v11 = vadd.f32 %v718_v23, %v588_v35  ;;  %v1242_v45 = vmul.f32 %v3898_v34, %v3898_v34 }
 0x19f   : > { %896 = vmatmul.f32.gmra.mxu2 %v436_v22  ;;  %v1091_v30 = vadd.f32 %v3904_v18, %v3898_v34  ;;  %v1243_v22 = vmul.f32 %v3904_v18, %v3904_v18 }
 0x1a0   : > { %1027 = vmatmul.f32.gmra.mxu3 %v474_v52  ;;  %v3918_v52 = vpop.f32.mrf.mxu0 }
 0x1a1   : > { %1092 = vadd.xlane.f32.xlu1 %v1091_v30  ;;  %1317 = vadd.xlane.f32.xlu0 %v1316_v10  ;;  %v1319_v60 = vadd.f32 %v1243_v22, %v1242_v45  ;;  %v2457_v30 = vld [vmem:[#allocation10 + $0xd8] sm:$0xff]  ;;  %v3928_v10 = vadd.f32 %v3875_v28, %v591_v61 }
 0x1a2   : > { %v849_v38 = vpop.f32.mrf.mxu2  ;;  %2601 = vmatpush.msrb.mxu1 %v2457_v30 }
 0x1a3   : > { %v980_v48 = vpop.f32.mrf.mxu3  ;;  %v850_v0 = vadd.f32 %v849_v38, %v3881_v24  ;;  %v1246_v45 = vmul.f32 %v3928_v10, %v3928_v10 }
 0x1a5   : > { %v3920_v37 = vadd.f32 %v980_v48, %v850_v0  ;;  %v594_v0 = vadd.f32 %v3883_v26, %v3779_v40 }
 0x1a7   : > { %899 = vmatmul.f32.gmra.mxu2 %v3665_v32  ;;  %v1094_v23 = vadd.f32 %v3920_v37, %v3912_v11  ;;  %v1244_v32 = vmul.f32 %v3912_v11, %v3912_v11  ;;  %v3948_v30 = vadd.f32 %v3888_v49, %v594_v0 }
 0x1a8   : > { %1030 = vmatmul.f32.gmra.mxu3 %v3668_v33  ;;  %v1245_v33 = vmul.f32 %v3920_v37, %v3920_v37  ;;  %v602_v28 = vpop.f32.mrf.mxu0 }
 0x1a9   : > { %1095 = vadd.xlane.f32.xlu2 %v1094_v23  ;;  %1320 = vadd.xlane.f32.xlu1 %v1319_v60  ;;  %v2440_v23 = vld [vmem:[#allocation10 + $0x50] sm:$0xff] }
 0x1aa   : > { %v852_v35 = vpop.f32.mrf.mxu2  ;;  %v1322_v22 = vadd.f32 %v1245_v33, %v1244_v32  ;;  %v2456_v60 = vld [vmem:[#allocation10 + $0xd0] sm:$0xff]  ;;  %2471 = vmatpush.msrb.mxu0 %v2440_v23  ;;  %v597_v32 = vadd.f32 %v3895_v44, %v3779_v40  ;;  %v1248_v33 = vmul.f32 %v3948_v30, %v3948_v30 }
 0x1ab   : > { %v983_v14 = vpop.f32.mrf.mxu3  ;;  %v853_v38 = vadd.f32 %v852_v35, %v3881_v24  ;;  %2602 = vmatpush.msrb.mxu1 %v2456_v60  ;;  %v2455_v60 = vld [vmem:[#allocation10 + $0xc8] sm:$0xff] }
 0x1ac   : > { %v3964_v44 = vadd.f32 %v3906_v57, %v597_v32 }
 0x1ad   : > { %v3935_v48 = vadd.f32 %v983_v14, %v853_v38  ;;  %2603 = vmatpush.msrb.mxu1 %v2455_v60 }
 0x1af   : > { %902 = vmatmul.f32.gmra.mxu2 %v3673_v42  ;;  %v1097_v61 = vadd.f32 %v3935_v48, %v3928_v10  ;;  %v1247_v39 = vmul.f32 %v3935_v48, %v3935_v48  ;;  %v733_v42 = vpop.f32.mrf.mxu1 }
 0x1b0   : > { %1033 = vmatmul.f32.gmra.mxu3 %v3676_v43 }
 0x1b1   : > { %1323 = vadd.xlane.f32.xlu2 %v1322_v22  ;;  %1098 = vadd.xlane.f32.xlu0 %v1097_v61  ;;  %v1325_v26 = vadd.f32 %v1247_v39, %v1246_v45  ;;  %v605_v45 = vpop.f32.mrf.mxu0  ;;  %v2439_v22 = vld [vmem:[#allocation10 + $0x48] sm:$0xff] }
 0x1b2   : > { %v855_v35 = vpop.f32.mrf.mxu2  ;;  %2472 = vmatpush.msrb.mxu0 %v2439_v22 }
 0x1b3   : > { %v986_v43 = vpop.f32.mrf.mxu3  ;;  %v856_v14 = vadd.f32 %v855_v35, %v3881_v24  ;;  %1326 = vadd.xlane.f32.xlu1 %v1325_v26  ;;  %v600_v35 = vadd.f32 %v3918_v52, %v3779_v40 }
 0x1b5   : > { %v3951_v38 = vadd.f32 %v986_v43, %v856_v14  ;;  %v1250_v43 = vmul.f32 %v3964_v44, %v3964_v44 }
 0x1b7   : > { %905 = vmatmul.f32.gmra.mxu2 %v3681_v46  ;;  %v1100_v49 = vadd.f32 %v3951_v38, %v3948_v30  ;;  %v1249_v0 = vmul.f32 %v3951_v38, %v3951_v38 }
 0x1b8   : > { %1036 = vmatmul.f32.gmra.mxu3 %v3684_v47  ;;  %v736_v47 = vpop.f32.mrf.mxu1 }
 0x1b9   : > { %1101 = vadd.xlane.f32.xlu2 %v1100_v49  ;;  %v1328_v61 = vadd.f32 %v1249_v0, %v1248_v33  ;;  %v3979_v33 = vadd.f32 %v730_v29, %v600_v35  ;;  %v608_v49 = vpop.f32.mrf.mxu0 }
 0x1ba   : > { %v858_v39 = vpop.f32.mrf.mxu2 }
 0x1bb   : > { %v989_v23 = vpop.f32.mrf.mxu3  ;;  %v859_v46 = vadd.f32 %v858_v39, %v3881_v24  ;;  %1329 = vadd.xlane.f32.xlu0 %v1328_v61  ;;  %v2438_v61 = vld [vmem:[#allocation10 + $0x40] sm:$0xff]  ;;  %v1252_v39 = vmul.f32 %v3979_v33, %v3979_v33 }
 0x1bc   : > { %2473 = vmatpush.msrb.mxu0 %v2438_v61 }
 0x1bd   : > { %v3967_v26 = vadd.f32 %v989_v23, %v859_v46  ;;  %v2454_v46 = vld [vmem:[#allocation10 + $0xc0] sm:$0xff] }
 0x1be   : > { %2604 = vmatpush.msrb.mxu1 %v2454_v46 }
 0x1bf   : > { %908 = vmatmul.f32.gmra.mxu2 %v3689_v50  ;;  %v1103_v57 = vadd.f32 %v3967_v26, %v3964_v44  ;;  %v1251_v14 = vmul.f32 %v3967_v26, %v3967_v26 }
 0x1c0   : > { %1039 = vmatmul.f32.gmra.mxu3 %v3692_v51  ;;  %v603_v51 = vadd.f32 %v602_v28, %v3779_v40  ;;  %v739_v23 = vpop.f32.mrf.mxu1 }
 0x1c1   : > { %1104 = vadd.xlane.f32.xlu1 %v1103_v57  ;;  %v1331_v32 = vadd.f32 %v1251_v14, %v1250_v43 }
 0x1c2   : > { %v861_v0 = vpop.f32.mrf.mxu2  ;;  %v3993_v43 = vadd.f32 %v733_v42, %v603_v51 }
 0x1c3   : > { %v992_v52 = vpop.f32.mrf.mxu3  ;;  %v862_v22 = vadd.f32 %v861_v0, %v3881_v24  ;;  %1332 = vadd.xlane.f32.xlu2 %v1331_v32  ;;  %v611_v32 = vpop.f32.mrf.mxu0  ;;  %v2437_v0 = vld [vmem:[#allocation10 + $0x38] sm:$0xff] }
 0x1c4   : > { %2474 = vmatpush.msrb.mxu0 %v2437_v0  ;;  %v2452_v0 = vld [vmem:[#allocation10 + $0xb0] sm:$0xff] }
 0x1c5   : > { %v3982_v50 = vadd.f32 %v992_v52, %v862_v22  ;;  %v1254_v52 = vmul.f32 %v3993_v43, %v3993_v43  ;;  %v2453_v22 = vld [vmem:[#allocation10 + $0xb8] sm:$0xff] }
 0x1c6   : > { %2605 = vmatpush.msrb.mxu1 %v2453_v22 }
 0x1c7   : > { %911 = vmatmul.f32.gmra.mxu2 %v3697_v54  ;;  %v1106_v29 = vadd.f32 %v3982_v50, %v3979_v33  ;;  %v1253_v60 = vmul.f32 %v3982_v50, %v3982_v50 }
 0x1c8   : > { %1042 = vmatmul.f32.gmra.mxu3 %v3700_v55  ;;  %v606_v55 = vadd.f32 %v605_v45, %v3779_v40  ;;  %v742_v51 = vpop.f32.mrf.mxu1  ;;  %2606 = vmatpush.msrb.mxu1 %v2452_v0 }
 0x1c9   : > { %1107 = vadd.xlane.f32.xlu0 %v1106_v29  ;;  %v1334_v35 = vadd.f32 %v1253_v60, %v1252_v39 }
 0x1ca   : > { %v864_v28 = vpop.f32.mrf.mxu2  ;;  %v4007_v46 = vadd.f32 %v736_v47, %v606_v55 }
 0x1cb   : > { %v995_v57 = vpop.f32.mrf.mxu3  ;;  %v865_v14 = vadd.f32 %v864_v28, %v3881_v24  ;;  %1335 = vadd.xlane.f32.xlu1 %v1334_v35  ;;  %v614_v28 = vpop.f32.mrf.mxu0 }
 0x1cc   : > { %5620 = vst [vmem:[#allocation33_spill] sm:$0xff] %v4007_v46  ;;  %v615_v0 = vadd.f32 %v614_v28, %v3779_v40 }
 0x1cd   : > { %v3996_v54 = vadd.f32 %v995_v57, %v865_v14  ;;  %v2436_v57 = vld [vmem:[#allocation10 + $0x30] sm:$0xff] }
 0x1ce   : > { %2475 = vmatpush.msrb.mxu0 %v2436_v57 }
 0x1cf   : > { %5619 = vst [vmem:[#allocation32_spill] sm:$0xff] %v3996_v54  ;;  %914 = vmatmul.f32.gmra.mxu2 %v3705_v58  ;;  %v1109_v42 = vadd.f32 %v3996_v54, %v3993_v43  ;;  %v1255_v61 = vmul.f32 %v3996_v54, %v3996_v54  ;;  %v609_v58 = vadd.f32 %v608_v49, %v3779_v40 }
 0x1d0   : > { %1045 = vmatmul.f32.gmra.mxu3 %v3708_v59  ;;  %v1256_v59 = vmul.f32 %v4007_v46, %v4007_v46 }
 0x1d1   : > { %1110 = vadd.xlane.f32.xlu2 %v1109_v42  ;;  %v1337_v39 = vadd.f32 %v1255_v61, %v1254_v52  ;;  %v4021_v55 = vadd.f32 %v739_v23, %v609_v58  ;;  %v745_v52 = vpop.f32.mrf.mxu1  ;;  %v2451_v58 = vld [vmem:[#allocation10 + $0xa8] sm:$0xff] }
 0x1d2   : > { %v867_v45 = vpop.f32.mrf.mxu2  ;;  %2607 = vmatpush.msrb.mxu1 %v2451_v58 }
 0x1d3   : > { %v998_v29 = vpop.f32.mrf.mxu3  ;;  %v868_v60 = vadd.f32 %v867_v45, %v3881_v24  ;;  %1338 = vadd.xlane.f32.xlu0 %v1337_v39  ;;  %5622 = vst [vmem:[#allocation35_spill] sm:$0xff] %v4021_v55  ;;  %v1258_v39 = vmul.f32 %v4021_v55, %v4021_v55  ;;  %v2435_v45 = vld [vmem:[#allocation10 + $0x28] sm:$0xff] }
 0x1d4   : > { %2476 = vmatpush.msrb.mxu0 %v2435_v45 }
 0x1d5   : > { %v4010_v35 = vadd.f32 %v998_v29, %v868_v60  ;;  %v617_v60 = vpop.f32.mrf.mxu0 }
 0x1d7   : > { %5621 = vst [vmem:[#allocation34_spill] sm:$0xff] %v4010_v35  ;;  %917 = vmatmul.f32.gmra.mxu2 %v3713_v62  ;;  %v1112_v47 = vadd.f32 %v4010_v35, %v4007_v46  ;;  %v1257_v14 = vmul.f32 %v4010_v35, %v4010_v35 }
 0x1d8   : > { %1048 = vmatmul.f32.gmra.mxu3 %v3716_v63  ;;  %v612_v63 = vadd.f32 %v611_v32, %v3779_v40 }
 0x1d9   : > { %1113 = vadd.xlane.f32.xlu1 %v1112_v47  ;;  %v1340_v49 = vadd.f32 %v1257_v14, %v1256_v59 }
 0x1da   : > { %v870_v22 = vpop.f32.mrf.mxu2  ;;  %v4035_v59 = vadd.f32 %v742_v51, %v612_v63  ;;  %v4049_v63 = vadd.f32 %v745_v52, %v615_v0 }
 0x1db   : > { %v1001_v42 = vpop.f32.mrf.mxu3  ;;  %v871_v61 = vadd.f32 %v870_v22, %v3881_v24  ;;  %1341 = vadd.xlane.f32.xlu2 %v1340_v49 }
 0x1dc   : > { %5624 = vst [vmem:[#allocation37_spill] sm:$0xff] %v4035_v59  ;;  %v1260_v49 = vmul.f32 %v4035_v59, %v4035_v59  ;;  %v1262_v58 = vmul.f32 %v4049_v63, %v4049_v63 }
 0x1dd   : > { %v4024_v62 = vadd.f32 %v1001_v42, %v871_v61  ;;  %v2434_v42 = vld [vmem:[#allocation10 + $0x20] sm:$0xff]  ;;  %5626 = vst [vmem:[#allocation39_spill] sm:$0xff] %v4049_v63  ;;  %v620_v28 = vpop.f32.mrf.mxu0 }
 0x1de   : > { %2477 = vmatpush.msrb.mxu0 %v2434_v42  ;;  %v621_v42 = vadd.f32 %v620_v28, %v3779_v40 }
 0x1df   : > { %5623 = vst [vmem:[#allocation36_spill] sm:$0xff] %v4024_v62  ;;  %920 = vmatmul.f32.gmra.mxu2 %v3721_v1  ;;  %v1115_v23 = vadd.f32 %v4024_v62, %v4021_v55  ;;  %v1259_v29 = vmul.f32 %v4024_v62, %v4024_v62  ;;  %v748_v1 = vpop.f32.mrf.mxu1  ;;  %v3172_v62 = vld [vmem:[%s3642_s14 + $0x120] sm:$0xff] }
 0x1e0   : > { %1051 = vmatmul.f32.gmra.mxu3 %v3724_v2 }
 0x1e1   : > { %1116 = vadd.xlane.f32.xlu0 %v1115_v23  ;;  %v1343_v32 = vadd.f32 %v1259_v29, %v1258_v39  ;;  %v618_v29 = vadd.f32 %v617_v60, %v3779_v40 }
 0x1e2   : > { %v873_v57 = vpop.f32.mrf.mxu2 }
 0x1e3   : > { %v1004_v47 = vpop.f32.mrf.mxu3  ;;  %v874_v14 = vadd.f32 %v873_v57, %v3881_v24  ;;  %1344 = vadd.xlane.f32.xlu1 %v1343_v32  ;;  %v4063_v0 = vadd.f32 %v748_v1, %v618_v29 }
 0x1e5   : > { %v4038_v2 = vadd.f32 %v1004_v47, %v874_v14  ;;  %v2433_v47 = vld [vmem:[#allocation10 + $0x18] sm:$0xff]  ;;  %5628 = vst [vmem:[#allocation41_spill] sm:$0xff] %v4063_v0 }
 0x1e6   : > { %2478 = vmatpush.msrb.mxu0 %v2433_v47 }
 0x1e7   : > { %5625 = vst [vmem:[#allocation38_spill] sm:$0xff] %v4038_v2  ;;  %923 = vmatmul.f32.gmra.mxu2 %v3729_v5  ;;  %v1118_v51 = vadd.f32 %v4038_v2, %v4035_v59  ;;  %v1261_v22 = vmul.f32 %v4038_v2, %v4038_v2  ;;  %v2450_v5 = vld [vmem:[#allocation10 + $0xa0] sm:$0xff]  ;;  %v751_v32 = vpop.f32.mrf.mxu1 }
 0x1e8   : > { %1054 = vmatmul.f32.gmra.mxu3 %v3732_v6  ;;  %2608 = vmatpush.msrb.mxu1 %v2450_v5  ;;  %v4077_v5 = vadd.f32 %v751_v32, %v621_v42 }
 0x1e9   : > { %1119 = vadd.xlane.f32.xlu2 %v1118_v51  ;;  %v1346_v61 = vadd.f32 %v1261_v22, %v1260_v49  ;;  %v2449_v22 = vld [vmem:[#allocation10 + $0x98] sm:$0xff] }
 0x1ea   : > { %v876_v39 = vpop.f32.mrf.mxu2  ;;  %2609 = vmatpush.msrb.mxu1 %v2449_v22  ;;  %5630 = vst [vmem:[#allocation43_spill] sm:$0xff] %v4077_v5 }
 0x1eb   : > { %v1007_v45 = vpop.f32.mrf.mxu3  ;;  %v877_v23 = vadd.f32 %v876_v39, %v3881_v24  ;;  %1347 = vadd.xlane.f32.xlu0 %v1346_v61  ;;  %v1264_v61 = vmul.f32 %v4063_v0, %v4063_v0 }
 0x1ed   : > { %v4052_v6 = vadd.f32 %v1007_v45, %v877_v23 }
 0x1ef   : > { %5627 = vst [vmem:[#allocation40_spill] sm:$0xff] %v4052_v6  ;;  %926 = vmatmul.f32.gmra.mxu2 %v3737_v8  ;;  %v1121_v52 = vadd.f32 %v4052_v6, %v4049_v63  ;;  %v1263_v57 = vmul.f32 %v4052_v6, %v4052_v6  ;;  %v623_v8 = vpop.f32.mrf.mxu0  ;;  %v754_v45 = vpop.f32.mrf.mxu1 }
 0x1f0   : > { %1057 = vmatmul.f32.gmra.mxu3 %v3740_v9 }
 0x1f1   : > { %1122 = vadd.xlane.f32.xlu1 %v1121_v52  ;;  %v1349_v14 = vadd.f32 %v1263_v57, %v1262_v58 }
 0x1f2   : > { %v879_v60 = vpop.f32.mrf.mxu2 }
 0x1f3   : > { %v1010_v49 = vpop.f32.mrf.mxu3  ;;  %v880_v51 = vadd.f32 %v879_v60, %v3881_v24  ;;  %1350 = vadd.xlane.f32.xlu2 %v1349_v14 }
 0x1f5   : > { %v4066_v9 = vadd.f32 %v1010_v49, %v880_v51 }
 0x1f7   : > { %5629 = vst [vmem:[#allocation42_spill] sm:$0xff] %v4066_v9  ;;  %929 = vmatmul.f32.gmra.mxu2 %v3745_v12  ;;  %v1124_v1 = vadd.f32 %v4066_v9, %v4063_v0  ;;  %v1265_v39 = vmul.f32 %v4066_v9, %v4066_v9  ;;  %v624_v12 = vadd.f32 %v623_v8, %v3779_v40  ;;  %v626_v57 = vpop.f32.mrf.mxu0  ;;  %v757_v49 = vpop.f32.mrf.mxu1 }
 0x1f8   : > { %1060 = vmatmul.f32.gmra.mxu3 %v3748_v13  ;;  %v1266_v13 = vmul.f32 %v4077_v5, %v4077_v5 }
 0x1f9   : > { %1125 = vadd.xlane.f32.xlu0 %v1124_v1  ;;  %v1352_v23 = vadd.f32 %v1265_v39, %v1264_v61  ;;  %v4091_v60 = vadd.f32 %v754_v45, %v624_v12  ;;  %v3162_v61 = vld [vmem:[%s3642_s14 + $0xf8] sm:$0xff] }
 0x1fa   : > { %v882_v29 = vpop.f32.mrf.mxu2  ;;  %v3163_v1 = vld [vmem:[%s3650_s20 + $0xf8] sm:$0xff] }
 0x1fb   : > { %v1013_v28 = vpop.f32.mrf.mxu3  ;;  %v883_v58 = vadd.f32 %v882_v29, %v3881_v24  ;;  %1353 = vadd.xlane.f32.xlu1 %v1352_v23  ;;  %5632 = vst [vmem:[#allocation45_spill] sm:$0xff] %v4091_v60  ;;  %v1268_v42 = vmul.f32 %v4091_v60, %v4091_v60 }
 0x1fd   : > { %v4080_v52 = vadd.f32 %v1013_v28, %v883_v58 }
 0x1ff   : > { %5631 = vst [vmem:[#allocation44_spill] sm:$0xff] %v4080_v52  ;;  %932 = vmatmul.f32.gmra.mxu2 %v3753_v16  ;;  %v1127_v32 = vadd.f32 %v4080_v52, %v4077_v5  ;;  %v1267_v47 = vmul.f32 %v4080_v52, %v4080_v52  ;;  %v629_v23 = vpop.f32.mrf.mxu0  ;;  %v4193_v5 = vmul.f32 %v3797_v19, %v3797_v19 }
 0x200   : > { %1063 = vmatmul.f32.gmra.mxu3 %v3756_v17  ;;  %v627_v17 = vadd.f32 %v626_v57, %v3779_v40 }
 0x201   : > { %1128 = vadd.xlane.f32.xlu2 %v1127_v32  ;;  %v1355_v14 = vadd.f32 %v1267_v47, %v1266_v13  ;;  %v2432_v13 = vld [vmem:[#allocation10 + $0x10] sm:$0xff]  ;;  %v760_v32 = vpop.f32.mrf.mxu1 }
 0x202   : > { %v885_v51 = vpop.f32.mrf.mxu2  ;;  %v4105_v28 = vadd.f32 %v757_v49, %v627_v17  ;;  %2479 = vmatpush.msrb.mxu0 %v2432_v13  ;;  %v3165_v49 = vld [vmem:[%s3650_s20 + $0x100] sm:$0xff] }
 0x203   : > { %v1016_v8 = vpop.f32.mrf.mxu3  ;;  %v886_v22 = vadd.f32 %v885_v51, %v3881_v24  ;;  %1356 = vadd.xlane.f32.xlu0 %v1355_v14  ;;  %v630_v14 = vadd.f32 %v629_v23, %v3779_v40 }
 0x204   : > { %5634 = vst [vmem:[#allocation47_spill] sm:$0xff] %v4105_v28 }
 0x205   : > { %v4094_v16 = vadd.f32 %v1016_v8, %v886_v22  ;;  %v1270_v8 = vmul.f32 %v4105_v28, %v4105_v28  ;;  %v3164_v22 = vld [vmem:[%s3642_s14 + $0x100] sm:$0xff] }
 0x207   : > { %5633 = vst [vmem:[#allocation46_spill] sm:$0xff] %v4094_v16  ;;  %935 = vmatmul.f32.gmra.mxu2 %v3162_v61  ;;  %v1130_v39 = vadd.f32 %v4094_v16, %v4091_v60  ;;  %v1269_v45 = vmul.f32 %v4094_v16, %v4094_v16  ;;  %v4119_v61 = vadd.f32 %v760_v32, %v630_v14  ;;  %v2447_v14 = vld [vmem:[#allocation10 + $0x88] sm:$0xff] }
 0x208   : > { %1066 = vmatmul.f32.gmra.mxu3 %v3163_v1  ;;  %v2448_v1 = vld [vmem:[#allocation10 + $0x90] sm:$0xff] }
 0x209   : > { %1131 = vadd.xlane.f32.xlu1 %v1130_v39  ;;  %v1358_v29 = vadd.f32 %v1269_v45, %v1268_v42  ;;  %5636 = vst [vmem:[#allocation49_spill] sm:$0xff] %v4119_v61  ;;  %v2431_v39 = vld [vmem:[#allocation10 + $0x8] sm:$0xff]  ;;  %2610 = vmatpush.msrb.mxu1 %v2448_v1  ;;  %v1272_v32 = vmul.f32 %v4119_v61, %v4119_v61  ;;  %v2430_v1 = vld [vmem:[#allocation10] sm:$0xff] }
 0x20a   : > { %v888_v58 = vpop.f32.mrf.mxu2  ;;  %2480 = vmatpush.msrb.mxu0 %v2431_v39  ;;  %v2446_v39 = vld [vmem:[#allocation10 + $0x80] sm:$0xff] }
 0x20b   : > { %v1019_v12 = vpop.f32.mrf.mxu3  ;;  %v889_v57 = vadd.f32 %v888_v58, %v3881_v24  ;;  %1359 = vadd.xlane.f32.xlu2 %v1358_v29  ;;  %v632_v29 = vpop.f32.mrf.mxu0  ;;  %2611 = vmatpush.msrb.mxu1 %v2447_v14 }
 0x20c   : > { %v1090_v47 = vpop.xlane.xlu0 %1089  ;;  %2481 = vmatpush.msrb.mxu0 %v2430_v1 }
 0x20d   : > { %v4109_v51 = vadd.f32 %v1019_v12, %v889_v57  ;;  %v4121_v45 = vmul.f32 0.00390625, %v1090_v47  ;;  %2612 = vmatpush.msrb.mxu1 %v2446_v39 }
 0x20f   : > { %5635 = vst [vmem:[#allocation48_spill] sm:$0xff] %v4109_v51  ;;  %938 = vmatmul.f32.gmra.mxu2 %v3164_v22  ;;  %v1133_v17 = vadd.f32 %v4109_v51, %v4105_v28  ;;  %v1271_v42 = vmul.f32 %v4109_v51, %v4109_v51 }
 0x210   : > { %1069 = vmatmul.f32.gmra.mxu3 %v3165_v49 }
 0x211   : > { %1134 = vadd.xlane.f32.xlu0 %v1133_v17  ;;  %v1361_v23 = vadd.f32 %v1271_v42, %v1270_v8  ;;  %v1468_v8 = vmul.f32 %v4121_v45, %v4121_v45  ;;  %v633_v17 = vadd.f32 %v632_v29, %v3779_v40  ;;  %v763_v42 = vpop.f32.mrf.mxu1 }
 0x212   : > { %v891_v58 = vpop.f32.mrf.mxu2 }
 0x213   : > { %v1022_v12 = vpop.f32.mrf.mxu3  ;;  %v892_v13 = vadd.f32 %v891_v58, %v3881_v24  ;;  %1362 = vadd.xlane.f32.xlu1 %v1361_v23  ;;  %v3166_v58 = vld [vmem:[%s3642_s14 + $0x108] sm:$0xff]  ;;  %v4141_v14 = vadd.f32 %v763_v42, %v633_v17 }
 0x214   : > { %v1093_v57 = vpop.xlane.xlu1 %1092  ;;  %v1318_v22 = vpop.xlane.xlu0 %1317 }
 0x215   : > { %v4126_v47 = vadd.f32 %v1022_v12, %v892_v13  ;;  %v1430_v49 = vmul.f32 0.00390625, %v1318_v22  ;;  %v4137_v13 = vmul.f32 0.00390625, %v1093_v57  ;;  %5638 = vst [vmem:[#allocation51_spill] sm:$0xff] %v4141_v14  ;;  %v1274_v17 = vmul.f32 %v4141_v14, %v4141_v14 }
 0x217   : > { %5637 = vst [vmem:[#allocation50_spill] sm:$0xff] %v4126_v47  ;;  %v1506_v23 = vsub.f32 %v1430_v49, %v1468_v8  ;;  %941 = vmatmul.f32.gmra.mxu2 %v3166_v58  ;;  %v1136_v51 = vadd.f32 %v4126_v47, %v4119_v61  ;;  %v1273_v12 = vmul.f32 %v4126_v47, %v4126_v47  ;;  %v635_v58 = vpop.f32.mrf.mxu0  ;;  %v3169_v47 = vld [vmem:[%s3650_s20 + $0x110] sm:$0xff] }
 0x218   : > { %1072 = vmatmul.f32.gmra.mxu3 %v3167_v3  ;;  %v636_v42 = vadd.f32 %v635_v58, %v3779_v40 }
 0x219   : > { %v4139_v29 = vadd.f32 1e-05, %v1506_v23  ;;  %1137 = vadd.xlane.f32.xlu2 %v1136_v51  ;;  %v1364_v22 = vadd.f32 %v1273_v12, %v1272_v32  ;;  %v1469_v51 = vmul.f32 %v4137_v13, %v4137_v13  ;;  %v3168_v12 = vld [vmem:[%s3642_s14 + $0x110] sm:$0xff] }
 0x21a   : > { %v894_v8 = vpop.f32.mrf.mxu2 }
 0x21b   : > { %v1025_v3 = vpop.f32.mrf.mxu3  ;;  %3086 = vrsqrt.f32 %v4139_v29  ;;  %v895_v49 = vadd.f32 %v894_v8, %v3881_v24  ;;  %1365 = vadd.xlane.f32.xlu0 %v1364_v22  ;;  %vm1588_vm1 = vweird.f32 %v4139_v29 }
 0x21c   : > { %v1096_v1 = vpop.xlane.xlu2 %1095  ;;  %v1321_v39 = vpop.xlane.xlu1 %1320 }
 0x21d   : > { %v4145_v57 = vadd.f32 %v1025_v3, %v895_v49  ;;  %v1431_v32 = vmul.f32 0.00390625, %v1321_v39  ;;  %v766_v3 = vpop.f32.mrf.mxu1  ;;  %v4158_v61 = vmul.f32 0.00390625, %v1096_v1 }
 0x21f   : > { %5639 = vst [vmem:[#allocation52_spill] sm:$0xff] %v4145_v57  ;;  %v1507_v23 = vsub.f32 %v1431_v32, %v1469_v51  ;;  %944 = vmatmul.f32.gmra.mxu2 %v3168_v12  ;;  %v1139_v22 = vadd.f32 %v4145_v57, %v4141_v14  ;;  %v1275_v8 = vmul.f32 %v4145_v57, %v4145_v57 }
 0x220   : > { %1075 = vmatmul.f32.gmra.mxu3 %v3169_v47  ;;  %v4163_v51 = vadd.f32 %v766_v3, %v636_v42 }
 0x221   : > { %v3087_v49 = vpop.eup %3086  ;;  %v4160_v39 = vadd.f32 1e-05, %v1507_v23  ;;  %1140 = vadd.xlane.f32.xlu1 %v1139_v22  ;;  %v1367_v28 = vadd.f32 %v1275_v8, %v1274_v17  ;;  %v1470_v17 = vmul.f32 %v4158_v61, %v4158_v61 }
 0x222   : > { %v1583_v40 = vmul.f32 %v3087_v49, %v4139_v29  ;;  %v897_v58 = vpop.f32.mrf.mxu2  ;;  %5640 = vst [vmem:[#allocation53_spill] sm:$0xff] %v4163_v51  ;;  %v1276_v14 = vmul.f32 %v4163_v51, %v4163_v51  ;;  %vm1589_vm0 = vweird.f32 %v3087_v49  ;;  %v4216_v29 = vmul.f32 %v3802_v25, %v3802_v25 }
 0x223   : > { %v1028_v47 = vpop.f32.mrf.mxu3  ;;  %3088 = vrsqrt.f32 %v4160_v39  ;;  %v898_v32 = vadd.f32 %v897_v58, %v3881_v24  ;;  %1368 = vadd.xlane.f32.xlu2 %v1367_v28  ;;  %v4177_v28 = vmul.f32 %v3785_v53, %v3785_v53  ;;  %v4181_v58 = vmul.f32 %v3792_v7, %v3792_v7  ;;  %vm1590_vm2 = vmor %vm1588_vm1, %vm1589_vm0 }
 0x224   : > { %v1584_v12 = vmul.f32 %v3087_v49, %v1583_v40  ;;  %v1324_v57 = vpop.xlane.xlu2 %1323  ;;  %v1099_v1 = vpop.xlane.xlu0 %1098  ;;  %v1962_v40 = vld [vmem:[#allocation8] sm:$0x3]  ;;  %vm1598_vm4 = vweird.f32 %v4160_v39 }
 0x225   : > { %v4167_v23 = vadd.f32 %v1028_v47, %v898_v32  ;;  %v1432_v22 = vmul.f32 0.00390625, %v1324_v57  ;;  %v4171_v8 = vmul.f32 0.00390625, %v1099_v1  ;;  %v3170_v1 = vld [vmem:[%s3642_s14 + $0x118] sm:$0xff] }
 0x226   : > { %v1585_v42 = vmul.f32 0.5, %v1584_v12  ;;  %v1327_v3 = vpop.xlane.xlu1 %1326  ;;  %v3171_v12 = vld [vmem:[%s3650_s20 + $0x118] sm:$0xff] }
 0x227   : > { %5641 = vst [vmem:[#allocation54_spill] sm:$0xff] %v4167_v23  ;;  %v1508_v47 = vsub.f32 %v1432_v22, %v1470_v17  ;;  %v1433_v32 = vmul.f32 0.00390625, %v1327_v3  ;;  %v1471_v57 = vmul.f32 %v4171_v8, %v4171_v8  ;;  %947 = vmatmul.f32.gmra.mxu2 %v3170_v1  ;;  %v1142_v16 = vadd.f32 %v4167_v23, %v4163_v51 }
 0x228   : > { %1078 = vmatmul.f32.gmra.mxu3 %v3171_v12  ;;  %v1586_v60 = vsub.f32 1.5, %v1585_v42  ;;  %v1277_v52 = vmul.f32 %v4167_v23, %v4167_v23  ;;  %v4199_v1 = vperm.slane %v1962_v40, 0  ;;  %v4201_v12 = vperm.slane %v1962_v40, 1 }
 0x229   : > { %v4195_v17 = vpop.eup %3088  ;;  %v4197_v22 = vadd.f32 1e-05, %v1508_v47  ;;  %v1509_v3 = vsub.f32 %v1433_v32, %v1471_v57  ;;  %1143 = vadd.xlane.f32.xlu0 %v1142_v16  ;;  %v2044_v47 = vld [vmem:[%s5530_s5] sm:$0x3]  ;;  %v4221_v32 = vmul.f32 %v3807_v31, %v3807_v31  ;;  %v4225_v57 = vmul.f32 %v3812_v41, %v3812_v41 }
 0x22a   : > { %v1587_v51 = vmul.f32 %v3087_v49, %v1586_v60  ;;  %v1593_v42 = vmul.f32 %v4195_v17, %v4160_v39  ;;  %v900_v23 = vpop.f32.mrf.mxu2  ;;  %v1370_v9 = vadd.f32 %v1277_v52, %v1276_v14  ;;  %v4236_v63 = vperm.slane %v2044_v47, 1  ;;  %v3174_v39 = vld [vmem:[%s3642_s14 + $0x128] sm:$0xff] }
 0x22b   : > { %v1031_v0 = vpop.f32.mrf.mxu3  ;;  %3090 = vrsqrt.f32 %v4197_v22  ;;  %v4211_v16 = vadd.f32 1e-05, %v1509_v3  ;;  %v901_v60 = vadd.f32 %v900_v23, %v3881_v24  ;;  %vm1599_vm3 = vweird.f32 %v4195_v17 }
 0x22c   : > { %v1594_v40 = vmul.f32 %v4195_v17, %v1593_v42  ;;  %1371 = vadd.xlane.f32.xlu1 %v1370_v9  ;;  %v1102_v52 = vpop.xlane.xlu2 %1101  ;;  %v1591_v14 = vsel %vm1590_vm2, %v3087_v49, %v1587_v51  ;;  %v4232_v42 = vperm.slane %v2044_v47, 0  ;;  %vm1600_vm5 = vmor %vm1598_vm4, %vm1599_vm3  ;;  %vm1608_vm6 = vweird.f32 %v4197_v22 }
 0x22d   : > { %3092 = vrsqrt.f32 %v4211_v16  ;;  %v4228_v23 = vadd.f32 %v1031_v0, %v901_v60  ;;  %v4230_v3 = vmul.f32 0.00390625, %v1102_v52  ;;  %v1968_v49 = vmul.f32 %v4199_v1, %v1591_v14  ;;  %v3173_v0 = vld [vmem:[%s3650_s20 + $0x120] sm:$0xff] }
 0x22e   : > { %v1595_v9 = vmul.f32 0.5, %v1594_v40  ;;  %v1330_v6 = vpop.xlane.xlu0 %1329  ;;  %v1969_v51 = vmul.f32 %v4201_v12, %v1591_v14  ;;  %v4250_v14 = vmul.f32 %v3817_v56, %v3817_v56  ;;  %vm1618_vm8 = vweird.f32 %v4211_v16 }
 0x22f   : > { %5642 = vst [vmem:[#allocation55_spill] sm:$0xff] %v4228_v23  ;;  %v1472_v2 = vmul.f32 %v4230_v3, %v4230_v3  ;;  %v1434_v59 = vmul.f32 0.00390625, %v1330_v6  ;;  %950 = vmatmul.f32.gmra.mxu2 %v3172_v62  ;;  %v1145_v60 = vadd.f32 %v4228_v23, %v3785_v53  ;;  %v1279_v40 = vmul.f32 %v4228_v23, %v4228_v23 }
 0x230   : > { %1081 = vmatmul.f32.gmra.mxu3 %v3173_v0  ;;  %v1596_v52 = vsub.f32 1.5, %v1595_v9  ;;  %v2045_v55 = vmul.f32 %v1968_v49, %v4121_v45  ;;  %v2046_v47 = vmul.f32 %v1969_v51, %v4121_v45  ;;  %v4257_v53 = vmul.f32 %v3822_v4, %v3822_v4 }
 0x231   : > { %v4252_v6 = vpop.eup %3090  ;;  %v1510_v62 = vsub.f32 %v1434_v59, %v1472_v2  ;;  %1146 = vadd.xlane.f32.xlu2 %v1145_v60  ;;  %v1373_v0 = vadd.f32 %v1279_v40, %v4177_v28  ;;  %v4261_v9 = vmul.f32 %v3827_v20, %v3827_v20  ;;  %v2202_v59 = vmul.f32 %v1968_v49, %v3886_v15 }
 0x232   : > { %v1603_v45 = vmul.f32 %v4252_v6, %v4197_v22  ;;  %v903_v23 = vpop.f32.mrf.mxu2  ;;  %v2126_v46 = vsub.f32 %v4232_v42, %v2045_v55  ;;  %v2127_v2 = vsub.f32 %v4236_v63, %v2046_v47  ;;  %v1597_v47 = vmul.f32 %v4195_v17, %v1596_v52 }
 0x233   : > { %5643 = vst [vmem:[#allocation56_spill] sm:$0xff] %v4261_v9  ;;  %v1034_v35 = vpop.f32.mrf.mxu3  ;;  %v4268_v28 = vpop.eup %3092  ;;  %v4271_v60 = vadd.f32 1e-05, %v1510_v62  ;;  %v904_v40 = vadd.f32 %v903_v23, %v3881_v24  ;;  %1374 = vadd.xlane.f32.xlu0 %v1373_v0  ;;  %v2203_v9 = vmul.f32 %v1969_v51, %v3890_v21  ;;  %vm1609_vm7 = vweird.f32 %v4252_v6 }
 0x234   : > { %v1604_v20 = vmul.f32 %v4252_v6, %v1603_v45  ;;  %v1613_v55 = vmul.f32 %v4268_v28, %v4211_v16  ;;  %v1105_v15 = vpop.xlane.xlu1 %1104  ;;  %v2278_v49 = vadd.f32 %v2202_v59, %v2126_v46  ;;  %v3175_v59 = vld [vmem:[%s3650_s20 + $0x128] sm:$0xff]  ;;  %vm1610_vm9 = vmor %vm1608_vm6, %vm1609_vm7  ;;  %vm1619_vm10 = vweird.f32 %v4268_v28 }
 0x235   : > { %3094 = vrsqrt.f32 %v4271_v60  ;;  %v4281_v62 = vadd.f32 %v1034_v35, %v904_v40  ;;  %v4283_v23 = vmul.f32 0.00390625, %v1105_v15  ;;  %v2279_v54 = vadd.f32 %v2203_v9, %v2127_v2  ;;  %vm1620_vm13 = vmor %vm1618_vm8, %vm1619_vm10 }
 0x236   : > { %v1605_v21 = vmul.f32 0.5, %v1604_v20  ;;  %v1614_v51 = vmul.f32 %v4268_v28, %v1613_v55  ;;  %v1333_v0 = vpop.xlane.xlu2 %1332  ;;  %v2354_v45 = vmax.f32 %v2278_v49, 0.0  ;;  %v1601_v2 = vsel %vm1600_vm5, %v4195_v17, %v1597_v47 }
 0x237   : > { %5644 = vst [vmem:[#allocation57_spill] sm:$0xff] %v4281_v62  ;;  %v1435_v46 = vmul.f32 0.00390625, %v1333_v0  ;;  %v1473_v52 = vmul.f32 %v4283_v23, %v4283_v23  ;;  %953 = vmatmul.f32.gmra.mxu2 %v3174_v39  ;;  %v1148_v35 = vadd.f32 %v4281_v62, %v3792_v7  ;;  %v1281_v20 = vmul.f32 %v4281_v62, %v4281_v62 }
 0x238   : > { %1084 = vmatmul.f32.gmra.mxu3 %v3175_v59  ;;  %v1606_v40 = vsub.f32 1.5, %v1605_v21  ;;  %v1615_v55 = vmul.f32 0.5, %v1614_v51  ;;  %2482 = vmatmul.f32.vlgmr.msrb.gmra.mxu0 %v2354_v45  ;;  %v2355_v9 = vmax.f32 %v2279_v54, 0.0  ;;  %v1970_v0 = vmul.f32 %v4199_v1, %v1601_v2 }
 0x239   : > { %v1511_v15 = vsub.f32 %v1435_v46, %v1473_v52  ;;  %1149 = vadd.xlane.f32.xlu1 %v1148_v35  ;;  %v1376_v49 = vadd.f32 %v1281_v20, %v4181_v58  ;;  %v1971_v39 = vmul.f32 %v4201_v12, %v1601_v2  ;;  %v4305_v54 = vmul.f32 %v3832_v27, %v3832_v27 }
 0x23a   : > { %2613 = vmatmul.f32.vlgmr.msrb.gmra.mxu1 %v2355_v9  ;;  %v906_v59 = vpop.f32.mrf.mxu2  ;;  %v1607_v51 = vmul.f32 %v4252_v6, %v1606_v40  ;;  %v2047_v45 = vmul.f32 %v1970_v0, %v4137_v13  ;;  %v1616_v46 = vsub.f32 1.5, %v1615_v55  ;;  %v2204_v20 = vmul.f32 %v1970_v0, %v3898_v34 }
 0x23b   : > { %v1037_v21 = vpop.f32.mrf.mxu3  ;;  %v4307_v17 = vpop.eup %3094  ;;  %v4310_v58 = vadd.f32 1e-05, %v1511_v15  ;;  %v907_v47 = vadd.f32 %v906_v59, %v3881_v24  ;;  %1377 = vadd.xlane.f32.xlu2 %v1376_v49  ;;  %v2048_v40 = vmul.f32 %v1971_v39, %v4137_v13  ;;  %v2205_v55 = vmul.f32 %v1971_v39, %v3904_v18 }
 0x23c   : > { %v1623_v52 = vmul.f32 %v4307_v17, %v4271_v60  ;;  %v1108_v35 = vpop.xlane.xlu0 %1107  ;;  %v2128_v34 = vsub.f32 %v4232_v42, %v2047_v45  ;;  %v1611_v0 = vsel %vm1610_vm9, %v4252_v6, %v1607_v51  ;;  %vm1628_vm11 = vweird.f32 %v4271_v60 }
 0x23d   : > { %3096 = vrsqrt.f32 %v4310_v58  ;;  %v4323_v9 = vadd.f32 %v1037_v21, %v907_v47  ;;  %v4325_v2 = vmul.f32 0.00390625, %v1108_v35  ;;  %v2129_v13 = vsub.f32 %v4236_v63, %v2048_v40 }
 0x23e   : > { %v1624_v15 = vmul.f32 %v4307_v17, %v1623_v52  ;;  %v1336_v49 = vpop.xlane.xlu1 %1335  ;;  %v2280_v39 = vadd.f32 %v2204_v20, %v2128_v34  ;;  %v1972_v35 = vmul.f32 %v4199_v1, %v1611_v0  ;;  %v1973_v51 = vmul.f32 %v4201_v12, %v1611_v0 }
 0x23f   : > { %v1436_v59 = vmul.f32 0.00390625, %v1336_v49  ;;  %v1474_v22 = vmul.f32 %v4325_v2, %v4325_v2  ;;  %v1151_v21 = vadd.f32 %v4323_v9, %v3797_v19  ;;  %v1283_v47 = vmul.f32 %v4323_v9, %v4323_v9 }
 0x240   : > { %v1625_v18 = vmul.f32 0.5, %v1624_v15  ;;  %v2281_v52 = vadd.f32 %v2205_v55, %v2129_v13  ;;  %v2356_v40 = vmax.f32 %v2280_v39, 0.0  ;;  %v2049_v15 = vmul.f32 %v1972_v35, %v4158_v61 }
 0x241   : > { %v1512_v45 = vsub.f32 %v1436_v59, %v1474_v22  ;;  %1152 = vadd.xlane.f32.xlu0 %v1151_v21  ;;  %v1379_v6 = vadd.f32 %v1283_v47, %v4193_v5  ;;  %v1617_v20 = vmul.f32 %v4268_v28, %v1616_v46  ;;  %vm1629_vm12 = vweird.f32 %v4307_v17 }
 0x242   : > { %v2357_v49 = vmax.f32 %v2281_v52, 0.0  ;;  %v909_v19 = vpop.f32.mrf.mxu2  ;;  %v2050_v13 = vmul.f32 %v1973_v51, %v4158_v61  ;;  %v1626_v0 = vsub.f32 1.5, %v1625_v18  ;;  %2485 = vmatmul.f32.gmra.mxu0 %v2356_v40  ;;  %v2130_v46 = vsub.f32 %v4232_v42, %v2049_v15  ;;  %vm1630_vm0 = vmor %vm1628_vm11, %vm1629_vm12 }
 0x243   : > { %v1040_v62 = vpop.f32.mrf.mxu3  ;;  %v4345_v55 = vpop.eup %3096  ;;  %v4348_v34 = vadd.f32 1e-05, %v1512_v45  ;;  %v910_v5 = vadd.f32 %v909_v19, %v3881_v24  ;;  %1380 = vadd.xlane.f32.xlu1 %v1379_v6  ;;  %v2206_v21 = vmul.f32 %v1972_v35, %v3912_v11  ;;  %v2207_v47 = vmul.f32 %v1973_v51, %v3920_v37 }
 0x244   : > { %v1633_v59 = vmul.f32 %v4345_v55, %v4310_v58  ;;  %2616 = vmatmul.f32.gmra.mxu1 %v2357_v49  ;;  %v1111_v22 = vpop.xlane.xlu2 %1110  ;;  %v2131_v45 = vsub.f32 %v4236_v63, %v2050_v13  ;;  %v1621_v11 = vsel %vm1620_vm13, %v4268_v28, %v1617_v20  ;;  %vm1638_vm14 = vweird.f32 %v4310_v58 }
 0x245   : > { %3098 = vrsqrt.f32 %v4348_v34  ;;  %v4361_v19 = vadd.f32 %v1040_v62, %v910_v5  ;;  %v4363_v61 = vmul.f32 0.00390625, %v1111_v22  ;;  %v2282_v52 = vadd.f32 %v2206_v21, %v2130_v46 }
 0x246   : > { %v1634_v18 = vmul.f32 %v4345_v55, %v1633_v59  ;;  %v1339_v39 = vpop.xlane.xlu0 %1338  ;;  %v2283_v51 = vadd.f32 %v2207_v47, %v2131_v45  ;;  %v1974_v49 = vmul.f32 %v4199_v1, %v1621_v11  ;;  %v1975_v20 = vmul.f32 %v4201_v12, %v1621_v11 }
 0x247   : > { %v1475_v16 = vmul.f32 %v4363_v61, %v4363_v61  ;;  %v1437_v35 = vmul.f32 0.00390625, %v1339_v39  ;;  %v1154_v62 = vadd.f32 %v4361_v19, %v3802_v25  ;;  %v1285_v6 = vmul.f32 %v4361_v19, %v4361_v19 }
 0x248   : > { %v1635_v40 = vmul.f32 0.5, %v1634_v18  ;;  %v2358_v37 = vmax.f32 %v2282_v52, 0.0  ;;  %v2359_v13 = vmax.f32 %v2283_v51, 0.0  ;;  %v2051_v46 = vmul.f32 %v1974_v49, %v4171_v8 }
 0x249   : > { %v1513_v15 = vsub.f32 %v1437_v35, %v1475_v16  ;;  %1155 = vadd.xlane.f32.xlu2 %v1154_v62  ;;  %v1382_v28 = vadd.f32 %v1285_v6, %v4216_v29  ;;  %v1627_v21 = vmul.f32 %v4307_v17, %v1626_v0  ;;  %v2208_v52 = vmul.f32 %v1974_v49, %v3928_v10 }
 0x24a   : > { %v1636_v5 = vsub.f32 1.5, %v1635_v40  ;;  %v912_v59 = vpop.f32.mrf.mxu2  ;;  %v2052_v29 = vmul.f32 %v1975_v20, %v4171_v8  ;;  %vm1639_vm15 = vweird.f32 %v4345_v55  ;;  %2488 = vmatmul.f32.gmra.mxu0 %v2358_v37  ;;  %v2132_v0 = vsub.f32 %v4232_v42, %v2051_v46 }
 0x24b   : > { %v1043_v22 = vpop.f32.mrf.mxu3  ;;  %v4381_v18 = vpop.eup %3098  ;;  %v4383_v47 = vadd.f32 1e-05, %v1513_v15  ;;  %v913_v39 = vadd.f32 %v912_v59, %v3881_v24  ;;  %1383 = vadd.xlane.f32.xlu0 %v1382_v28  ;;  %v2209_v16 = vmul.f32 %v1975_v20, %v3935_v48  ;;  %v1631_v48 = vsel %vm1630_vm0, %v4307_v17, %v1627_v21  ;;  %vm1640_vm2 = vmor %vm1638_vm14, %vm1639_vm15 }
 0x24c   : > { %v1643_v45 = vmul.f32 %v4381_v18, %v4348_v34  ;;  %2619 = vmatmul.f32.gmra.mxu1 %v2359_v13  ;;  %v1114_v11 = vpop.xlane.xlu1 %1113  ;;  %v1637_v10 = vmul.f32 %v4345_v55, %v1636_v5  ;;  %v2284_v40 = vadd.f32 %v2208_v52, %v2132_v0  ;;  %v2133_v37 = vsub.f32 %v4236_v63, %v2052_v29 }
 0x24d   : > { %3100 = vrsqrt.f32 %v4383_v47  ;;  %v4399_v8 = vadd.f32 %v1043_v22, %v913_v39  ;;  %v4401_v35 = vmul.f32 0.00390625, %v1114_v11  ;;  %vm1648_vm1 = vweird.f32 %v4348_v34 }
 0x24e   : > { %v1644_v62 = vmul.f32 %v4381_v18, %v1643_v45  ;;  %v1342_v6 = vpop.xlane.xlu2 %1341  ;;  %v2285_v20 = vadd.f32 %v2209_v16, %v2133_v37  ;;  %v1976_v5 = vmul.f32 %v4199_v1, %v1631_v48  ;;  %v2360_v13 = vmax.f32 %v2284_v40, 0.0 }
 0x24f   : > { %v1438_v51 = vmul.f32 0.00390625, %v1342_v6  ;;  %v1476_v60 = vmul.f32 %v4401_v35, %v4401_v35  ;;  %v1157_v49 = vadd.f32 %v4399_v8, %v3807_v31  ;;  %v1287_v15 = vmul.f32 %v4399_v8, %v4399_v8 }
 0x250   : > { %v1645_v28 = vmul.f32 0.5, %v1644_v62  ;;  %v1977_v22 = vmul.f32 %v4201_v12, %v1631_v48  ;;  %v2361_v21 = vmax.f32 %v2285_v20, 0.0  ;;  %v2053_v29 = vmul.f32 %v1976_v5, %v4230_v3 }
 0x251   : > { %v1514_v17 = vsub.f32 %v1438_v51, %v1476_v60  ;;  %1158 = vadd.xlane.f32.xlu1 %v1157_v49  ;;  %v1385_v59 = vadd.f32 %v1287_v15, %v4221_v32  ;;  %v1641_v45 = vsel %vm1640_vm2, %v4345_v55, %v1637_v10  ;;  %v2210_v16 = vmul.f32 %v1976_v5, %v3948_v30 }
 0x252   : > { %v1646_v46 = vsub.f32 1.5, %v1645_v28  ;;  %v915_v39 = vpop.f32.mrf.mxu2  ;;  %v2054_v32 = vmul.f32 %v1977_v22, %v4230_v3  ;;  %vm1649_vm3 = vweird.f32 %v4381_v18  ;;  %2491 = vmatmul.f32.gmra.mxu0 %v2360_v13  ;;  %v2134_v55 = vsub.f32 %v4232_v42, %v2053_v29 }
 0x253   : > { %v1046_v52 = vpop.f32.mrf.mxu3  ;;  %v4422_v11 = vpop.eup %3100  ;;  %v4424_v0 = vadd.f32 1e-05, %v1514_v17  ;;  %v916_v58 = vadd.f32 %v915_v39, %v3881_v24  ;;  %1386 = vadd.xlane.f32.xlu2 %v1385_v59  ;;  %v2211_v10 = vmul.f32 %v1977_v22, %v3951_v38  ;;  %v1978_v49 = vmul.f32 %v4199_v1, %v1641_v45  ;;  %vm1650_vm5 = vmor %vm1648_vm1, %vm1649_vm3 }
 0x254   : > { %v1653_v62 = vmul.f32 %v4422_v11, %v4383_v47  ;;  %2622 = vmatmul.f32.gmra.mxu1 %v2361_v21  ;;  %v1117_v6 = vpop.xlane.xlu0 %1116  ;;  %v1647_v40 = vmul.f32 %v4381_v18, %v1646_v46  ;;  %v2286_v51 = vadd.f32 %v2210_v16, %v2134_v55  ;;  %v2135_v60 = vsub.f32 %v4236_v63, %v2054_v32 }
 0x255   : > { %3102 = vrsqrt.f32 %v4424_v0  ;;  %v4436_v37 = vadd.f32 %v1046_v52, %v916_v58  ;;  %v4438_v30 = vmul.f32 0.00390625, %v1117_v6  ;;  %vm1658_vm4 = vweird.f32 %v4383_v47 }
 0x256   : > { %v1654_v3 = vmul.f32 %v4422_v11, %v1653_v62  ;;  %v1345_v48 = vpop.xlane.xlu1 %1344  ;;  %v2287_v17 = vadd.f32 %v2211_v10, %v2135_v60  ;;  %v2055_v13 = vmul.f32 %v1978_v49, %v4283_v23  ;;  %v2362_v22 = vmax.f32 %v2286_v51, 0.0 }
 0x257   : > { %v1439_v15 = vmul.f32 0.00390625, %v1345_v48  ;;  %v1477_v38 = vmul.f32 %v4438_v30, %v4438_v30  ;;  %v1160_v28 = vadd.f32 %v4436_v37, %v3812_v41  ;;  %v1289_v20 = vmul.f32 %v4436_v37, %v4436_v37 }
 0x258   : > { %v1655_v5 = vmul.f32 0.5, %v1654_v3  ;;  %v1979_v21 = vmul.f32 %v4201_v12, %v1641_v45  ;;  %v2363_v52 = vmax.f32 %v2287_v17, 0.0  ;;  %v2136_v16 = vsub.f32 %v4232_v42, %v2055_v13 }
 0x259   : > { %v1515_v59 = vsub.f32 %v1439_v15, %v1477_v38  ;;  %1161 = vadd.xlane.f32.xlu0 %v1160_v28  ;;  %v1388_v46 = vadd.f32 %v1289_v20, %v4225_v57  ;;  %v2212_v32 = vmul.f32 %v1978_v49, %v3964_v44  ;;  %v1651_v34 = vsel %vm1650_vm5, %v4381_v18, %v1647_v40 }
 0x25a   : > { %v1656_v39 = vsub.f32 1.5, %v1655_v5  ;;  %v918_v29 = vpop.f32.mrf.mxu2  ;;  %v2056_v45 = vmul.f32 %v1979_v21, %v4283_v23  ;;  %vm1659_vm6 = vweird.f32 %v4422_v11  ;;  %2494 = vmatmul.f32.gmra.mxu0 %v2362_v22  ;;  %v2213_v3 = vmul.f32 %v1979_v21, %v3967_v26 }
 0x25b   : > { %v1049_v58 = vpop.f32.mrf.mxu3  ;;  %v4459_v62 = vpop.eup %3102  ;;  %v4461_v6 = vadd.f32 1e-05, %v1515_v59  ;;  %v919_v57 = vadd.f32 %v918_v29, %v3881_v24  ;;  %1389 = vadd.xlane.f32.xlu1 %v1388_v46  ;;  %v2288_v44 = vadd.f32 %v2212_v32, %v2136_v16  ;;  %v1980_v15 = vmul.f32 %v4199_v1, %v1651_v34  ;;  %vm1660_vm7 = vmor %vm1658_vm4, %vm1659_vm6 }
 0x25c   : > { %v1663_v55 = vmul.f32 %v4459_v62, %v4424_v0  ;;  %2625 = vmatmul.f32.gmra.mxu1 %v2363_v52  ;;  %v1120_v10 = vpop.xlane.xlu2 %1119  ;;  %v1657_v48 = vmul.f32 %v4422_v11, %v1656_v39  ;;  %v2137_v49 = vsub.f32 %v4236_v63, %v2056_v45  ;;  %v1981_v21 = vmul.f32 %v4201_v12, %v1651_v34 }
 0x25d   : > { %3104 = vrsqrt.f32 %v4461_v6  ;;  %v4472_v51 = vadd.f32 %v1049_v58, %v919_v57  ;;  %v4474_v23 = vmul.f32 0.00390625, %v1120_v10  ;;  %v2364_v60 = vmax.f32 %v2288_v44, 0.0 }
 0x25e   : > { %v1664_v18 = vmul.f32 %v4459_v62, %v1663_v55  ;;  %v1348_v40 = vpop.xlane.xlu0 %1347  ;;  %v2289_v17 = vadd.f32 %v2213_v3, %v2137_v49  ;;  %v2057_v13 = vmul.f32 %v1980_v15, %v4325_v2  ;;  %v2214_v59 = vmul.f32 %v1980_v15, %v3979_v33 }
 0x25f   : > { %v1478_v38 = vmul.f32 %v4474_v23, %v4474_v23  ;;  %v1440_v26 = vmul.f32 0.00390625, %v1348_v40  ;;  %v1163_v28 = vadd.f32 %v4472_v51, %v3817_v56  ;;  %v1291_v20 = vmul.f32 %v4472_v51, %v4472_v51 }
 0x260   : > { %v1665_v5 = vmul.f32 0.5, %v1664_v18  ;;  %v1661_v39 = vsel %vm1660_vm7, %v4422_v11, %v1657_v48  ;;  %v2365_v29 = vmax.f32 %v2289_v17, 0.0  ;;  %v2138_v47 = vsub.f32 %v4232_v42, %v2057_v13 }
 0x261   : > { %v1516_v22 = vsub.f32 %v1440_v26, %v1478_v38  ;;  %1164 = vadd.xlane.f32.xlu2 %v1163_v28  ;;  %v1391_v46 = vadd.f32 %v1291_v20, %v4250_v14  ;;  %v1982_v32 = vmul.f32 %v4199_v1, %v1661_v39  ;;  %v2058_v14 = vmul.f32 %v1981_v21, %v4325_v2 }
 0x262   : > { %v1666_v52 = vsub.f32 1.5, %v1665_v5  ;;  %v921_v58 = vpop.f32.mrf.mxu2  ;;  %v4504_v11 = vmul.f32 %v3837_v36, %v3837_v36  ;;  %vm1668_vm8 = vweird.f32 %v4424_v0  ;;  %vm1669_vm9 = vweird.f32 %v4459_v62  ;;  %2497 = vmatmul.f32.gmra.mxu0 %v2364_v60 }
 0x263   : > { %v1052_v16 = vpop.f32.mrf.mxu3  ;;  %v4496_v57 = vpop.eup %3104  ;;  %v4498_v45 = vadd.f32 1e-05, %v1516_v22  ;;  %v922_v33 = vadd.f32 %v921_v58, %v3881_v24  ;;  %1392 = vadd.xlane.f32.xlu0 %v1391_v46  ;;  %v2290_v10 = vadd.f32 %v2214_v59, %v2138_v47  ;;  %v2139_v40 = vsub.f32 %v4236_v63, %v2058_v14  ;;  %vm1670_vm10 = vmor %vm1668_vm8, %vm1669_vm9 }
 0x264   : > { %v1673_v34 = vmul.f32 %v4496_v57, %v4461_v6  ;;  %2628 = vmatmul.f32.gmra.mxu1 %v2365_v29  ;;  %v1123_v55 = vpop.xlane.xlu1 %1122  ;;  %v1667_v44 = vmul.f32 %v4459_v62, %v1666_v52  ;;  %v2215_v49 = vmul.f32 %v1981_v21, %v3982_v50  ;;  %v2059_v60 = vmul.f32 %v1982_v32, %v4363_v61 }
 0x265   : > { %3106 = vrsqrt.f32 %v4498_v45  ;;  %v4512_v2 = vadd.f32 %v1052_v16, %v922_v33  ;;  %v4514_v3 = vmul.f32 0.00390625, %v1123_v55  ;;  %v2366_v5 = vmax.f32 %v2290_v10, 0.0 }
 0x266   : > { %v1674_v48 = vmul.f32 %v4496_v57, %v1673_v34  ;;  %v1351_v18 = vpop.xlane.xlu2 %1350  ;;  %v2291_v50 = vadd.f32 %v2215_v49, %v2139_v40  ;;  %v2140_v17 = vsub.f32 %v4232_v42, %v2059_v60  ;;  %v1983_v22 = vmul.f32 %v4201_v12, %v1661_v39  ;;  %v5645_v39 = vld [vmem:[#allocation24_spill] sm:$0xff] }
 0x267   : > { %v1441_v15 = vmul.f32 0.00390625, %v1351_v18  ;;  %v1479_v38 = vmul.f32 %v4514_v3, %v4514_v3  ;;  %v1166_v26 = vadd.f32 %v4512_v2, %v3822_v4  ;;  %v1293_v28 = vmul.f32 %v4512_v2, %v4512_v2  ;;  %v5646_v40 = vld [vmem:[#allocation32_spill] sm:$0xff] }
 0x268   : > { %v1675_v20 = vmul.f32 0.5, %v1674_v48  ;;  %v1671_v46 = vsel %vm1670_vm10, %v4459_v62, %v1667_v44  ;;  %v2367_v52 = vmax.f32 %v2291_v50, 0.0  ;;  %v2216_v0 = vmul.f32 %v1982_v32, %v3993_v43 }
 0x269   : > { %v1517_v13 = vsub.f32 %v1441_v15, %v1479_v38  ;;  %1167 = vadd.xlane.f32.xlu1 %v1166_v26  ;;  %v1394_v59 = vadd.f32 %v1293_v28, %v4257_v53  ;;  %v1984_v16 = vmul.f32 %v4199_v1, %v1671_v46  ;;  %v2060_v53 = vmul.f32 %v1983_v22, %v4363_v61  ;;  %v5647_v26 = vld [vmem:[#allocation23_spill] sm:$0xff] }
 0x26a   : > { %v1676_v21 = vsub.f32 1.5, %v1675_v20  ;;  %v924_v29 = vpop.f32.mrf.mxu2  ;;  %v4544_v62 = vmul.f32 %v5645_v39, %v5645_v39  ;;  %vm1678_vm11 = vweird.f32 %v4461_v6  ;;  %vm1679_vm12 = vweird.f32 %v4496_v57  ;;  %2500 = vmatmul.f32.gmra.mxu0 %v2366_v5 }
 0x26b   : > { %v1055_v58 = vpop.f32.mrf.mxu3  ;;  %v4536_v47 = vpop.eup %3106  ;;  %v4538_v33 = vadd.f32 1e-05, %v1517_v13  ;;  %v925_v14 = vadd.f32 %v924_v29, %v3881_v24  ;;  %1395 = vadd.xlane.f32.xlu2 %v1394_v59  ;;  %v2292_v34 = vadd.f32 %v2216_v0, %v2140_v17  ;;  %v2141_v18 = vsub.f32 %v4236_v63, %v2060_v53  ;;  %vm1680_vm13 = vmor %vm1678_vm11, %vm1679_vm12 }
 0x26c   : > { %v1683_v43 = vmul.f32 %v4536_v47, %v4498_v45  ;;  %2631 = vmatmul.f32.gmra.mxu1 %v2367_v52  ;;  %v1126_v32 = vpop.xlane.xlu0 %1125  ;;  %v1677_v55 = vmul.f32 %v4496_v57, %v1676_v21  ;;  %v2217_v49 = vmul.f32 %v1983_v22, %v5646_v40  ;;  %v2061_v60 = vmul.f32 %v1984_v16, %v4401_v35  ;;  %v5648_v21 = vld [vmem:[#allocation56_spill] sm:$0xff] }
 0x26d   : > { %3108 = vrsqrt.f32 %v4538_v33  ;;  %v4552_v61 = vadd.f32 %v1055_v58, %v925_v14  ;;  %v4554_v10 = vmul.f32 0.00390625, %v1126_v32  ;;  %v1985_v13 = vmul.f32 %v4201_v12, %v1671_v46 }
 0x26e   : > { %v1684_v44 = vmul.f32 %v4536_v47, %v1683_v43  ;;  %v1354_v48 = vpop.xlane.xlu1 %1353  ;;  %v2293_v50 = vadd.f32 %v2217_v49, %v2141_v18  ;;  %v2142_v17 = vsub.f32 %v4232_v42, %v2061_v60  ;;  %v2368_v22 = vmax.f32 %v2292_v34, 0.0  ;;  %v5649_v43 = vld [vmem:[#allocation33_spill] sm:$0xff] }
 0x26f   : > { %v1442_v15 = vmul.f32 0.00390625, %v1354_v48  ;;  %v1480_v38 = vmul.f32 %v4554_v10, %v4554_v10  ;;  %v1169_v28 = vadd.f32 %v4552_v61, %v5647_v26  ;;  %v1295_v20 = vmul.f32 %v4552_v61, %v4552_v61  ;;  %v5650_v18 = vld [vmem:[#allocation25_spill] sm:$0xff] }
 0x270   : > { %v1685_v5 = vmul.f32 0.5, %v1684_v44  ;;  %v1681_v29 = vsel %vm1680_vm13, %v4496_v57, %v1677_v55  ;;  %v2369_v0 = vmax.f32 %v2293_v50, 0.0  ;;  %v2218_v6 = vmul.f32 %v1984_v16, %v5649_v43 }
 0x271   : > { %v1518_v59 = vsub.f32 %v1442_v15, %v1480_v38  ;;  %1170 = vadd.xlane.f32.xlu0 %v1169_v28  ;;  %v1397_v52 = vadd.f32 %v1295_v20, %v5648_v21  ;;  %v2062_v32 = vmul.f32 %v1985_v13, %v4401_v35  ;;  %v1986_v34 = vmul.f32 %v4199_v1, %v1681_v29  ;;  %v5651_v20 = vld [vmem:[#allocation34_spill] sm:$0xff] }
 0x272   : > { %v1686_v58 = vsub.f32 1.5, %v1685_v5  ;;  %v927_v14 = vpop.f32.mrf.mxu2  ;;  %v4584_v57 = vmul.f32 %v5650_v18, %v5650_v18  ;;  %vm1688_vm14 = vweird.f32 %v4498_v45  ;;  %vm1689_vm15 = vweird.f32 %v4536_v47  ;;  %2503 = vmatmul.f32.gmra.mxu0 %v2368_v22 }
 0x273   : > { %v1058_v53 = vpop.f32.mrf.mxu3  ;;  %v4576_v44 = vpop.eup %3108  ;;  %v4578_v48 = vadd.f32 1e-05, %v1518_v59  ;;  %v928_v46 = vadd.f32 %v927_v14, %v3881_v24  ;;  %1398 = vadd.xlane.f32.xlu1 %v1397_v52  ;;  %v2294_v55 = vadd.f32 %v2218_v6, %v2142_v17  ;;  %v2143_v28 = vsub.f32 %v4236_v63, %v2062_v32  ;;  %vm1690_vm0 = vmor %vm1688_vm14, %vm1689_vm15 }
 0x274   : > { %v1693_v35 = vmul.f32 %v4576_v44, %v4538_v33  ;;  %2634 = vmatmul.f32.gmra.mxu1 %v2369_v0  ;;  %v1129_v16 = vpop.xlane.xlu2 %1128  ;;  %v1687_v40 = vmul.f32 %v4536_v47, %v1686_v58  ;;  %v2219_v5 = vmul.f32 %v1985_v13, %v5651_v20  ;;  %v2063_v50 = vmul.f32 %v1986_v34, %v4438_v30 }
 0x275   : > { %3110 = vrsqrt.f32 %v4578_v48  ;;  %v4592_v49 = vadd.f32 %v1058_v53, %v928_v46  ;;  %v4594_v60 = vmul.f32 0.00390625, %v1129_v16  ;;  %v1987_v0 = vmul.f32 %v4201_v12, %v1681_v29 }
 0x276   : > { %v1694_v15 = vmul.f32 %v4576_v44, %v1693_v35  ;;  %v1357_v38 = vpop.xlane.xlu0 %1356  ;;  %v2295_v58 = vadd.f32 %v2219_v5, %v2143_v28  ;;  %v2144_v13 = vsub.f32 %v4232_v42, %v2063_v50  ;;  %v2370_v53 = vmax.f32 %v2294_v55, 0.0 }
 0x277   : > { %v1481_v17 = vmul.f32 %v4594_v60, %v4594_v60  ;;  %v1443_v59 = vmul.f32 0.00390625, %v1357_v38  ;;  %v1172_v22 = vadd.f32 %v4592_v49, %v3832_v27  ;;  %v1297_v21 = vmul.f32 %v4592_v49, %v4592_v49  ;;  %v5652_v38 = vld [vmem:[#allocation35_spill] sm:$0xff] }
 0x278   : > { %v1695_v52 = vmul.f32 0.5, %v1694_v15  ;;  %v1691_v6 = vsel %vm1690_vm0, %v4536_v47, %v1687_v40  ;;  %v2371_v46 = vmax.f32 %v2295_v58, 0.0  ;;  %v2220_v45 = vmul.f32 %v1986_v34, %v5652_v38 }
 0x279   : > { %v1519_v14 = vsub.f32 %v1443_v59, %v1481_v17  ;;  %1173 = vadd.xlane.f32.xlu2 %v1172_v22  ;;  %v1400_v43 = vadd.f32 %v1297_v21, %v4305_v54  ;;  %v2064_v15 = vmul.f32 %v1987_v0, %v4438_v30  ;;  %v1988_v55 = vmul.f32 %v4199_v1, %v1691_v6  ;;  %v5653_v54 = vld [vmem:[#allocation26_spill] sm:$0xff] }
 0x27a   : > { %v1696_v32 = vsub.f32 1.5, %v1695_v52  ;;  %v930_v35 = vpop.f32.mrf.mxu2  ;;  %v4624_v47 = vmul.f32 %v5653_v54, %v5653_v54  ;;  %vm1698_vm1 = vweird.f32 %v4538_v33  ;;  %vm1699_vm2 = vweird.f32 %v4576_v44  ;;  %2506 = vmatmul.f32.gmra.mxu0 %v2370_v53  ;;  %v5655_v52 = vld [vmem:[#allocation36_spill] sm:$0xff] }
 0x27b   : > { %v1061_v16 = vpop.f32.mrf.mxu3  ;;  %v4616_v28 = vpop.eup %3110  ;;  %v4618_v20 = vadd.f32 1e-05, %v1519_v14  ;;  %v931_v29 = vadd.f32 %v930_v35, %v3881_v24  ;;  %1401 = vadd.xlane.f32.xlu0 %v1400_v43  ;;  %v2296_v40 = vadd.f32 %v2220_v45, %v2144_v13  ;;  %v2145_v21 = vsub.f32 %v4236_v63, %v2064_v15  ;;  %vm1700_vm3 = vmor %vm1698_vm1, %vm1699_vm2 }
 0x27c   : > { %v1703_v30 = vmul.f32 %v4616_v28, %v4578_v48  ;;  %2637 = vmatmul.f32.gmra.mxu1 %v2371_v46  ;;  %v1132_v34 = vpop.xlane.xlu1 %1131  ;;  %v1697_v5 = vmul.f32 %v4576_v44, %v1696_v32  ;;  %v2221_v58 = vmul.f32 %v1987_v0, %v5655_v52  ;;  %v2065_v14 = vmul.f32 %v1988_v55, %v4474_v23 }
 0x27d   : > { %3112 = vrsqrt.f32 %v4618_v20  ;;  %v4632_v50 = vadd.f32 %v1061_v16, %v931_v29  ;;  %v4634_v17 = vmul.f32 0.00390625, %v1132_v34  ;;  %v1989_v16 = vmul.f32 %v4201_v12, %v1691_v6 }
 0x27e   : > { %v1704_v59 = vmul.f32 %v4616_v28, %v1703_v30  ;;  %v1360_v22 = vpop.xlane.xlu2 %1359  ;;  %v2297_v35 = vadd.f32 %v2221_v58, %v2145_v21  ;;  %v2146_v0 = vsub.f32 %v4232_v42, %v2065_v14  ;;  %v2372_v45 = vmax.f32 %v2296_v40, 0.0 }
 0x27f   : > { %5654 = vst [vmem:[#allocation32_spill] sm:$0xff] %v4632_v50  ;;  %v1444_v53 = vmul.f32 0.00390625, %v1360_v22  ;;  %v1482_v13 = vmul.f32 %v4634_v17, %v4634_v17  ;;  %v1175_v43 = vadd.f32 %v4632_v50, %v3837_v36  ;;  %v1299_v32 = vmul.f32 %v4632_v50, %v4632_v50  ;;  %v5656_v50 = vld [vmem:[#allocation37_spill] sm:$0xff] }
 0x280   : > { %v1705_v46 = vmul.f32 0.5, %v1704_v59  ;;  %v1701_v29 = vsel %vm1700_vm3, %v4576_v44, %v1697_v5  ;;  %v2373_v34 = vmax.f32 %v2297_v35, 0.0  ;;  %v2222_v33 = vmul.f32 %v1988_v55, %v5656_v50 }
 0x281   : > { %v1520_v38 = vsub.f32 %v1444_v53, %v1482_v13  ;;  %1176 = vadd.xlane.f32.xlu1 %v1175_v43  ;;  %v1403_v15 = vadd.f32 %v1299_v32, %v4504_v11  ;;  %v2066_v59 = vmul.f32 %v1989_v16, %v4474_v23  ;;  %v1990_v40 = vmul.f32 %v4199_v1, %v1701_v29  ;;  %v5657_v11 = vld [vmem:[#allocation27_spill] sm:$0xff] }
 0x282   : > { %v1706_v30 = vsub.f32 1.5, %v1705_v46  ;;  %v933_v22 = vpop.f32.mrf.mxu2  ;;  %v4664_v44 = vmul.f32 %v5657_v11, %v5657_v11  ;;  %vm1708_vm4 = vweird.f32 %v4578_v48  ;;  %vm1709_vm5 = vweird.f32 %v4616_v28  ;;  %2509 = vmatmul.f32.gmra.mxu0 %v2372_v45  ;;  %v5659_v46 = vld [vmem:[#allocation38_spill] sm:$0xff] }
 0x283   : > { %v1064_v52 = vpop.f32.mrf.mxu3  ;;  %v4656_v21 = vpop.eup %3112  ;;  %v4658_v58 = vadd.f32 1e-05, %v1520_v38  ;;  %v934_v6 = vadd.f32 %v933_v22, %v3881_v24  ;;  %1404 = vadd.xlane.f32.xlu2 %v1403_v15  ;;  %v2298_v5 = vadd.f32 %v2222_v33, %v2146_v0  ;;  %v2147_v32 = vsub.f32 %v4236_v63, %v2066_v59  ;;  %vm1710_vm6 = vmor %vm1708_vm4, %vm1709_vm5 }
 0x284   : > { %v1713_v23 = vmul.f32 %v4656_v21, %v4618_v20  ;;  %2640 = vmatmul.f32.gmra.mxu1 %v2373_v34  ;;  %v1135_v55 = vpop.xlane.xlu0 %1134  ;;  %v1707_v50 = vmul.f32 %v4616_v28, %v1706_v30  ;;  %v2223_v35 = vmul.f32 %v1989_v16, %v5659_v46  ;;  %v2067_v38 = vmul.f32 %v1990_v40, %v4514_v3 }
 0x285   : > { %3114 = vrsqrt.f32 %v4658_v58  ;;  %v4672_v14 = vadd.f32 %v1064_v52, %v934_v6  ;;  %v4674_v53 = vmul.f32 0.00390625, %v1135_v55  ;;  %v1991_v52 = vmul.f32 %v4201_v12, %v1701_v29 }
 0x286   : > { %v1714_v13 = vmul.f32 %v4656_v21, %v1713_v23  ;;  %v1363_v43 = vpop.xlane.xlu1 %1362  ;;  %v2299_v22 = vadd.f32 %v2223_v35, %v2147_v32  ;;  %v2148_v16 = vsub.f32 %v4232_v42, %v2067_v38  ;;  %v2374_v59 = vmax.f32 %v2298_v5, 0.0 }
 0x287   : > { %5658 = vst [vmem:[#allocation23_spill] sm:$0xff] %v4672_v14  ;;  %v1445_v45 = vmul.f32 0.00390625, %v1363_v43  ;;  %v1483_v0 = vmul.f32 %v4674_v53, %v4674_v53  ;;  %v1178_v15 = vadd.f32 %v4672_v14, %v5645_v39  ;;  %v1301_v30 = vmul.f32 %v4672_v14, %v4672_v14  ;;  %v5660_v39 = vld [vmem:[#allocation39_spill] sm:$0xff] }
 0x288   : > { %v1715_v34 = vmul.f32 0.5, %v1714_v13  ;;  %v1711_v23 = vsel %vm1710_vm6, %v4616_v28, %v1707_v50  ;;  %v2375_v43 = vmax.f32 %v2299_v22, 0.0  ;;  %v2224_v48 = vmul.f32 %v1990_v40, %v5660_v39 }
 0x289   : > { %v1521_v33 = vsub.f32 %v1445_v45, %v1483_v0  ;;  %1179 = vadd.xlane.f32.xlu0 %v1178_v15  ;;  %v1406_v6 = vadd.f32 %v1301_v30, %v4544_v62  ;;  %v2068_v13 = vmul.f32 %v1991_v52, %v4514_v3  ;;  %v1992_v5 = vmul.f32 %v4199_v1, %v1711_v23  ;;  %v5661_v62 = vld [vmem:[#allocation28_spill] sm:$0xff] }
 0x28a   : > { %v1716_v55 = vsub.f32 1.5, %v1715_v34  ;;  %v936_v46 = vpop.f32.mrf.mxu2  ;;  %v4704_v28 = vmul.f32 %v5661_v62, %v5661_v62  ;;  %vm1718_vm7 = vweird.f32 %v4618_v20  ;;  %vm1719_vm8 = vweird.f32 %v4656_v21  ;;  %2512 = vmatmul.f32.gmra.mxu0 %v2374_v59  ;;  %v5663_v34 = vld [vmem:[#allocation40_spill] sm:$0xff] }
 0x28b   : > { %v1067_v14 = vpop.f32.mrf.mxu3  ;;  %v4696_v32 = vpop.eup %3114  ;;  %v4698_v35 = vadd.f32 1e-05, %v1521_v33  ;;  %v937_v29 = vadd.f32 %v936_v46, %v3881_v24  ;;  %1407 = vadd.xlane.f32.xlu1 %v1406_v6  ;;  %v2300_v40 = vadd.f32 %v2224_v48, %v2148_v16  ;;  %v2149_v30 = vsub.f32 %v4236_v63, %v2068_v13  ;;  %vm1720_vm9 = vmor %vm1718_vm7, %vm1719_vm8 }
 0x28c   : > { %v1723_v3 = vmul.f32 %v4696_v32, %v4658_v58  ;;  %2643 = vmatmul.f32.gmra.mxu1 %v2375_v43  ;;  %v1138_v39 = vpop.xlane.xlu2 %1137  ;;  %v1717_v50 = vmul.f32 %v4656_v21, %v1716_v55  ;;  %v2225_v22 = vmul.f32 %v1991_v52, %v5663_v34  ;;  %v2069_v33 = vmul.f32 %v1992_v5, %v4554_v10 }
 0x28d   : > { %3116 = vrsqrt.f32 %v4698_v35  ;;  %v4712_v38 = vadd.f32 %v1067_v14, %v937_v29  ;;  %v4714_v45 = vmul.f32 0.00390625, %v1138_v39  ;;  %v1993_v46 = vmul.f32 %v4201_v12, %v1711_v23 }
 0x28e   : > { %v1724_v0 = vmul.f32 %v4696_v32, %v1723_v3  ;;  %v1366_v15 = vpop.xlane.xlu0 %1365  ;;  %v2301_v43 = vadd.f32 %v2225_v22, %v2149_v30  ;;  %v2150_v52 = vsub.f32 %v4232_v42, %v2069_v33  ;;  %v2376_v13 = vmax.f32 %v2300_v40, 0.0 }
 0x28f   : > { %5662 = vst [vmem:[#allocation56_spill] sm:$0xff] %v4712_v38  ;;  %v1484_v16 = vmul.f32 %v4714_v45, %v4714_v45  ;;  %v1446_v59 = vmul.f32 0.00390625, %v1366_v15  ;;  %v1181_v6 = vadd.f32 %v4712_v38, %v5650_v18  ;;  %v1303_v14 = vmul.f32 %v4712_v38, %v4712_v38  ;;  %v5664_v18 = vld [vmem:[#allocation41_spill] sm:$0xff] }
 0x290   : > { %v1725_v55 = vmul.f32 0.5, %v1724_v0  ;;  %v1721_v3 = vsel %vm1720_vm9, %v4656_v21, %v1717_v50  ;;  %v2377_v15 = vmax.f32 %v2301_v43, 0.0  ;;  %v2226_v20 = vmul.f32 %v1992_v5, %v5664_v18  ;;  %v5665_v5 = vld [vmem:[#allocation42_spill] sm:$0xff]  ;;  %v5667_v43 = vld [vmem:[#allocation43_spill] sm:$0xff] }
 0x291   : > { %v1522_v48 = vsub.f32 %v1446_v59, %v1484_v16  ;;  %1182 = vadd.xlane.f32.xlu2 %v1181_v6  ;;  %v1409_v29 = vadd.f32 %v1303_v14, %v4584_v57  ;;  %v2070_v0 = vmul.f32 %v1993_v46, %v4554_v10  ;;  %vm1728_vm10 = vweird.f32 %v4658_v58 }
 0x292   : > { %v1726_v39 = vsub.f32 1.5, %v1725_v55  ;;  %v939_v34 = vpop.f32.mrf.mxu2  ;;  %v1994_v57 = vmul.f32 %v4199_v1, %v1721_v3  ;;  %vm1729_vm11 = vweird.f32 %v4696_v32  ;;  %2515 = vmatmul.f32.gmra.mxu0 %v2376_v13  ;;  %v2302_v10 = vadd.f32 %v2226_v20, %v2150_v52 }
 0x293   : > { %v1070_v38 = vpop.f32.mrf.mxu3  ;;  %v4736_v30 = vpop.eup %3116  ;;  %v4739_v23 = vadd.f32 1e-05, %v1522_v48  ;;  %v940_v40 = vadd.f32 %v939_v34, %v3881_v24  ;;  %1410 = vadd.xlane.f32.xlu0 %v1409_v29  ;;  %v2227_v50 = vmul.f32 %v1993_v46, %v5665_v5  ;;  %v2151_v14 = vsub.f32 %v4236_v63, %v2070_v0  ;;  %vm1730_vm12 = vmor %vm1728_vm10, %vm1729_vm11 }
 0x294   : > { %v1733_v21 = vmul.f32 %v4736_v30, %v4698_v35  ;;  %2646 = vmatmul.f32.gmra.mxu1 %v2377_v15  ;;  %v1141_v18 = vpop.xlane.xlu1 %1140  ;;  %v1727_v22 = vmul.f32 %v4696_v32, %v1726_v39  ;;  %v2071_v55 = vmul.f32 %v1994_v57, %v4594_v60  ;;  %v2228_v48 = vmul.f32 %v1994_v57, %v5667_v43 }
 0x295   : > { %3118 = vrsqrt.f32 %v4739_v23  ;;  %v4749_v33 = vadd.f32 %v1070_v38, %v940_v40  ;;  %v4751_v16 = vmul.f32 0.00390625, %v1141_v18  ;;  %v2303_v39 = vadd.f32 %v2227_v50, %v2151_v14  ;;  %v5668_v14 = vld [vmem:[#allocation29_spill] sm:$0xff] }
 0x296   : > { %v1734_v59 = vmul.f32 %v4736_v30, %v1733_v21  ;;  %v1369_v6 = vpop.xlane.xlu2 %1368  ;;  %v2152_v15 = vsub.f32 %v4232_v42, %v2071_v55  ;;  %v1995_v34 = vmul.f32 %v4201_v12, %v1721_v3  ;;  %v2378_v0 = vmax.f32 %v2302_v10, 0.0 }
 0x297   : > { %5666 = vst [vmem:[#allocation33_spill] sm:$0xff] %v4749_v33  ;;  %v1447_v52 = vmul.f32 0.00390625, %v1369_v6  ;;  %v1485_v46 = vmul.f32 %v4751_v16, %v4751_v16  ;;  %v1184_v13 = vadd.f32 %v4749_v33, %v5653_v54  ;;  %v1305_v38 = vmul.f32 %v4749_v33, %v4749_v33  ;;  %v5672_v33 = vld [vmem:[#allocation46_spill] sm:$0xff] }
 0x298   : > { %v1735_v29 = vmul.f32 0.5, %v1734_v59  ;;  %v1731_v57 = vsel %vm1730_vm12, %v4696_v32, %v1727_v22  ;;  %v2379_v18 = vmax.f32 %v2303_v39, 0.0  ;;  %v2304_v43 = vadd.f32 %v2228_v48, %v2152_v15  ;;  %v5669_v22 = vld [vmem:[#allocation44_spill] sm:$0xff] }
 0x299   : > { %v1523_v20 = vsub.f32 %v1447_v52, %v1485_v46  ;;  %1185 = vadd.xlane.f32.xlu1 %v1184_v13  ;;  %v1412_v40 = vadd.f32 %v1305_v38, %v4624_v47  ;;  %v2072_v58 = vmul.f32 %v1995_v34, %v4594_v60  ;;  %v1996_v10 = vmul.f32 %v4199_v1, %v1731_v57 }
 0x29a   : > { %v1736_v21 = vsub.f32 1.5, %v1735_v29  ;;  %v942_v5 = vpop.f32.mrf.mxu2  ;;  %v4780_v47 = vmul.f32 %v5668_v14, %v5668_v14  ;;  %vm1738_vm13 = vweird.f32 %v4698_v35  ;;  %vm1739_vm14 = vweird.f32 %v4736_v30  ;;  %2518 = vmatmul.f32.gmra.mxu0 %v2378_v0 }
 0x29b   : > { %v1073_v6 = vpop.f32.mrf.mxu3  ;;  %v4772_v59 = vpop.eup %3118  ;;  %v4774_v50 = vadd.f32 1e-05, %v1523_v20  ;;  %v943_v3 = vadd.f32 %v942_v5, %v3881_v24  ;;  %1413 = vadd.xlane.f32.xlu2 %v1412_v40  ;;  %v2229_v55 = vmul.f32 %v1995_v34, %v5669_v22  ;;  %vm1748_vm15 = vweird.f32 %v4739_v23  ;;  %vm1740_vm0 = vmor %vm1738_vm13, %vm1739_vm14 }
 0x29c   : > { %v1743_v60 = vmul.f32 %v4772_v59, %v4739_v23  ;;  %2649 = vmatmul.f32.gmra.mxu1 %v2379_v18  ;;  %v1144_v32 = vpop.xlane.xlu0 %1143  ;;  %v1737_v48 = vmul.f32 %v4736_v30, %v1736_v21  ;;  %v2380_v38 = vmax.f32 %v2304_v43, 0.0  ;;  %v2153_v29 = vsub.f32 %v4236_v63, %v2072_v58  ;;  %v5671_v58 = vld [vmem:[#allocation45_spill] sm:$0xff] }
 0x29d   : > { %3120 = vrsqrt.f32 %v4774_v50  ;;  %v4790_v52 = vadd.f32 %v1073_v6, %v943_v3  ;;  %v4792_v46 = vmul.f32 0.00390625, %v1144_v32  ;;  %v2073_v39 = vmul.f32 %v1996_v10, %v4634_v17 }
 0x29e   : > { %v1744_v13 = vmul.f32 %v4772_v59, %v1743_v60  ;;  %v1997_v40 = vmul.f32 %v4201_v12, %v1731_v57  ;;  %v2305_v5 = vadd.f32 %v2229_v55, %v2153_v29  ;;  %v2230_v3 = vmul.f32 %v1996_v10, %v5671_v58 }
 0x29f   : > { %5670 = vst [vmem:[#allocation34_spill] sm:$0xff] %v4790_v52  ;;  %v1372_v15 = vpop.xlane.xlu1 %1371  ;;  %v1486_v34 = vmul.f32 %v4792_v46, %v4792_v46  ;;  %v1187_v20 = vadd.f32 %v4790_v52, %v5657_v11  ;;  %v1307_v0 = vmul.f32 %v4790_v52, %v4790_v52  ;;  %v2154_v6 = vsub.f32 %v4232_v42, %v2073_v39 }
 0x2a0   : > { %v1745_v21 = vmul.f32 0.5, %v1744_v13  ;;  %v1448_v18 = vmul.f32 0.00390625, %v1372_v15  ;;  %v2074_v60 = vmul.f32 %v1997_v40, %v4634_v17  ;;  %v1741_v32 = vsel %vm1740_vm0, %v4736_v30, %v1737_v48 }
 0x2a1   : > { %1188 = vadd.xlane.f32.xlu0 %v1187_v20  ;;  %v1415_v43 = vadd.f32 %v1307_v0, %v4664_v44  ;;  %v2381_v52 = vmax.f32 %v2305_v5, 0.0  ;;  %v2231_v13 = vmul.f32 %v1997_v40, %v5672_v33  ;;  %v2306_v29 = vadd.f32 %v2230_v3, %v2154_v6 }
 0x2a2   : > { %v1746_v57 = vsub.f32 1.5, %v1745_v21  ;;  %v1524_v22 = vsub.f32 %v1448_v18, %v1486_v34  ;;  %v945_v11 = vpop.f32.mrf.mxu2  ;;  %v2155_v44 = vsub.f32 %v4236_v63, %v2074_v60  ;;  %v1998_v10 = vmul.f32 %v4199_v1, %v1741_v32  ;;  %2521 = vmatmul.f32.gmra.mxu0 %v2380_v38  ;;  %v5673_v18 = vld [vmem:[#allocation30_spill] sm:$0xff] }
 0x2a3   : > { %v1076_v35 = vpop.f32.mrf.mxu3  ;;  %v4814_v15 = vpop.eup %3120  ;;  %v946_v55 = vadd.f32 %v945_v11, %v3881_v24  ;;  %1416 = vadd.xlane.f32.xlu1 %v1415_v43  ;;  %vm1749_vm1 = vweird.f32 %v4772_v59  ;;  %v1999_v48 = vmul.f32 %v4201_v12, %v1741_v32  ;;  %v2382_v6 = vmax.f32 %v2306_v29, 0.0  ;;  %v5674_v32 = vld [vmem:[#allocation47_spill] sm:$0xff] }
 0x2a4   : > { %v1753_v17 = vmul.f32 %v4814_v15, %v4774_v50  ;;  %v4822_v30 = vadd.f32 1e-05, %v1524_v22  ;;  %2652 = vmatmul.f32.gmra.mxu1 %v2381_v52  ;;  %v1147_v33 = vpop.xlane.xlu2 %1146  ;;  %v1747_v11 = vmul.f32 %v4772_v59, %v1746_v57  ;;  %v2307_v20 = vadd.f32 %v2231_v13, %v2155_v44  ;;  %vm1750_vm2 = vmor %vm1748_vm15, %vm1749_vm1 }
 0x2a5   : > { %v4826_v39 = vadd.f32 %v1076_v35, %v946_v55  ;;  %v4828_v34 = vmul.f32 0.00390625, %v1147_v33  ;;  %v2075_v21 = vmul.f32 %v1998_v10, %v4674_v53  ;;  %v4835_v52 = vmul.f32 %v5673_v18, %v5673_v18 }
 0x2a6   : > { %v1754_v0 = vmul.f32 %v4814_v15, %v1753_v17  ;;  %3122 = vrsqrt.f32 %v4822_v30  ;;  %v1375_v40 = vpop.xlane.xlu0 %1374  ;;  %v2232_v57 = vmul.f32 %v1998_v10, %v5674_v32  ;;  %v2383_v35 = vmax.f32 %v2307_v20, 0.0 }
 0x2a7   : > { %v1487_v38 = vmul.f32 %v4828_v34, %v4828_v34  ;;  %v1449_v5 = vmul.f32 0.00390625, %v1375_v40  ;;  %v1190_v43 = vadd.f32 %v4826_v39, %v5661_v62  ;;  %v1309_v3 = vmul.f32 %v4826_v39, %v4826_v39 }
 0x2a8   : > { %v1755_v58 = vmul.f32 0.5, %v1754_v0  ;;  %v2156_v60 = vsub.f32 %v4232_v42, %v2075_v21  ;;  %v2076_v13 = vmul.f32 %v1999_v48, %v4674_v53  ;;  %v1751_v55 = vsel %vm1750_vm2, %v4772_v59, %v1747_v11 }
 0x2a9   : > { %v1525_v22 = vsub.f32 %v1449_v5, %v1487_v38  ;;  %1191 = vadd.xlane.f32.xlu2 %v1190_v43  ;;  %v1418_v23 = vadd.f32 %v1309_v3, %v4704_v28  ;;  %v2000_v0 = vmul.f32 %v4199_v1, %v1751_v55  ;;  %v2001_v20 = vmul.f32 %v4201_v12, %v1751_v55  ;;  %v5675_v28 = vld [vmem:[#allocation48_spill] sm:$0xff]  ;;  %v5676_v5 = vld [vmem:[#allocation31_spill] sm:$0xff] }
 0x2aa   : > { %v1756_v29 = vsub.f32 1.5, %v1755_v58  ;;  %v948_v44 = vpop.f32.mrf.mxu2  ;;  %v2308_v33 = vadd.f32 %v2232_v57, %v2156_v60  ;;  %v2157_v10 = vsub.f32 %v4236_v63, %v2076_v13  ;;  %vm1758_vm3 = vweird.f32 %v4774_v50  ;;  %2524 = vmatmul.f32.gmra.mxu0 %v2382_v6 }
 0x2ab   : > { %v1079_v17 = vpop.f32.mrf.mxu3  ;;  %v4853_v40 = vadd.f32 1e-05, %v1525_v22  ;;  %v949_v21 = vadd.f32 %v948_v44, %v3881_v24  ;;  %v2233_v59 = vmul.f32 %v1999_v48, %v5675_v28  ;;  %v2077_v11 = vmul.f32 %v2000_v0, %v4714_v45  ;;  %1419 = vadd.xlane.f32.xlu0 %v1418_v23 }
 0x2ac   : > { %v4858_v38 = vpop.eup %3122  ;;  %2655 = vmatmul.f32.gmra.mxu1 %v2383_v35  ;;  %v1150_v53 = vpop.xlane.xlu1 %1149  ;;  %v4865_v43 = vmul.f32 %v5676_v5, %v5676_v5  ;;  %v1757_v58 = vmul.f32 %v4814_v15, %v1756_v29  ;;  %vm1759_vm4 = vweird.f32 %v4814_v15  ;;  %vm1768_vm5 = vweird.f32 %v4822_v30 }
 0x2ad   : > { %v1763_v3 = vmul.f32 %v4858_v38, %v4822_v30  ;;  %3124 = vrsqrt.f32 %v4853_v40  ;;  %v4873_v6 = vadd.f32 %v1079_v17, %v949_v21  ;;  %v4875_v48 = vmul.f32 0.00390625, %v1150_v53  ;;  %vm1760_vm6 = vmor %vm1758_vm3, %vm1759_vm4  ;;  %v5678_v21 = vld [vmem:[#allocation49_spill] sm:$0xff] }
 0x2ae   : > { %v1378_v60 = vpop.xlane.xlu2 %1377  ;;  %v2309_v32 = vadd.f32 %v2233_v59, %v2157_v10  ;;  %v2384_v35 = vmax.f32 %v2308_v33, 0.0  ;;  %v2078_v13 = vmul.f32 %v2001_v20, %v4714_v45  ;;  %v2158_v23 = vsub.f32 %v4232_v42, %v2077_v11 }
 0x2af   : > { %5677 = vst [vmem:[#allocation35_spill] sm:$0xff] %v4873_v6  ;;  %v1764_v57 = vmul.f32 %v4858_v38, %v1763_v3  ;;  %v1450_v22 = vmul.f32 0.00390625, %v1378_v60  ;;  %v1488_v55 = vmul.f32 %v4875_v48, %v4875_v48  ;;  %v1193_v29 = vadd.f32 %v4873_v6, %v5668_v14  ;;  %v4895_v60 = vld [vmem:[%s5532_s7] ss:$0 sm:$0xff] }
 0x2b0   : > { %v1311_v44 = vmul.f32 %v4873_v6, %v4873_v6  ;;  %v2234_v10 = vmul.f32 %v2000_v0, %v5678_v21  ;;  %v2159_v33 = vsub.f32 %v4236_v63, %v2078_v13  ;;  %v1761_v45 = vsel %vm1760_vm6, %v4814_v15, %v1757_v58  ;;  %v5679_v58 = vld [vmem:[#allocation50_spill] sm:$0xff] }
 0x2b1   : > { %v1765_v17 = vmul.f32 0.5, %v1764_v57  ;;  %v1526_v50 = vsub.f32 %v1450_v22, %v1488_v55  ;;  %v2385_v53 = vmax.f32 %v2309_v32, 0.0  ;;  %1194 = vadd.xlane.f32.xlu1 %v1193_v29  ;;  %v2002_v11 = vmul.f32 %v4199_v1, %v1761_v45 }
 0x2b2   : > { %v951_v28 = vpop.f32.mrf.mxu2  ;;  %v1421_v59 = vadd.f32 %v1311_v44, %v4780_v47  ;;  %vm1769_vm7 = vweird.f32 %v4858_v38  ;;  %v2235_v32 = vmul.f32 %v2001_v20, %v5679_v58  ;;  %2527 = vmatmul.f32.gmra.mxu0 %v2384_v35  ;;  %v2310_v55 = vadd.f32 %v2234_v10, %v2158_v23 }
 0x2b3   : > { %v1082_v3 = vpop.f32.mrf.mxu3  ;;  %v4898_v57 = vpop.eup %3124  ;;  %v1766_v0 = vsub.f32 1.5, %v1765_v17  ;;  %v952_v15 = vadd.f32 %v951_v28, %v3881_v24  ;;  %v4905_v22 = vadd.f32 1e-05, %v1526_v50  ;;  %v2079_v29 = vmul.f32 %v2002_v11, %v4751_v16  ;;  %vm1770_vm8 = vmor %vm1768_vm5, %vm1769_vm7 }
 0x2b4   : > { %v1773_v47 = vmul.f32 %v4898_v57, %v4853_v40  ;;  %2658 = vmatmul.f32.gmra.mxu1 %v2385_v53  ;;  %v1153_v13 = vpop.xlane.xlu0 %1152  ;;  %1422 = vadd.xlane.f32.xlu2 %v1421_v59  ;;  %v2311_v28 = vadd.f32 %v2235_v32, %v2159_v33  ;;  %v2003_v20 = vmul.f32 %v4201_v12, %v1761_v45  ;;  %vm1779_vm9 = vweird.f32 %v4898_v57 }
 0x2b5   : > { %v4908_v44 = vadd.f32 %v1082_v3, %v952_v15  ;;  %v2483_v17 = vpop.f32.mrf.mxu0  ;;  %v4910_v21 = vmul.f32 0.00390625, %v1153_v13  ;;  %v1767_v58 = vmul.f32 %v4858_v38, %v1766_v0  ;;  %3126 = vrsqrt.f32 %v4905_v22 }
 0x2b6   : > { %v1774_v50 = vmul.f32 %v4898_v57, %v1773_v47  ;;  %v2484_v35 = vadd.f32 %v4895_v60, %v2483_v17  ;;  %v1381_v23 = vpop.xlane.xlu1 %1380  ;;  %v2386_v15 = vmax.f32 %v2310_v55, 0.0  ;;  %v2160_v32 = vsub.f32 %v4232_v42, %v2079_v29  ;;  %v5681_v55 = vld [vmem:[#allocation51_spill] sm:$0xff] }
 0x2b7   : > { %5680 = vst [vmem:[#allocation26_spill] sm:$0xff] %v4908_v44  ;;  %v2614_v10 = vpop.f32.mrf.mxu1  ;;  %v1451_v53 = vmul.f32 0.00390625, %v1381_v23  ;;  %v1489_v59 = vmul.f32 %v4910_v21, %v4910_v21  ;;  %v1196_v33 = vadd.f32 %v4908_v44, %v5673_v18  ;;  %v1313_v45 = vmul.f32 %v4908_v44, %v4908_v44  ;;  %v3176_v44 = vld [vmem:[%s3642_s14] sm:$0xff] }
 0x2b8   : > { %v1775_v3 = vmul.f32 0.5, %v1774_v50  ;;  %v2615_v0 = vadd.f32 %v2614_v10, %v2484_v35  ;;  %v2387_v13 = vmax.f32 %v2311_v28, 0.0  ;;  %v2080_v23 = vmul.f32 %v2003_v20, %v4751_v16 }
 0x2b9   : > { %v1527_v47 = vsub.f32 %v1451_v53, %v1489_v59  ;;  %1197 = vadd.xlane.f32.xlu0 %v1196_v33  ;;  %v1424_v17 = vadd.f32 %v1313_v45, %v4835_v52  ;;  %v2236_v10 = vmul.f32 %v2002_v11, %v5681_v55  ;;  %v1771_v29 = vsel %vm1770_vm8, %v4858_v38, %v1767_v58  ;;  %v5682_v11 = vld [vmem:[#allocation52_spill] sm:$0xff] }
 0x2ba   : > { %v1776_v18 = vsub.f32 1.5, %v1775_v3  ;;  %v2728_v50 = vadd.f32 %v3176_v44, %v2615_v0  ;;  %v954_v35 = vpop.f32.mrf.mxu2  ;;  %v2161_v53 = vsub.f32 %v4236_v63, %v2080_v23  ;;  %v2004_v52 = vmul.f32 %v4199_v1, %v1771_v29  ;;  %2530 = vmatmul.f32.gmra.mxu0 %v2386_v15 }
 0x2bb   : > { %v4933_v6 = vadd.f32 1e-05, %v1527_v47  ;;  %v955_v30 = vadd.f32 %v954_v35, %v3881_v24  ;;  %1425 = vadd.xlane.f32.xlu1 %v1424_v17  ;;  %v1085_v28 = vpop.f32.mrf.mxu3  ;;  %v4938_v59 = vpop.eup %3126  ;;  %v2312_v38 = vadd.f32 %v2236_v10, %v2160_v32  ;;  %v2237_v44 = vmul.f32 %v2003_v20, %v5682_v11 }
 0x2bc   : > { %2766 = vst [vmem:[%s4941_s6] sm:$0xff] %v2728_v50  ;;  %2661 = vmatmul.f32.gmra.mxu1 %v2387_v13  ;;  %v1156_v16 = vpop.xlane.xlu2 %1155  ;;  %v2005_v24 = vmul.f32 %v4201_v12, %v1771_v29  ;;  %v1777_v58 = vmul.f32 %v4898_v57, %v1776_v18  ;;  %v1783_v33 = vmul.f32 %v4938_v59, %v4905_v22  ;;  %vm1778_vm10 = vweird.f32 %v4853_v40 }
 0x2bd   : > { %3128 = vrsqrt.f32 %v4933_v6  ;;  %v4951_v45 = vadd.f32 %v1085_v28, %v955_v30  ;;  %v4953_v3 = vmul.f32 0.00390625, %v1156_v16  ;;  %v2313_v15 = vadd.f32 %v2237_v44, %v2161_v53  ;;  %vm1780_vm11 = vmor %vm1778_vm10, %vm1779_vm9  ;;  %v5683_v44 = vld [vmem:[#allocation53_spill] sm:$0xff] }
 0x2be   : > { %v1384_v0 = vpop.xlane.xlu0 %1383  ;;  %v2081_v32 = vmul.f32 %v2004_v52, %v4792_v46  ;;  %v1784_v20 = vmul.f32 %v4938_v59, %v1783_v33  ;;  %v2082_v47 = vmul.f32 %v2005_v24, %v4792_v46  ;;  %v2388_v17 = vmax.f32 %v2312_v38, 0.0 }
 0x2bf   : > { %v1452_v18 = vmul.f32 0.00390625, %v1384_v0  ;;  %v1490_v13 = vmul.f32 %v4953_v3, %v4953_v3  ;;  %v1199_v23 = vadd.f32 %v4951_v45, %v5676_v5  ;;  %v1315_v50 = vmul.f32 %v4951_v45, %v4951_v45  ;;  %v2486_v40 = vpop.f32.mrf.mxu0 }
 0x2c0   : > { %v1785_v35 = vmul.f32 0.5, %v1784_v20  ;;  %v2389_v10 = vmax.f32 %v2313_v15, 0.0  ;;  %v2162_v29 = vsub.f32 %v4232_v42, %v2081_v32  ;;  %v2163_v46 = vsub.f32 %v4236_v63, %v2082_v47 }
 0x2c1   : > { %v2617_v55 = vpop.f32.mrf.mxu1  ;;  %v2487_v30 = vadd.f32 %v4895_v60, %v2486_v40  ;;  %v1528_v28 = vsub.f32 %v1452_v18, %v1490_v13  ;;  %1200 = vadd.xlane.f32.xlu2 %v1199_v23  ;;  %v1427_v53 = vadd.f32 %v1315_v50, %v4865_v43  ;;  %v1781_v16 = vsel %vm1780_vm11, %v4898_v57, %v1777_v58  ;;  %v5684_v57 = vld [vmem:[#allocation54_spill] sm:$0xff] }
 0x2c2   : > { %v1786_v11 = vsub.f32 1.5, %v1785_v35  ;;  %vm1789_vm12 = vweird.f32 %v4938_v59  ;;  %v2238_v33 = vmul.f32 %v2004_v52, %v5683_v44  ;;  %v2006_v0 = vmul.f32 %v4199_v1, %v1781_v16  ;;  %2533 = vmatmul.f32.gmra.mxu0 %v2388_v17  ;;  %v3177_v23 = vld [vmem:[%s3642_s14 + $0x8] sm:$0xff] }
 0x2c3   : > { %v4972_v38 = vpop.eup %3128  ;;  %v2618_v32 = vadd.f32 %v2617_v55, %v2487_v30  ;;  %v4979_v20 = vadd.f32 1e-05, %v1528_v28  ;;  %v2239_v58 = vmul.f32 %v2005_v24, %v5684_v57  ;;  %vm1788_vm13 = vweird.f32 %v4905_v22  ;;  %1428 = vadd.xlane.f32.xlu0 %v1427_v53 }
 0x2c4   : > { %v1793_v15 = vmul.f32 %v4972_v38, %v4933_v6  ;;  %2664 = vmatmul.f32.gmra.mxu1 %v2389_v10  ;;  %v1159_v43 = vpop.xlane.xlu1 %1158  ;;  %v1787_v18 = vmul.f32 %v4938_v59, %v1786_v11  ;;  %v2314_v47 = vadd.f32 %v2238_v33, %v2162_v29  ;;  %vm1790_vm14 = vmor %vm1788_vm13, %vm1789_vm12  ;;  %v2083_v22 = vmul.f32 %v2006_v0, %v4828_v34 }
 0x2c5   : > { %v4984_v52 = vmul.f32 0.00390625, %v1159_v43  ;;  %v2729_v50 = vadd.f32 %v3177_v23, %v2618_v32  ;;  %3130 = vrsqrt.f32 %v4979_v20  ;;  %v2315_v35 = vadd.f32 %v2239_v58, %v2163_v46  ;;  %v5685_v58 = vld [vmem:[#allocation21_spill] sm:$0xff] }
 0x2c6   : > { %v1794_v13 = vmul.f32 %v4972_v38, %v1793_v15  ;;  %v1387_v17 = vpop.xlane.xlu2 %1386  ;;  %v2007_v10 = vmul.f32 %v4201_v12, %v1781_v16  ;;  %v1791_v29 = vsel %vm1790_vm14, %v4938_v59, %v1787_v18  ;;  %v2390_v11 = vmax.f32 %v2314_v47, 0.0 }
 0x2c7   : > { %v1453_v24 = vmul.f32 0.00390625, %v1387_v17  ;;  %v1491_v40 = vmul.f32 %v4984_v52, %v4984_v52  ;;  %2767 = vst [vmem:[%s4941_s6 + $0x8] sm:$0xff] %v2729_v50  ;;  %v2489_v30 = vpop.f32.mrf.mxu0  ;;  %v2164_v46 = vsub.f32 %v4232_v42, %v2083_v22  ;;  %v2008_v44 = vmul.f32 %v4199_v1, %v1791_v29 }
 0x2c8   : > { %v1795_v55 = vmul.f32 0.5, %v1794_v13  ;;  %v2490_v15 = vadd.f32 %v4895_v60, %v2489_v30  ;;  %v2391_v32 = vmax.f32 %v2315_v35, 0.0  ;;  %v2084_v43 = vmul.f32 %v2007_v10, %v4828_v34  ;;  %v5686_v13 = vld [vmem:[#allocation55_spill] sm:$0xff] }
 0x2c9   : > { %v2620_v28 = vpop.f32.mrf.mxu1  ;;  %v1529_v53 = vsub.f32 %v1453_v24, %v1491_v40  ;;  %v2240_v16 = vmul.f32 %v2006_v0, %v5685_v58  ;;  %v2241_v59 = vmul.f32 %v2007_v10, %v5686_v13  ;;  %v2009_v18 = vmul.f32 %v4201_v12, %v1791_v29  ;;  %v3178_v40 = vld [vmem:[%s3642_s14 + $0x10] sm:$0xff] }
 0x2ca   : > { %v1796_v33 = vsub.f32 1.5, %v1795_v55  ;;  %vm1799_vm15 = vweird.f32 %v4972_v38  ;;  %v2621_v50 = vadd.f32 %v2620_v28, %v2490_v15  ;;  %2536 = vmatmul.f32.gmra.mxu0 %v2390_v11  ;;  %v2165_v34 = vsub.f32 %v4236_v63, %v2084_v43 }
 0x2cb   : > { %v5001_v57 = vadd.f32 1e-05, %v1529_v53  ;;  %v5006_v47 = vpop.eup %3130  ;;  %v2316_v35 = vadd.f32 %v2240_v16, %v2164_v46  ;;  %v2085_v24 = vmul.f32 %v2008_v44, %v4875_v48  ;;  %vm1798_vm0 = vweird.f32 %v4933_v6 }
 0x2cc   : > { %v1797_v23 = vmul.f32 %v4972_v38, %v1796_v33  ;;  %2667 = vmatmul.f32.gmra.mxu1 %v2391_v32  ;;  %v1162_v17 = vpop.xlane.xlu0 %1161  ;;  %v1803_v0 = vmul.f32 %v5006_v47, %v4979_v20  ;;  %v2730_v22 = vadd.f32 %v3178_v40, %v2621_v50  ;;  %v2317_v29 = vadd.f32 %v2241_v59, %v2165_v34  ;;  %vm1800_vm1 = vmor %vm1798_vm0, %vm1799_vm15 }
 0x2cd   : > { %3132 = vrsqrt.f32 %v5001_v57  ;;  %v5017_v55 = vmul.f32 0.00390625, %v1162_v17  ;;  %v2086_v53 = vmul.f32 %v2009_v18, %v4875_v48  ;;  %v2242_v6 = vmul.f32 %v2008_v44, %v3792_v7 }
 0x2ce   : > { %v1390_v10 = vpop.xlane.xlu1 %1389  ;;  %v1804_v30 = vmul.f32 %v5006_v47, %v1803_v0  ;;  %2768 = vst [vmem:[%s4941_s6 + $0x10] sm:$0xff] %v2730_v22  ;;  %v1801_v46 = vsel %vm1800_vm1, %v4972_v38, %v1797_v23  ;;  %v2392_v43 = vmax.f32 %v2316_v35, 0.0  ;;  %v2166_v58 = vsub.f32 %v4232_v42, %v2085_v24  ;;  %v5687_v24 = vld [vmem:[#allocation57_spill] sm:$0xff] }
 0x2cf   : > { %v1454_v28 = vmul.f32 0.00390625, %v1390_v10  ;;  %v1492_v11 = vmul.f32 %v5017_v55, %v5017_v55  ;;  %v2492_v15 = vpop.f32.mrf.mxu0  ;;  %v2010_v16 = vmul.f32 %v4199_v1, %v1801_v46  ;;  %v2393_v48 = vmax.f32 %v2317_v29, 0.0 }
 0x2d0   : > { %v1805_v33 = vmul.f32 0.5, %v1804_v30  ;;  %v2493_v13 = vadd.f32 %v4895_v60, %v2492_v15  ;;  %v2167_v50 = vsub.f32 %v4236_v63, %v2086_v53  ;;  %vm1809_vm2 = vweird.f32 %v5006_v47 }
 0x2d1   : > { %v2623_v32 = vpop.f32.mrf.mxu1  ;;  %v1530_v59 = vsub.f32 %v1454_v28, %v1492_v11  ;;  %v2087_v7 = vmul.f32 %v2010_v16, %v4910_v21  ;;  %v2011_v38 = vmul.f32 %v4201_v12, %v1801_v46  ;;  %v2243_v40 = vmul.f32 %v2009_v18, %v5687_v24  ;;  %v3179_v28 = vld [vmem:[%s3642_s14 + $0x18] sm:$0xff] }
 0x2d2   : > { %v1806_v34 = vsub.f32 1.5, %v1805_v33  ;;  %v2624_v23 = vadd.f32 %v2623_v32, %v2493_v13  ;;  %2539 = vmatmul.f32.gmra.mxu0 %v2392_v43  ;;  %vm1808_vm3 = vweird.f32 %v4979_v20  ;;  %v2318_v29 = vadd.f32 %v2242_v6, %v2166_v58 }
 0x2d3   : > { %v5032_v17 = vpop.eup %3132  ;;  %v5039_v0 = vadd.f32 1e-05, %v1530_v59  ;;  %v2319_v46 = vadd.f32 %v2243_v40, %v2167_v50  ;;  %vm1810_vm4 = vmor %vm1808_vm3, %vm1809_vm2  ;;  %v2168_v20 = vsub.f32 %v4232_v42, %v2087_v7  ;;  %v2088_v15 = vmul.f32 %v2011_v38, %v4910_v21 }
 0x2d4   : > { %v1813_v44 = vmul.f32 %v5032_v17, %v5001_v57  ;;  %2670 = vmatmul.f32.gmra.mxu1 %v2393_v48  ;;  %v1165_v35 = vpop.xlane.xlu2 %1164  ;;  %v1807_v22 = vmul.f32 %v5006_v47, %v1806_v34  ;;  %v2731_v53 = vadd.f32 %v3179_v28, %v2624_v23  ;;  %v2394_v59 = vmax.f32 %v2318_v29, 0.0  ;;  %v5688_v48 = vld [vmem:[#allocation22_spill] sm:$0xff] }
 0x2d5   : > { %v5044_v10 = vmul.f32 0.00390625, %v1165_v35  ;;  %3134 = vrsqrt.f32 %v5039_v0  ;;  %v2244_v50 = vmul.f32 %v2010_v16, %v5688_v48  ;;  %v2395_v35 = vmax.f32 %v2319_v46, 0.0 }
 0x2d6   : > { %v1814_v30 = vmul.f32 %v5032_v17, %v1813_v44  ;;  %v1393_v11 = vpop.xlane.xlu0 %1392  ;;  %2769 = vst [vmem:[%s4941_s6 + $0x18] sm:$0xff] %v2731_v53  ;;  %v1811_v32 = vsel %vm1810_vm4, %v5006_v47, %v1807_v22  ;;  %v2169_v7 = vsub.f32 %v4236_v63, %v2088_v15  ;;  %v2245_v47 = vmul.f32 %v2011_v38, %v4323_v9  ;;  %v3180_v9 = vld [vmem:[%s3642_s14 + $0x20] sm:$0xff] }
 0x2d7   : > { %v1493_v18 = vmul.f32 %v5044_v10, %v5044_v10  ;;  %v1455_v33 = vmul.f32 0.00390625, %v1393_v11  ;;  %v2495_v43 = vpop.f32.mrf.mxu0  ;;  %v2012_v34 = vmul.f32 %v4199_v1, %v1811_v32  ;;  %v2320_v24 = vadd.f32 %v2244_v50, %v2168_v20 }
 0x2d8   : > { %v1815_v6 = vmul.f32 0.5, %v1814_v30  ;;  %v2496_v23 = vadd.f32 %v4895_v60, %v2495_v43  ;;  %v2013_v40 = vmul.f32 %v4201_v12, %v1811_v32  ;;  %vm1819_vm5 = vweird.f32 %v5032_v17 }
 0x2d9   : > { %v2626_v58 = vpop.f32.mrf.mxu1  ;;  %v1531_v13 = vsub.f32 %v1455_v33, %v1493_v18  ;;  %v2089_v28 = vmul.f32 %v2012_v34, %v4953_v3  ;;  %vm1818_vm6 = vweird.f32 %v5001_v57  ;;  %v2321_v18 = vadd.f32 %v2245_v47, %v2169_v7 }
 0x2da   : > { %v1816_v44 = vsub.f32 1.5, %v1815_v6  ;;  %v2627_v29 = vadd.f32 %v2626_v58, %v2496_v23  ;;  %2542 = vmatmul.f32.gmra.mxu0 %v2394_v59  ;;  %vm1820_vm7 = vmor %vm1818_vm6, %vm1819_vm5  ;;  %v2090_v15 = vmul.f32 %v2013_v40, %v4953_v3  ;;  %v2396_v32 = vmax.f32 %v2320_v24, 0.0 }
 0x2db   : > { %v5061_v21 = vadd.f32 1e-05, %v1531_v13  ;;  %v5065_v22 = vpop.eup %3134  ;;  %v2170_v43 = vsub.f32 %v4232_v42, %v2089_v28  ;;  %v2246_v48 = vmul.f32 %v2012_v34, %v3802_v25  ;;  %vm1828_vm9 = vweird.f32 %v5039_v0 }
 0x2dc   : > { %v1817_v16 = vmul.f32 %v5032_v17, %v1816_v44  ;;  %2673 = vmatmul.f32.gmra.mxu1 %v2395_v35  ;;  %v1168_v30 = vpop.xlane.xlu1 %1167  ;;  %v1823_v53 = vmul.f32 %v5065_v22, %v5039_v0  ;;  %v2732_v38 = vadd.f32 %v3180_v9, %v2627_v29  ;;  %v2171_v50 = vsub.f32 %v4236_v63, %v2090_v15 }
 0x2dd   : > { %3136 = vrsqrt.f32 %v5061_v21  ;;  %v5075_v11 = vmul.f32 0.00390625, %v1168_v30  ;;  %vm1829_vm8 = vweird.f32 %v5065_v22  ;;  %v2397_v35 = vmax.f32 %v2321_v18, 0.0 }
 0x2de   : > { %v1396_v46 = vpop.xlane.xlu2 %1395  ;;  %v1824_v33 = vmul.f32 %v5065_v22, %v1823_v53  ;;  %2770 = vst [vmem:[%s4941_s6 + $0x20] sm:$0xff] %v2732_v38  ;;  %v1821_v57 = vsel %vm1820_vm7, %v5032_v17, %v1817_v16  ;;  %v2247_v17 = vmul.f32 %v2013_v40, %v4361_v19  ;;  %v2322_v28 = vadd.f32 %v2246_v48, %v2170_v43  ;;  %v3181_v38 = vld [vmem:[%s3642_s14 + $0x28] sm:$0xff]  ;;  %vm1830_vm10 = vmor %vm1828_vm9, %vm1829_vm8 }
 0x2df   : > { %v1456_v20 = vmul.f32 0.00390625, %v1396_v46  ;;  %v1494_v6 = vmul.f32 %v5075_v11, %v5075_v11  ;;  %v2498_v13 = vpop.f32.mrf.mxu0  ;;  %v2014_v44 = vmul.f32 %v4199_v1, %v1821_v57  ;;  %v2015_v25 = vmul.f32 %v4201_v12, %v1821_v57 }
 0x2e0   : > { %v1825_v58 = vmul.f32 0.5, %v1824_v33  ;;  %v2499_v3 = vadd.f32 %v4895_v60, %v2498_v13  ;;  %v2323_v19 = vadd.f32 %v2247_v17, %v2171_v50  ;;  %v2398_v0 = vmax.f32 %v2322_v28, 0.0 }
 0x2e1   : > { %v2629_v59 = vpop.f32.mrf.mxu1  ;;  %v1532_v23 = vsub.f32 %v1456_v20, %v1494_v6  ;;  %v2091_v47 = vmul.f32 %v2014_v44, %v4984_v52  ;;  %v2092_v6 = vmul.f32 %v2015_v25, %v4984_v52  ;;  %v2248_v48 = vmul.f32 %v2014_v44, %v3807_v31 }
 0x2e2   : > { %v1826_v24 = vsub.f32 1.5, %v1825_v58  ;;  %v2630_v16 = vadd.f32 %v2629_v59, %v2499_v3  ;;  %2545 = vmatmul.f32.gmra.mxu0 %v2396_v32  ;;  %v2399_v59 = vmax.f32 %v2323_v19, 0.0  ;;  %vm1838_vm12 = vweird.f32 %v5061_v21 }
 0x2e3   : > { %v5089_v7 = vpop.eup %3136  ;;  %v5096_v29 = vadd.f32 1e-05, %v1532_v23  ;;  %v2172_v15 = vsub.f32 %v4232_v42, %v2091_v47 }
 0x2e4   : > { %v1833_v34 = vmul.f32 %v5089_v7, %v5061_v21  ;;  %2676 = vmatmul.f32.gmra.mxu1 %v2397_v35  ;;  %v1171_v30 = vpop.xlane.xlu0 %1170  ;;  %v1827_v53 = vmul.f32 %v5065_v22, %v1826_v24  ;;  %v2733_v46 = vadd.f32 %v3181_v38, %v2630_v16  ;;  %v2173_v35 = vsub.f32 %v4236_v63, %v2092_v6 }
 0x2e5   : > { %v5099_v9 = vmul.f32 0.00390625, %v1171_v30  ;;  %3138 = vrsqrt.f32 %v5096_v29  ;;  %v2324_v17 = vadd.f32 %v2248_v48, %v2172_v15  ;;  %vm1839_vm11 = vweird.f32 %v5089_v7 }
 0x2e6   : > { %v1834_v40 = vmul.f32 %v5089_v7, %v1833_v34  ;;  %v1399_v18 = vpop.xlane.xlu1 %1398  ;;  %2771 = vst [vmem:[%s4941_s6 + $0x28] sm:$0xff] %v2733_v46  ;;  %v1831_v43 = vsel %vm1830_vm10, %v5065_v22, %v1827_v53  ;;  %v2249_v22 = vmul.f32 %v2015_v25, %v4399_v8  ;;  %v3182_v25 = vld [vmem:[%s3642_s14 + $0x30] sm:$0xff]  ;;  %vm1840_vm13 = vmor %vm1838_vm12, %vm1839_vm11  ;;  %vm1848_vm14 = vweird.f32 %v5096_v29 }
 0x2e7   : > { %v1457_v33 = vmul.f32 0.00390625, %v1399_v18  ;;  %v1495_v20 = vmul.f32 %v5099_v9, %v5099_v9  ;;  %v2501_v57 = vpop.f32.mrf.mxu0  ;;  %v2016_v50 = vmul.f32 %v4199_v1, %v1831_v43  ;;  %v2017_v52 = vmul.f32 %v4201_v12, %v1831_v43 }
 0x2e8   : > { %v1835_v32 = vmul.f32 0.5, %v1834_v40  ;;  %v2502_v23 = vadd.f32 %v4895_v60, %v2501_v57  ;;  %v2325_v40 = vadd.f32 %v2249_v22, %v2173_v35 }
 0x2e9   : > { %v2632_v58 = vpop.f32.mrf.mxu1  ;;  %v1533_v13 = vsub.f32 %v1457_v33, %v1495_v20  ;;  %v2093_v16 = vmul.f32 %v2016_v50, %v5017_v55  ;;  %v2094_v8 = vmul.f32 %v2017_v52, %v5017_v55  ;;  %v2400_v33 = vmax.f32 %v2324_v17, 0.0 }
 0x2ea   : > { %v1836_v3 = vsub.f32 1.5, %v1835_v32  ;;  %v2633_v31 = vadd.f32 %v2632_v58, %v2502_v23  ;;  %2548 = vmatmul.f32.gmra.mxu0 %v2398_v0  ;;  %v2250_v32 = vmul.f32 %v2016_v50, %v3812_v41  ;;  %v2251_v41 = vmul.f32 %v2017_v52, %v4436_v37  ;;  %v3183_v52 = vld [vmem:[%s3642_s14 + $0x38] sm:$0xff] }
 0x2eb   : > { %v5118_v24 = vadd.f32 1e-05, %v1533_v13  ;;  %v5121_v47 = vpop.eup %3138  ;;  %v2174_v55 = vsub.f32 %v4232_v42, %v2093_v16  ;;  %v2175_v0 = vsub.f32 %v4236_v63, %v2094_v8  ;;  %v2401_v13 = vmax.f32 %v2325_v40, 0.0 }
 0x2ec   : > { %v1837_v34 = vmul.f32 %v5089_v7, %v1836_v3  ;;  %2679 = vmatmul.f32.gmra.mxu1 %v2399_v59  ;;  %v1174_v44 = vpop.xlane.xlu2 %1173  ;;  %v1843_v30 = vmul.f32 %v5121_v47, %v5096_v29  ;;  %v2734_v28 = vadd.f32 %v3182_v25, %v2633_v31  ;;  %vm1849_vm15 = vweird.f32 %v5121_v47 }
 0x2ed   : > { %3140 = vrsqrt.f32 %v5118_v24  ;;  %v5132_v53 = vmul.f32 0.00390625, %v1174_v44  ;;  %v2326_v17 = vadd.f32 %v2250_v32, %v2174_v55  ;;  %v2327_v31 = vadd.f32 %v2251_v41, %v2175_v0  ;;  %vm1850_vm0 = vmor %vm1848_vm14, %vm1849_vm15 }
 0x2ee   : > { %v1402_v19 = vpop.xlane.xlu0 %1401  ;;  %v1844_v38 = vmul.f32 %v5121_v47, %v1843_v30  ;;  %2772 = vst [vmem:[%s4941_s6 + $0x30] sm:$0xff] %v2734_v28  ;;  %v1841_v21 = vsel %vm1840_vm13, %v5089_v7, %v1837_v34  ;;  %vm1858_vm2 = vweird.f32 %v5118_v24 }
 0x2ef   : > { %v1458_v46 = vmul.f32 0.00390625, %v1402_v19  ;;  %v1496_v18 = vmul.f32 %v5132_v53, %v5132_v53  ;;  %v2504_v15 = vpop.f32.mrf.mxu0  ;;  %v2018_v43 = vmul.f32 %v4199_v1, %v1841_v21  ;;  %v2019_v59 = vmul.f32 %v4201_v12, %v1841_v21 }
 0x2f0   : > { %v1845_v20 = vmul.f32 0.5, %v1844_v38  ;;  %v2505_v57 = vadd.f32 %v4895_v60, %v2504_v15  ;;  %v2402_v40 = vmax.f32 %v2326_v17, 0.0  ;;  %v2403_v55 = vmax.f32 %v2327_v31, 0.0 }
 0x2f1   : > { %v2635_v6 = vpop.f32.mrf.mxu1  ;;  %v1534_v58 = vsub.f32 %v1458_v46, %v1496_v18  ;;  %v2095_v44 = vmul.f32 %v2018_v43, %v5044_v10  ;;  %v2096_v8 = vmul.f32 %v2019_v59, %v5044_v10  ;;  %v2253_v0 = vmul.f32 %v2019_v59, %v4472_v51  ;;  %v3184_v51 = vld [vmem:[%s3642_s14 + $0x40] sm:$0xff] }
 0x2f2   : > { %v1846_v3 = vsub.f32 1.5, %v1845_v20  ;;  %v2636_v50 = vadd.f32 %v2635_v6, %v2505_v57  ;;  %2551 = vmatmul.f32.gmra.mxu0 %v2400_v33 }
 0x2f3   : > { %v5147_v48 = vpop.eup %3140  ;;  %v5154_v23 = vadd.f32 1e-05, %v1534_v58  ;;  %v2176_v10 = vsub.f32 %v4232_v42, %v2095_v44  ;;  %v2177_v15 = vsub.f32 %v4236_v63, %v2096_v8 }
 0x2f4   : > { %v1853_v7 = vmul.f32 %v5147_v48, %v5118_v24  ;;  %2682 = vmatmul.f32.gmra.mxu1 %v2401_v13  ;;  %v1177_v35 = vpop.xlane.xlu1 %1176  ;;  %v1847_v22 = vmul.f32 %v5121_v47, %v1846_v3  ;;  %v2735_v16 = vadd.f32 %v3183_v52, %v2636_v50  ;;  %vm1859_vm1 = vweird.f32 %v5147_v48 }
 0x2f5   : > { %v5157_v34 = vmul.f32 0.00390625, %v1177_v35  ;;  %3142 = vrsqrt.f32 %v5154_v23  ;;  %vm1860_vm3 = vmor %vm1858_vm2, %vm1859_vm1  ;;  %v2329_v35 = vadd.f32 %v2253_v0, %v2177_v15  ;;  %vm1868_vm5 = vweird.f32 %v5154_v23  ;;  %v3185_v0 = vld [vmem:[%s3642_s14 + $0x48] sm:$0xff] }
 0x2f6   : > { %v1854_v37 = vmul.f32 %v5147_v48, %v1853_v7  ;;  %v1405_v30 = vpop.xlane.xlu2 %1404  ;;  %2773 = vst [vmem:[%s4941_s6 + $0x38] sm:$0xff] %v2735_v16  ;;  %v1851_v38 = vsel %vm1850_vm0, %v5121_v47, %v1847_v22  ;;  %v2252_v47 = vmul.f32 %v2018_v43, %v3817_v56 }
 0x2f7   : > { %v1459_v25 = vmul.f32 0.00390625, %v1405_v30  ;;  %v1497_v28 = vmul.f32 %v5157_v34, %v5157_v34  ;;  %v2507_v46 = vpop.f32.mrf.mxu0  ;;  %v2020_v21 = vmul.f32 %v4199_v1, %v1851_v38  ;;  %v2021_v6 = vmul.f32 %v4201_v12, %v1851_v38 }
 0x2f8   : > { %v1855_v19 = vmul.f32 0.5, %v1854_v37  ;;  %v2508_v29 = vadd.f32 %v4895_v60, %v2507_v46  ;;  %v2328_v56 = vadd.f32 %v2252_v47, %v2176_v10 }
 0x2f9   : > { %v2638_v18 = vpop.f32.mrf.mxu1  ;;  %v1535_v33 = vsub.f32 %v1459_v25, %v1497_v28  ;;  %v2097_v41 = vmul.f32 %v2020_v21, %v5075_v11  ;;  %v2098_v17 = vmul.f32 %v2021_v6, %v5075_v11  ;;  %v2254_v28 = vmul.f32 %v2020_v21, %v3822_v4 }
 0x2fa   : > { %v1856_v20 = vsub.f32 1.5, %v1855_v19  ;;  %v2639_v13 = vadd.f32 %v2638_v18, %v2508_v29  ;;  %2554 = vmatmul.f32.gmra.mxu0 %v2402_v40  ;;  %v2404_v25 = vmax.f32 %v2328_v56, 0.0 }
 0x2fb   : > { %v5178_v32 = vadd.f32 1e-05, %v1535_v33  ;;  %v5182_v57 = vpop.eup %3142  ;;  %v2178_v37 = vsub.f32 %v4232_v42, %v2097_v41  ;;  %v2179_v38 = vsub.f32 %v4236_v63, %v2098_v17  ;;  %v2255_v33 = vmul.f32 %v2021_v6, %v4512_v2 }
 0x2fc   : > { %v1857_v58 = vmul.f32 %v5147_v48, %v1856_v20  ;;  %2685 = vmatmul.f32.gmra.mxu1 %v2403_v55  ;;  %v1180_v3 = vpop.xlane.xlu0 %1179  ;;  %v1863_v7 = vmul.f32 %v5182_v57, %v5154_v23  ;;  %v2736_v43 = vadd.f32 %v3184_v51, %v2639_v13  ;;  %vm1869_vm4 = vweird.f32 %v5182_v57 }
 0x2fd   : > { %3144 = vrsqrt.f32 %v5178_v32  ;;  %v5193_v59 = vmul.f32 0.00390625, %v1180_v3  ;;  %v2330_v29 = vadd.f32 %v2254_v28, %v2178_v37  ;;  %v2331_v3 = vadd.f32 %v2255_v33, %v2179_v38  ;;  %vm1870_vm6 = vmor %vm1868_vm5, %vm1869_vm4 }
 0x2fe   : > { %v1408_v50 = vpop.xlane.xlu1 %1407  ;;  %v1864_v22 = vmul.f32 %v5182_v57, %v1863_v7  ;;  %v1861_v31 = vsel %vm1860_vm3, %v5147_v48, %v1857_v58  ;;  %2774 = vst [vmem:[%s4941_s6 + $0x40] sm:$0xff] %v2736_v43  ;;  %v2405_v48 = vmax.f32 %v2329_v35, 0.0  ;;  %vm1878_vm8 = vweird.f32 %v5178_v32 }
 0x2ff   : > { %v1460_v24 = vmul.f32 0.00390625, %v1408_v50  ;;  %v1498_v44 = vmul.f32 %v5193_v59, %v5193_v59  ;;  %v2022_v52 = vmul.f32 %v4199_v1, %v1861_v31  ;;  %v2510_v30 = vpop.f32.mrf.mxu0  ;;  %v2023_v11 = vmul.f32 %v4201_v12, %v1861_v31 }
 0x300   : > { %v1865_v16 = vmul.f32 0.5, %v1864_v22  ;;  %v2511_v19 = vadd.f32 %v4895_v60, %v2510_v30  ;;  %v2407_v37 = vmax.f32 %v2331_v3, 0.0 }
 0x301   : > { %v2641_v8 = vpop.f32.mrf.mxu1  ;;  %v1536_v40 = vsub.f32 %v1460_v24, %v1498_v44  ;;  %v2099_v55 = vmul.f32 %v2022_v52, %v5099_v9  ;;  %v2100_v2 = vmul.f32 %v2023_v11, %v5099_v9  ;;  %v2406_v9 = vmax.f32 %v2330_v29, 0.0 }
 0x302   : > { %v1866_v18 = vsub.f32 1.5, %v1865_v16  ;;  %v2642_v10 = vadd.f32 %v2641_v8, %v2511_v19  ;;  %2557 = vmatmul.f32.gmra.mxu0 %v2404_v25  ;;  %v2256_v17 = vmul.f32 %v2022_v52, %v5647_v26  ;;  %v2257_v8 = vmul.f32 %v2023_v11, %v4552_v61  ;;  %v3186_v11 = vld [vmem:[%s3642_s14 + $0x50] sm:$0xff] }
 0x303   : > { %v5207_v46 = vpop.eup %3144  ;;  %v5214_v21 = vadd.f32 1e-05, %v1536_v40  ;;  %v2180_v23 = vsub.f32 %v4232_v42, %v2099_v55  ;;  %v2181_v22 = vsub.f32 %v4236_v63, %v2100_v2 }
 0x304   : > { %v1873_v4 = vmul.f32 %v5207_v46, %v5178_v32  ;;  %2688 = vmatmul.f32.gmra.mxu1 %v2405_v48  ;;  %v1183_v20 = vpop.xlane.xlu2 %1182  ;;  %v1867_v15 = vmul.f32 %v5182_v57, %v1866_v18  ;;  %v2737_v58 = vadd.f32 %v3185_v0, %v2642_v10  ;;  %vm1879_vm7 = vweird.f32 %v5207_v46 }
 0x305   : > { %v5218_v47 = vmul.f32 0.00390625, %v1183_v20  ;;  %3146 = vrsqrt.f32 %v5214_v21  ;;  %v2333_v48 = vadd.f32 %v2257_v8, %v2181_v22  ;;  %vm1880_vm9 = vmor %vm1878_vm8, %vm1879_vm7  ;;  %vm1888_vm11 = vweird.f32 %v5214_v21 }
 0x306   : > { %v1874_v6 = vmul.f32 %v5207_v46, %v1873_v4  ;;  %v1411_v13 = vpop.xlane.xlu0 %1410  ;;  %2775 = vst [vmem:[%s4941_s6 + $0x48] sm:$0xff] %v2737_v58  ;;  %v1871_v51 = vsel %vm1870_vm6, %v5182_v57, %v1867_v15  ;;  %v2332_v57 = vadd.f32 %v2256_v17, %v2180_v23 }
 0x307   : > { %v1499_v41 = vmul.f32 %v5218_v47, %v5218_v47  ;;  %v1461_v7 = vmul.f32 0.00390625, %v1411_v13  ;;  %v2513_v43 = vpop.f32.mrf.mxu0  ;;  %v2024_v24 = vmul.f32 %v4199_v1, %v1871_v51  ;;  %v2025_v16 = vmul.f32 %v4201_v12, %v1871_v51 }
 0x308   : > { %v1875_v56 = vmul.f32 0.5, %v1874_v6  ;;  %v2514_v44 = vadd.f32 %v4895_v60, %v2513_v43  ;;  %v2408_v6 = vmax.f32 %v2332_v57, 0.0  ;;  %v2409_v0 = vmax.f32 %v2333_v48, 0.0 }
 0x309   : > { %v2644_v50 = vpop.f32.mrf.mxu1  ;;  %v1537_v35 = vsub.f32 %v1461_v7, %v1499_v41  ;;  %v2101_v19 = vmul.f32 %v2024_v24, %v5132_v53  ;;  %v2102_v61 = vmul.f32 %v2025_v16, %v5132_v53 }
 0x30a   : > { %v1876_v31 = vsub.f32 1.5, %v1875_v56  ;;  %v2645_v52 = vadd.f32 %v2644_v50, %v2514_v44  ;;  %2560 = vmatmul.f32.gmra.mxu0 %v2406_v9  ;;  %v2259_v56 = vmul.f32 %v2025_v16, %v4592_v49 }
 0x30b   : > { %v5237_v30 = vadd.f32 1e-05, %v1537_v35  ;;  %v5240_v25 = vpop.eup %3146  ;;  %v2182_v20 = vsub.f32 %v4232_v42, %v2101_v19  ;;  %v2183_v58 = vsub.f32 %v4236_v63, %v2102_v61 }
 0x30c   : > { %v1877_v26 = vmul.f32 %v5207_v46, %v1876_v31  ;;  %2691 = vmatmul.f32.gmra.mxu1 %v2407_v37  ;;  %v1186_v28 = vpop.xlane.xlu1 %1185  ;;  %v1883_v40 = vmul.f32 %v5240_v25, %v5214_v21  ;;  %v2738_v32 = vadd.f32 %v3186_v11, %v2645_v52  ;;  %vm1889_vm10 = vweird.f32 %v5240_v25  ;;  %v3187_v31 = vld [vmem:[%s3642_s14 + $0x58] sm:$0xff] }
 0x30d   : > { %3148 = vrsqrt.f32 %v5237_v30  ;;  %v5252_v38 = vmul.f32 0.00390625, %v1186_v28  ;;  %vm1890_vm12 = vmor %vm1888_vm11, %vm1889_vm10  ;;  %vm1898_vm14 = vweird.f32 %v5237_v30 }
 0x30e   : > { %v1414_v18 = vpop.xlane.xlu2 %1413  ;;  %v1884_v33 = vmul.f32 %v5240_v25, %v1883_v40  ;;  %v1881_v4 = vsel %vm1880_vm9, %v5207_v46, %v1877_v26  ;;  %2776 = vst [vmem:[%s4941_s6 + $0x50] sm:$0xff] %v2738_v32  ;;  %v2258_v46 = vmul.f32 %v2024_v24, %v3832_v27  ;;  %v2335_v24 = vadd.f32 %v2259_v56, %v2183_v58 }
 0x30f   : > { %v1462_v55 = vmul.f32 0.00390625, %v1414_v18  ;;  %v1500_v10 = vmul.f32 %v5252_v38, %v5252_v38  ;;  %v2026_v53 = vmul.f32 %v4199_v1, %v1881_v4  ;;  %v2516_v15 = vpop.f32.mrf.mxu0  ;;  %v2027_v41 = vmul.f32 %v4201_v12, %v1881_v4 }
 0x310   : > { %v1885_v29 = vmul.f32 0.5, %v1884_v33  ;;  %v2517_v13 = vadd.f32 %v4895_v60, %v2516_v15  ;;  %v2334_v27 = vadd.f32 %v2258_v46, %v2182_v20  ;;  %v2411_v61 = vmax.f32 %v2335_v24, 0.0 }
 0x311   : > { %v2647_v2 = vpop.f32.mrf.mxu1  ;;  %v1538_v3 = vsub.f32 %v1462_v55, %v1500_v10  ;;  %v2103_v9 = vmul.f32 %v2026_v53, %v5157_v34  ;;  %v2104_v16 = vmul.f32 %v2027_v41, %v5157_v34  ;;  %v2260_v34 = vmul.f32 %v2026_v53, %v3837_v36  ;;  %v5689_v53 = vld [vmem:[#allocation32_spill] sm:$0xff] }
 0x312   : > { %v1886_v23 = vsub.f32 1.5, %v1885_v29  ;;  %v2648_v43 = vadd.f32 %v2647_v2, %v2517_v13  ;;  %2563 = vmatmul.f32.gmra.mxu0 %v2408_v6  ;;  %v2410_v52 = vmax.f32 %v2334_v27, 0.0  ;;  %v2261_v15 = vmul.f32 %v2027_v41, %v5689_v53  ;;  %v3188_v6 = vld [vmem:[%s3642_s14 + $0x60] sm:$0xff] }
 0x313   : > { %v3149_v7 = vpop.eup %3148  ;;  %v5269_v50 = vadd.f32 1e-05, %v1538_v3  ;;  %v2184_v21 = vsub.f32 %v4232_v42, %v2103_v9  ;;  %v2185_v33 = vsub.f32 %v4236_v63, %v2104_v16 }
 0x314   : > { %v1893_v51 = vmul.f32 %v3149_v7, %v5237_v30  ;;  %2694 = vmatmul.f32.gmra.mxu1 %v2409_v0  ;;  %v1189_v35 = vpop.xlane.xlu0 %1188  ;;  %v1887_v17 = vmul.f32 %v5240_v25, %v1886_v23  ;;  %v2739_v44 = vadd.f32 %v3187_v31, %v2648_v43  ;;  %vm1899_vm13 = vweird.f32 %v3149_v7  ;;  %v5690_v31 = vld [vmem:[#allocation24_spill] sm:$0xff] }
 0x315   : > { %v5273_v22 = vmul.f32 0.00390625, %v1189_v35  ;;  %3150 = vrsqrt.f32 %v5269_v50  ;;  %vm1900_vm15 = vmor %vm1898_vm14, %vm1899_vm13  ;;  %v2337_v13 = vadd.f32 %v2261_v15, %v2185_v33  ;;  %vm1908_vm1 = vweird.f32 %v5269_v50 }
 0x316   : > { %v1894_v49 = vmul.f32 %v3149_v7, %v1893_v51  ;;  %v1417_v37 = vpop.xlane.xlu1 %1416  ;;  %2777 = vst [vmem:[%s4941_s6 + $0x58] sm:$0xff] %v2739_v44  ;;  %v1891_v28 = vsel %vm1890_vm12, %v5240_v25, %v1887_v17  ;;  %v2336_v25 = vadd.f32 %v2260_v34, %v2184_v21 }
 0x317   : > { %v1463_v57 = vmul.f32 0.00390625, %v1417_v37  ;;  %v1501_v8 = vmul.f32 %v5273_v22, %v5273_v22  ;;  %v2519_v19 = vpop.f32.mrf.mxu0  ;;  %v2028_v11 = vmul.f32 %v4199_v1, %v1891_v28  ;;  %v2029_v55 = vmul.f32 %v4201_v12, %v1891_v28  ;;  %v5691_v28 = vld [vmem:[#allocation23_spill] sm:$0xff] }
 0x318   : > { %v1895_v26 = vmul.f32 0.5, %v1894_v49  ;;  %v2520_v18 = vadd.f32 %v4895_v60, %v2519_v19  ;;  %v2412_v56 = vmax.f32 %v2336_v25, 0.0  ;;  %v2413_v49 = vmax.f32 %v2337_v13, 0.0 }
 0x319   : > { %v2650_v40 = vpop.f32.mrf.mxu1  ;;  %v1539_v48 = vsub.f32 %v1463_v57, %v1501_v8  ;;  %v2105_v2 = vmul.f32 %v2028_v11, %v5193_v59  ;;  %v2106_v3 = vmul.f32 %v2029_v55, %v5193_v59  ;;  %v5310_v59 = vld [vmem:[%s5532_s7] ss:$0 sm:$0xff]  ;;  %v2262_v44 = vmul.f32 %v2028_v11, %v5690_v31 }
 0x31a   : > { %v1896_v32 = vsub.f32 1.5, %v1895_v26  ;;  %v2651_v29 = vadd.f32 %v2650_v40, %v2520_v18  ;;  %2566 = vmatmul.f32.gmra.mxu0 %v2410_v52  ;;  %v2263_v19 = vmul.f32 %v2029_v55, %v5691_v28 }
 0x31b   : > { %v5290_v4 = vadd.f32 1e-05, %v1539_v48  ;;  %v3151_v10 = vpop.eup %3150  ;;  %v2186_v17 = vsub.f32 %v4232_v42, %v2105_v2  ;;  %v2187_v37 = vsub.f32 %v4236_v63, %v2106_v3 }
 0x31c   : > { %v1897_v20 = vmul.f32 %v3149_v7, %v1896_v32  ;;  %2697 = vmatmul.f32.gmra.mxu1 %v2411_v61  ;;  %v1192_v36 = vpop.xlane.xlu2 %1191  ;;  %v1903_v60 = vmul.f32 %v3151_v10, %v5269_v50  ;;  %v2740_v0 = vadd.f32 %v3188_v6, %v2651_v29  ;;  %vm1909_vm0 = vweird.f32 %v3151_v10  ;;  %v3190_v50 = vld [vmem:[%s3642_s14 + $0x68] sm:$0xff] }
 0x31d   : > { %3152 = vrsqrt.f32 %v5290_v4  ;;  %v5298_v58 = vmul.f32 0.00390625, %v1192_v36  ;;  %v2338_v34 = vadd.f32 %v2262_v44, %v2186_v17  ;;  %vm1910_vm2 = vmor %vm1908_vm1, %vm1909_vm0  ;;  %v2339_v25 = vadd.f32 %v2263_v19, %v2187_v37  ;;  %v5692_v6 = vld [vmem:[#allocation25_spill] sm:$0xff] }
 0x31e   : > { %v1904_v46 = vmul.f32 %v3151_v10, %v1903_v60  ;;  %v1901_v23 = vsel %vm1900_vm15, %v3149_v7, %v1897_v20  ;;  %2778 = vst [vmem:[%s4941_s6 + $0x60] sm:$0xff] %v2740_v0  ;;  %v1420_v41 = vpop.xlane.xlu0 %1419  ;;  %vm1918_vm4 = vweird.f32 %v5290_v4 }
 0x31f   : > { %v1502_v30 = vmul.f32 %v5298_v58, %v5298_v58  ;;  %v2030_v9 = vmul.f32 %v4199_v1, %v1901_v23  ;;  %v2522_v43 = vpop.f32.mrf.mxu0  ;;  %v1464_v27 = vmul.f32 0.00390625, %v1420_v41  ;;  %v2031_v24 = vmul.f32 %v4201_v12, %v1901_v23 }
 0x320   : > { %v1905_v51 = vmul.f32 0.5, %v1904_v46  ;;  %v2523_v7 = vadd.f32 %v5310_v59, %v2522_v43  ;;  %v2414_v23 = vmax.f32 %v2338_v34, 0.0 }
 0x321   : > { %v2653_v35 = vpop.f32.mrf.mxu1  ;;  %v1540_v8 = vsub.f32 %v1464_v27, %v1502_v30  ;;  %v2107_v21 = vmul.f32 %v2030_v9, %v5218_v47  ;;  %v2108_v11 = vmul.f32 %v2031_v24, %v5218_v47  ;;  %v2264_v0 = vmul.f32 %v2030_v9, %v5692_v6 }
 0x322   : > { %v1906_v57 = vsub.f32 1.5, %v1905_v51  ;;  %v2654_v52 = vadd.f32 %v2653_v35, %v2523_v7  ;;  %2569 = vmatmul.f32.gmra.mxu0 %v2412_v56  ;;  %v2415_v30 = vmax.f32 %v2339_v25, 0.0  ;;  %v5693_v51 = vld [vmem:[#allocation56_spill] sm:$0xff] }
 0x323   : > { %v5315_v16 = vpop.eup %3152  ;;  %v5322_v48 = vadd.f32 1e-05, %v1540_v8  ;;  %v2188_v55 = vsub.f32 %v4232_v42, %v2107_v21  ;;  %v2189_v13 = vsub.f32 %v4236_v63, %v2108_v11  ;;  %v2265_v43 = vmul.f32 %v2031_v24, %v5693_v51 }
 0x324   : > { %v1913_v26 = vmul.f32 %v5315_v16, %v5290_v4  ;;  %2700 = vmatmul.f32.gmra.mxu1 %v2413_v49  ;;  %v1907_v40 = vmul.f32 %v3151_v10, %v1906_v57  ;;  %v1195_v61 = vpop.xlane.xlu1 %1194  ;;  %v2741_v18 = vadd.f32 %v3190_v50, %v2654_v52  ;;  %vm1919_vm3 = vweird.f32 %v5315_v16  ;;  %v3191_v57 = vld [vmem:[%s3642_s14 + $0x70] sm:$0xff] }
 0x325   : > { %v5327_v33 = vmul.f32 0.00390625, %v1195_v61  ;;  %3154 = vrsqrt.f32 %v5322_v48  ;;  %v2340_v56 = vadd.f32 %v2264_v0, %v2188_v55  ;;  %v2341_v37 = vadd.f32 %v2265_v43, %v2189_v13  ;;  %vm1920_vm5 = vmor %vm1918_vm4, %vm1919_vm3 }
 0x326   : > { %v1914_v32 = vmul.f32 %v5315_v16, %v1913_v26  ;;  %v1911_v20 = vsel %vm1910_vm2, %v3151_v10, %v1907_v40  ;;  %2779 = vst [vmem:[%s4941_s6 + $0x68] sm:$0xff] %v2741_v18  ;;  %vm1928_vm7 = vweird.f32 %v5322_v48 }
 0x327   : > { %v1423_v36 = vpop.xlane.xlu2 %1422  ;;  %v1503_v53 = vmul.f32 %v5327_v33, %v5327_v33  ;;  %v2032_v47 = vmul.f32 %v4199_v1, %v1911_v20  ;;  %v2525_v15 = vpop.f32.mrf.mxu0  ;;  %v2033_v3 = vmul.f32 %v4201_v12, %v1911_v20  ;;  %v2416_v52 = vmax.f32 %v2340_v56, 0.0 }
 0x328   : > { %v1915_v29 = vmul.f32 0.5, %v1914_v32  ;;  %v1465_v2 = vmul.f32 0.00390625, %v1423_v36  ;;  %v2526_v10 = vadd.f32 %v5310_v59, %v2525_v15  ;;  %v2417_v32 = vmax.f32 %v2341_v37, 0.0 }
 0x329   : > { %v2656_v60 = vpop.f32.mrf.mxu1  ;;  %v2109_v35 = vmul.f32 %v2032_v47, %v5252_v38  ;;  %v2110_v7 = vmul.f32 %v2033_v3, %v5252_v38  ;;  %v2266_v20 = vmul.f32 %v2032_v47, %v5653_v54 }
 0x32a   : > { %v1916_v46 = vsub.f32 1.5, %v1915_v29  ;;  %v1541_v41 = vsub.f32 %v1465_v2, %v1503_v53  ;;  %v2657_v9 = vadd.f32 %v2656_v60, %v2526_v10  ;;  %2572 = vmatmul.f32.gmra.mxu0 %v2414_v23  ;;  %v5694_v29 = vld [vmem:[#allocation33_spill] sm:$0xff] }
 0x32b   : > { %v3155_v49 = vpop.eup %3154  ;;  %v2190_v19 = vsub.f32 %v4232_v42, %v2109_v35  ;;  %v2191_v4 = vsub.f32 %v4236_v63, %v2110_v7  ;;  %v2267_v36 = vmul.f32 %v2033_v3, %v5694_v29 }
 0x32c   : > { %v1917_v27 = vmul.f32 %v5315_v16, %v1916_v46  ;;  %2703 = vmatmul.f32.gmra.mxu1 %v2415_v30  ;;  %v1198_v17 = vpop.xlane.xlu0 %1197  ;;  %v5344_v31 = vadd.f32 1e-05, %v1541_v41  ;;  %v1923_v24 = vmul.f32 %v3155_v49, %v5322_v48  ;;  %v2742_v8 = vadd.f32 %v3191_v57, %v2657_v9  ;;  %v3192_v46 = vld [vmem:[%s3642_s14 + $0x78] sm:$0xff] }
 0x32d   : > { %v5346_v44 = vmul.f32 0.00390625, %v1198_v17  ;;  %vm1929_vm6 = vweird.f32 %v3155_v49  ;;  %v2342_v60 = vadd.f32 %v2266_v20, %v2190_v19  ;;  %v2343_v2 = vadd.f32 %v2267_v36, %v2191_v4 }
 0x32e   : > { %v1426_v21 = vpop.xlane.xlu1 %1425  ;;  %3156 = vrsqrt.f32 %v5344_v31  ;;  %v1924_v28 = vmul.f32 %v3155_v49, %v1923_v24  ;;  %2780 = vst [vmem:[%s4941_s6 + $0x70] sm:$0xff] %v2742_v8  ;;  %v1921_v40 = vsel %vm1920_vm5, %v5315_v16, %v1917_v27  ;;  %vm1930_vm8 = vmor %vm1928_vm7, %vm1929_vm6  ;;  %vm1938_vm9 = vweird.f32 %v5344_v31 }
 0x32f   : > { %v1466_v38 = vmul.f32 0.00390625, %v1426_v21  ;;  %v1504_v26 = vmul.f32 %v5346_v44, %v5346_v44  ;;  %v2528_v61 = vpop.f32.mrf.mxu0  ;;  %v2034_v50 = vmul.f32 %v4199_v1, %v1921_v40  ;;  %v2035_v18 = vmul.f32 %v4201_v12, %v1921_v40  ;;  %v5695_v21 = vld [vmem:[#allocation27_spill] sm:$0xff] }
 0x330   : > { %v1925_v25 = vmul.f32 0.5, %v1924_v28  ;;  %v2529_v55 = vadd.f32 %v5310_v59, %v2528_v61  ;;  %v2418_v56 = vmax.f32 %v2342_v60, 0.0  ;;  %v2419_v51 = vmax.f32 %v2343_v2, 0.0 }
 0x331   : > { %v2659_v34 = vpop.f32.mrf.mxu1  ;;  %v1542_v11 = vsub.f32 %v1466_v38, %v1504_v26  ;;  %v2111_v13 = vmul.f32 %v2034_v50, %v5273_v22  ;;  %v2112_v54 = vmul.f32 %v2035_v18, %v5273_v22  ;;  %v2268_v38 = vmul.f32 %v2034_v50, %v5695_v21  ;;  %v5696_v26 = vld [vmem:[#allocation34_spill] sm:$0xff] }
 0x332   : > { %v1926_v16 = vsub.f32 1.5, %v1925_v25  ;;  %v2660_v15 = vadd.f32 %v2659_v34, %v2529_v55  ;;  %2575 = vmatmul.f32.gmra.mxu0 %v2416_v52  ;;  %v2269_v52 = vmul.f32 %v2035_v18, %v5696_v26  ;;  %v3193_v55 = vld [vmem:[%s3642_s14 + $0x80] sm:$0xff] }
 0x333   : > { %v5365_v53 = vadd.f32 1e-05, %v1542_v11  ;;  %v2192_v9 = vsub.f32 %v4232_v42, %v2111_v13  ;;  %v2193_v17 = vsub.f32 %v4236_v63, %v2112_v54 }
 0x334   : > { %2706 = vmatmul.f32.gmra.mxu1 %v2417_v32  ;;  %v3157_v6 = vpop.eup %3156  ;;  %v1201_v0 = vpop.xlane.xlu2 %1200  ;;  %v1927_v47 = vmul.f32 %v3155_v49, %v1926_v16  ;;  %v2743_v10 = vadd.f32 %v3192_v46, %v2660_v15 }
 0x335   : > { %3158 = vrsqrt.f32 %v5365_v53  ;;  %v1933_v3 = vmul.f32 %v3157_v6, %v5344_v31  ;;  %v5374_v23 = vmul.f32 0.00390625, %v1201_v0  ;;  %vm1939_vm10 = vweird.f32 %v3157_v6 }
 0x336   : > { %2781 = vst [vmem:[%s4941_s6 + $0x78] sm:$0xff] %v2743_v10  ;;  %v1429_v41 = vpop.xlane.xlu0 %1428  ;;  %v1931_v43 = vsel %vm1930_vm8, %v3155_v49, %v1927_v47  ;;  %v2344_v61 = vadd.f32 %v2268_v38, %v2192_v9  ;;  %v2345_v34 = vadd.f32 %v2269_v52, %v2193_v17  ;;  %vm1940_vm11 = vmor %vm1938_vm9, %vm1939_vm10  ;;  %vm1948_vm13 = vweird.f32 %v5365_v53 }
 0x337   : > { %v1934_v30 = vmul.f32 %v3157_v6, %v1933_v3  ;;  %v2531_v35 = vpop.f32.mrf.mxu0  ;;  %v1505_v22 = vmul.f32 %v5374_v23, %v5374_v23  ;;  %v1467_v48 = vmul.f32 0.00390625, %v1429_v41  ;;  %v2036_v24 = vmul.f32 %v4199_v1, %v1931_v43 }
 0x338   : > { %v2532_v37 = vadd.f32 %v5310_v59, %v2531_v35  ;;  %v2037_v57 = vmul.f32 %v4201_v12, %v1931_v43  ;;  %v2420_v15 = vmax.f32 %v2344_v61, 0.0  ;;  %v2421_v54 = vmax.f32 %v2345_v34, 0.0  ;;  %v3194_v43 = vld [vmem:[%s3642_s14 + $0x88] sm:$0xff]  ;;  %v3195_v61 = vld [vmem:[%s3642_s14 + $0x90] sm:$0xff] }
 0x339   : > { %v2662_v27 = vpop.f32.mrf.mxu1  ;;  %v1935_v7 = vmul.f32 0.5, %v1934_v30  ;;  %v1543_v49 = vsub.f32 %v1467_v48, %v1505_v22  ;;  %v2113_v11 = vmul.f32 %v2036_v24, %v5298_v58  ;;  %v2270_v47 = vmul.f32 %v2036_v24, %v5661_v62 }
 0x33a   : > { %v2663_v4 = vadd.f32 %v2662_v27, %v2532_v37  ;;  %2578 = vmatmul.f32.gmra.mxu0 %v2418_v56  ;;  %v2114_v18 = vmul.f32 %v2037_v57, %v5298_v58  ;;  %v2271_v46 = vmul.f32 %v2037_v57, %v4826_v39 }
 0x33b   : > { %v3159_v8 = vpop.eup %3158  ;;  %v1936_v28 = vsub.f32 1.5, %v1935_v7  ;;  %v5388_v40 = vadd.f32 1e-05, %v1543_v49  ;;  %v2194_v60 = vsub.f32 %v4232_v42, %v2113_v11  ;;  %v5697_v49 = vld [vmem:[#allocation35_spill] sm:$0xff] }
 0x33c   : > { %v1943_v19 = vmul.f32 %v3159_v8, %v5365_v53  ;;  %2709 = vmatmul.f32.gmra.mxu1 %v2419_v51  ;;  %v2744_v50 = vadd.f32 %v3193_v55, %v2663_v4  ;;  %v2195_v31 = vsub.f32 %v4236_v63, %v2114_v18  ;;  %vm1949_vm12 = vweird.f32 %v3159_v8 }
 0x33d   : > { %v1937_v32 = vmul.f32 %v3157_v6, %v1936_v28  ;;  %3160 = vrsqrt.f32 %v5388_v40  ;;  %v2346_v30 = vadd.f32 %v2270_v47, %v2194_v60  ;;  %vm1950_vm14 = vmor %vm1948_vm13, %vm1949_vm12  ;;  %vm1958_vm0 = vweird.f32 %v5388_v40  ;;  %v5699_v60 = vld [vmem:[#allocation26_spill] sm:$0xff] }
 0x33e   : > { %v1944_v25 = vmul.f32 %v3159_v8, %v1943_v19  ;;  %2782 = vst [vmem:[%s4941_s6 + $0x80] sm:$0xff] %v2744_v50  ;;  %v2347_v35 = vadd.f32 %v2271_v46, %v2195_v31 }
 0x33f   : > { %v1941_v29 = vsel %vm1940_vm11, %v3157_v6, %v1937_v32  ;;  %v2534_v36 = vpop.f32.mrf.mxu0  ;;  %v2422_v39 = vmax.f32 %v2346_v30, 0.0 }
 0x340   : > { %v1945_v20 = vmul.f32 0.5, %v1944_v25  ;;  %v2038_v2 = vmul.f32 %v4199_v1, %v1941_v29  ;;  %v2039_v0 = vmul.f32 %v4201_v12, %v1941_v29  ;;  %v2535_v58 = vadd.f32 %v5310_v59, %v2534_v36 }
 0x341   : > { %v2665_v16 = vpop.f32.mrf.mxu1  ;;  %v2423_v24 = vmax.f32 %v2347_v35, 0.0 }
 0x342   : > { %v1946_v13 = vsub.f32 1.5, %v1945_v20  ;;  %v2666_v3 = vadd.f32 %v2665_v16, %v2535_v58  ;;  %2581 = vmatmul.f32.gmra.mxu0 %v2420_v15  ;;  %v2115_v41 = vmul.f32 %v2038_v2, %v5327_v33  ;;  %v2116_v56 = vmul.f32 %v2039_v0, %v5327_v33 }
 0x343   : > { %v3161_v10 = vpop.eup %3160  ;;  %v2273_v21 = vmul.f32 %v2039_v0, %v5697_v49 }
 0x344   : > { %v1947_v6 = vmul.f32 %v3159_v8, %v1946_v13  ;;  %2712 = vmatmul.f32.gmra.mxu1 %v2421_v54  ;;  %v1953_v51 = vmul.f32 %v3161_v10, %v5388_v40  ;;  %v2745_v62 = vadd.f32 %v3194_v43, %v2666_v3  ;;  %v2196_v17 = vsub.f32 %v4232_v42, %v2115_v41  ;;  %v3196_v13 = vld [vmem:[%s3642_s14 + $0x98] sm:$0xff] }
 0x345   : > { %v2197_v53 = vsub.f32 %v4236_v63, %v2116_v56  ;;  %vm1959_vm15 = vweird.f32 %v3161_v10 }
 0x346   : > { %v1951_v27 = vsel %vm1950_vm14, %v3159_v8, %v1947_v6  ;;  %v1954_v22 = vmul.f32 %v3161_v10, %v1953_v51  ;;  %2783 = vst [vmem:[%s4941_s6 + $0x88] sm:$0xff] %v2745_v62  ;;  %v2272_v8 = vmul.f32 %v2038_v2, %v5668_v14  ;;  %vm1960_vm1 = vmor %vm1958_vm0, %vm1959_vm15  ;;  %v3197_v51 = vld [vmem:[%s3642_s14 + $0xa0] sm:$0xff] }
 0x347   : > { %v2537_v48 = vpop.f32.mrf.mxu0  ;;  %v2040_v7 = vmul.f32 %v4199_v1, %v1951_v27  ;;  %v2041_v57 = vmul.f32 %v4201_v12, %v1951_v27  ;;  %v2349_v28 = vadd.f32 %v2273_v21, %v2197_v53  ;;  %v3200_v21 = vld [vmem:[%s3642_s14 + $0xb8] sm:$0xff] }
 0x348   : > { %v1955_v37 = vmul.f32 0.5, %v1954_v22  ;;  %v2538_v33 = vadd.f32 %v5310_v59, %v2537_v48  ;;  %v2348_v52 = vadd.f32 %v2272_v8, %v2196_v17 }
 0x349   : > { %v2668_v9 = vpop.f32.mrf.mxu1  ;;  %v2117_v19 = vmul.f32 %v2040_v7, %v5346_v44  ;;  %v2118_v11 = vmul.f32 %v2041_v57, %v5346_v44  ;;  %v2425_v50 = vmax.f32 %v2349_v28, 0.0  ;;  %v5698_v44 = vld [vmem:[#allocation30_spill] sm:$0xff]  ;;  %v2275_v2 = vmul.f32 %v2041_v57, %v5699_v60 }
 0x34a   : > { %v1956_v38 = vsub.f32 1.5, %v1955_v37  ;;  %v2669_v26 = vadd.f32 %v2668_v9, %v2538_v33  ;;  %2584 = vmatmul.f32.gmra.mxu0 %v2422_v39  ;;  %v2424_v55 = vmax.f32 %v2348_v52, 0.0  ;;  %v2274_v16 = vmul.f32 %v2040_v7, %v5698_v44  ;;  %v3199_v37 = vld [vmem:[%s3642_s14 + $0xb0] sm:$0xff] }
 0x34b   : > { %v2198_v18 = vsub.f32 %v4232_v42, %v2117_v19  ;;  %v2199_v29 = vsub.f32 %v4236_v63, %v2118_v11 }
 0x34c   : > { %2715 = vmatmul.f32.gmra.mxu1 %v2423_v24  ;;  %v1957_v4 = vmul.f32 %v3161_v10, %v1956_v38  ;;  %v2746_v34 = vadd.f32 %v3195_v61, %v2669_v26 }
 0x34d   : > { %v2350_v0 = vadd.f32 %v2274_v16, %v2198_v18  ;;  %v2351_v54 = vadd.f32 %v2275_v2, %v2199_v29  ;;  %v3204_v2 = vld [vmem:[%s3642_s14 + $0xd8] sm:$0xff] }
 0x34e   : > { %2784 = vst [vmem:[%s4941_s6 + $0x90] sm:$0xff] %v2746_v34  ;;  %v1961_v14 = vsel %vm1960_vm1, %v3161_v10, %v1957_v4  ;;  %v3201_v4 = vld [vmem:[%s3642_s14 + $0xc0] sm:$0xff] }
 0x34f   : > { %v2540_v32 = vpop.f32.mrf.mxu0  ;;  %v2042_v40 = vmul.f32 %v4199_v1, %v1961_v14  ;;  %v2043_v36 = vmul.f32 %v4201_v12, %v1961_v14  ;;  %v2426_v6 = vmax.f32 %v2350_v0, 0.0  ;;  %v2427_v46 = vmax.f32 %v2351_v54, 0.0 }
 0x350   : > { %v2541_v20 = vadd.f32 %v5310_v59, %v2540_v32 }
 0x351   : > { %v2671_v25 = vpop.f32.mrf.mxu1  ;;  %v2119_v31 = vmul.f32 %v2042_v40, %v5374_v23  ;;  %v2120_v47 = vmul.f32 %v2043_v36, %v5374_v23  ;;  %v2276_v56 = vmul.f32 %v2042_v40, %v5676_v5  ;;  %v2277_v23 = vmul.f32 %v2043_v36, %v4951_v45  ;;  %v3198_v5 = vld [vmem:[%s3642_s14 + $0xa8] sm:$0xff]  ;;  %v3203_v40 = vld [vmem:[%s3642_s14 + $0xd0] sm:$0xff] }
 0x352   : > { %v2672_v15 = vadd.f32 %v2671_v25, %v2541_v20  ;;  %2587 = vmatmul.f32.gmra.mxu0 %v2424_v55  ;;  %v3202_v25 = vld [vmem:[%s3642_s14 + $0xc8] sm:$0xff] }
 0x353   : > { %v2200_v10 = vsub.f32 %v4232_v42, %v2119_v31  ;;  %v2201_v30 = vsub.f32 %v4236_v63, %v2120_v47  ;;  %v3205_v47 = vld [vmem:[%s3642_s14 + $0xe0] sm:$0xff] }
 0x354   : > { %2718 = vmatmul.f32.gmra.mxu1 %v2425_v50  ;;  %v2747_v58 = vadd.f32 %v3196_v13, %v2672_v15 }
 0x355   : > { %v2352_v62 = vadd.f32 %v2276_v56, %v2200_v10  ;;  %v2353_v35 = vadd.f32 %v2277_v23, %v2201_v30  ;;  %v3206_v10 = vld [vmem:[%s3642_s14 + $0xe8] sm:$0xff] }
 0x356   : > { %2785 = vst [vmem:[%s4941_s6 + $0x98] sm:$0xff] %v2747_v58 }
 0x357   : > { %v2543_v1 = vpop.f32.mrf.mxu0  ;;  %v2428_v42 = vmax.f32 %v2352_v62, 0.0  ;;  %v2429_v48 = vmax.f32 %v2353_v35, 0.0 }
 0x358   : > { %v2544_v3 = vadd.f32 %v5310_v59, %v2543_v1 }
 0x359   : > { %v2674_v12 = vpop.f32.mrf.mxu1 }
 0x35a   : > { %v2675_v41 = vadd.f32 %v2674_v12, %v2544_v3  ;;  %2590 = vmatmul.f32.gmra.mxu0 %v2426_v6 }
 0x35c   : > { %2721 = vmatmul.f32.gmra.mxu1 %v2427_v46  ;;  %v2748_v43 = vadd.f32 %v3197_v51, %v2675_v41 }
 0x35e   : > { %2786 = vst [vmem:[%s4941_s6 + $0xa0] sm:$0xff] %v2748_v43  ;;  %v3207_v43 = vld [vmem:[%s3642_s14 + $0xf0] sm:$0xff] }
 0x35f   : > { %v2546_v27 = vpop.f32.mrf.mxu0 }
 0x360   : > { %v2547_v63 = vadd.f32 %v5310_v59, %v2546_v27 }
 0x361   : > { %v2677_v22 = vpop.f32.mrf.mxu1 }
 0x362   : > { %v2678_v9 = vadd.f32 %v2677_v22, %v2547_v63  ;;  %2593 = vmatmul.f32.gmra.mxu0 %v2428_v42  ;;  %v3208_v42 = vld [vmem:[%s3642_s14 + $0xf8] sm:$0xff] }
 0x364   : > { %2724 = vmatmul.f32.gmra.mxu1 %v2429_v48  ;;  %v2749_v45 = vadd.f32 %v3198_v5, %v2678_v9 }
 0x366   : > { %2787 = vst [vmem:[%s4941_s6 + $0xa8] sm:$0xff] %v2749_v45 }
 0x367   : > { %v2549_v39 = vpop.f32.mrf.mxu0 }
 0x368   : > { %v2550_v53 = vadd.f32 %v5310_v59, %v2549_v39 }
 0x369   : > { %v2680_v17 = vpop.f32.mrf.mxu1 }
 0x36a   : > { %v2681_v7 = vadd.f32 %v2680_v17, %v2550_v53  ;;  %v3209_v17 = vld [vmem:[%s3642_s14 + $0x100] sm:$0xff] }
 0x36c   : > { %v2750_v33 = vadd.f32 %v3199_v37, %v2681_v7 }
 0x36e   : > { %2788 = vst [vmem:[%s4941_s6 + $0xb0] sm:$0xff] %v2750_v33 }
 0x36f   : > { %v2552_v24 = vpop.f32.mrf.mxu0 }
 0x370   : > { %v2553_v8 = vadd.f32 %v5310_v59, %v2552_v24 }
 0x371   : > { %v2683_v57 = vpop.f32.mrf.mxu1 }
 0x372   : > { %v2684_v49 = vadd.f32 %v2683_v57, %v2553_v8  ;;  %v3210_v57 = vld [vmem:[%s3642_s14 + $0x108] sm:$0xff] }
 0x374   : > { %v2751_v38 = vadd.f32 %v3200_v21, %v2684_v49 }
 0x376   : > { %2789 = vst [vmem:[%s4941_s6 + $0xb8] sm:$0xff] %v2751_v38 }
 0x377   : > { %v2555_v26 = vpop.f32.mrf.mxu0 }
 0x378   : > { %v2556_v28 = vadd.f32 %v5310_v59, %v2555_v26 }
 0x379   : > { %v2686_v52 = vpop.f32.mrf.mxu1 }
 0x37a   : > { %v2687_v19 = vadd.f32 %v2686_v52, %v2556_v28  ;;  %v3211_v52 = vld [vmem:[%s3642_s14 + $0x110] sm:$0xff] }
 0x37c   : > { %v2752_v61 = vadd.f32 %v3201_v4, %v2687_v19 }
 0x37e   : > { %2790 = vst [vmem:[%s4941_s6 + $0xc0] sm:$0xff] %v2752_v61 }
 0x37f   : > { %v2558_v34 = vpop.f32.mrf.mxu0 }
 0x380   : > { %v2559_v14 = vadd.f32 %v5310_v59, %v2558_v34 }
 0x381   : > { %v2689_v11 = vpop.f32.mrf.mxu1 }
 0x382   : > { %v2690_v32 = vadd.f32 %v2689_v11, %v2559_v14  ;;  %v3212_v11 = vld [vmem:[%s3642_s14 + $0x118] sm:$0xff] }
 0x384   : > { %v2753_v55 = vadd.f32 %v3202_v25, %v2690_v32 }
 0x386   : > { %2791 = vst [vmem:[%s4941_s6 + $0xc8] sm:$0xff] %v2753_v55 }
 0x387   : > { %v2561_v50 = vpop.f32.mrf.mxu0 }
 0x388   : > { %v2562_v20 = vadd.f32 %v5310_v59, %v2561_v50 }
 0x389   : > { %v2692_v18 = vpop.f32.mrf.mxu1 }
 0x38a   : > { %v2693_v29 = vadd.f32 %v2692_v18, %v2562_v20  ;;  %v3213_v18 = vld [vmem:[%s3642_s14 + $0x120] sm:$0xff] }
 0x38c   : > { %v2754_v36 = vadd.f32 %v3203_v40, %v2693_v29 }
 0x38e   : > { %2792 = vst [vmem:[%s4941_s6 + $0xd0] sm:$0xff] %v2754_v36 }
 0x38f   : > { %v2564_v44 = vpop.f32.mrf.mxu0 }
 0x390   : > { %v2565_v15 = vadd.f32 %v5310_v59, %v2564_v44 }
 0x391   : > { %v2695_v16 = vpop.f32.mrf.mxu1 }
 0x392   : > { %v2696_v60 = vadd.f32 %v2695_v16, %v2565_v15  ;;  %v3214_v16 = vld [vmem:[%s3642_s14 + $0x128] sm:$0xff] }
 0x394   : > { %v2755_v0 = vadd.f32 %v3204_v2, %v2696_v60 }
 0x396   : > { %2793 = vst [vmem:[%s4941_s6 + $0xd8] sm:$0xff] %v2755_v0 }
 0x397   : > { %v2567_v13 = vpop.f32.mrf.mxu0 }
 0x398   : > { %v2568_v54 = vadd.f32 %v5310_v59, %v2567_v13 }
 0x399   : > { %v2698_v58 = vpop.f32.mrf.mxu1 }
 0x39a   : > { %v2699_v31 = vadd.f32 %v2698_v58, %v2568_v54 }
 0x39c   : > { %v2756_v1 = vadd.f32 %v3205_v47, %v2699_v31 }
 0x39e   : > { %2794 = vst [vmem:[%s4941_s6 + $0xe0] sm:$0xff] %v2756_v1 }
 0x39f   : > { %v2570_v12 = vpop.f32.mrf.mxu0 }
 0x3a0   : > { %v2571_v3 = vadd.f32 %v5310_v59, %v2570_v12 }
 0x3a1   : > { %v2701_v6 = vpop.f32.mrf.mxu1 }
 0x3a2   : > { %v2702_v46 = vadd.f32 %v2701_v6, %v2571_v3 }
 0x3a4   : > { %v2757_v30 = vadd.f32 %v3206_v10, %v2702_v46 }
 0x3a6   : > { %2795 = vst [vmem:[%s4941_s6 + $0xe8] sm:$0xff] %v2757_v30 }
 0x3a7   : > { %v2573_v41 = vpop.f32.mrf.mxu0 }
 0x3a8   : > { %v2574_v23 = vadd.f32 %v5310_v59, %v2573_v41 }
 0x3a9   : > { %v2704_v56 = vpop.f32.mrf.mxu1 }
 0x3aa   : > { %v2705_v51 = vadd.f32 %v2704_v56, %v2574_v23 }
 0x3ac   : > { %v2758_v62 = vadd.f32 %v3207_v43, %v2705_v51 }
 0x3ae   : > { %2796 = vst [vmem:[%s4941_s6 + $0xf0] sm:$0xff] %v2758_v62 }
 0x3af   : > { %v2576_v35 = vpop.f32.mrf.mxu0 }
 0x3b0   : > { %v2577_v22 = vadd.f32 %v5310_v59, %v2576_v35 }
 0x3b1   : > { %v2707_v27 = vpop.f32.mrf.mxu1 }
 0x3b2   : > { %v2708_v63 = vadd.f32 %v2707_v27, %v2577_v22 }
 0x3b4   : > { %v2759_v48 = vadd.f32 %v3208_v42, %v2708_v63 }
 0x3b6   : > { %2797 = vst [vmem:[%s4941_s6 + $0xf8] sm:$0xff] %v2759_v48 }
 0x3b7   : > { %v2579_v9 = vpop.f32.mrf.mxu0 }
 0x3b8   : > { %v2580_v45 = vadd.f32 %v5310_v59, %v2579_v9 }
 0x3b9   : > { %v2710_v5 = vpop.f32.mrf.mxu1 }
 0x3ba   : > { %v2711_v39 = vadd.f32 %v2710_v5, %v2580_v45 }
 0x3bc   : > { %v2760_v53 = vadd.f32 %v3209_v17, %v2711_v39 }
 0x3be   : > { %2798 = vst [vmem:[%s4941_s6 + $0x100] sm:$0xff] %v2760_v53 }
 0x3bf   : > { %v2582_v7 = vpop.f32.mrf.mxu0 }
 0x3c0   : > { %v2583_v33 = vadd.f32 %v5310_v59, %v2582_v7 }
 0x3c1   : > { %v2713_v37 = vpop.f32.mrf.mxu1 }
 0x3c2   : > { %v2714_v24 = vadd.f32 %v2713_v37, %v2583_v33 }
 0x3c4   : > { %v2761_v8 = vadd.f32 %v3210_v57, %v2714_v24 }
 0x3c6   : > { %2799 = vst [vmem:[%s4941_s6 + $0x108] sm:$0xff] %v2761_v8 }
 0x3c7   : > { %v2585_v49 = vpop.f32.mrf.mxu0 }
 0x3c8   : > { %v2586_v38 = vadd.f32 %v5310_v59, %v2585_v49 }
 0x3c9   : > { %v2716_v21 = vpop.f32.mrf.mxu1 }
 0x3ca   : > { %v2717_v26 = vadd.f32 %v2716_v21, %v2586_v38 }
 0x3cc   : > { %v2762_v28 = vadd.f32 %v3211_v52, %v2717_v26 }
 0x3ce   : > { %2800 = vst [vmem:[%s4941_s6 + $0x110] sm:$0xff] %v2762_v28 }
 0x3cf   : > { %v2588_v19 = vpop.f32.mrf.mxu0 }
 0x3d0   : > { %v2589_v61 = vadd.f32 %v5310_v59, %v2588_v19 }
 0x3d1   : > { %v2719_v4 = vpop.f32.mrf.mxu1 }
 0x3d2   : > { %v2720_v34 = vadd.f32 %v2719_v4, %v2589_v61 }
 0x3d4   : > { %v2763_v14 = vadd.f32 %v3212_v11, %v2720_v34 }
 0x3d6   : > { %2801 = vst [vmem:[%s4941_s6 + $0x118] sm:$0xff] %v2763_v14 }
 0x3d7   : > { %v2591_v32 = vpop.f32.mrf.mxu0 }
 0x3d8   : > { %v2592_v55 = vadd.f32 %v5310_v59, %v2591_v32 }
 0x3d9   : > { %v2722_v25 = vpop.f32.mrf.mxu1 }
 0x3da   : > { %v2723_v50 = vadd.f32 %v2722_v25, %v2592_v55 }
 0x3dc   : > { %v2764_v20 = vadd.f32 %v3213_v18, %v2723_v50 }
 0x3de   : > { %2802 = vst [vmem:[%s4941_s6 + $0x120] sm:$0xff] %v2764_v20 }
 0x3df   : > { %v2594_v29 = vpop.f32.mrf.mxu0 }
 0x3e0   : > { %v2595_v40 = vadd.f32 %v5310_v59, %v2594_v29 }
 0x3e1   : > { %v2725_v36 = vpop.f32.mrf.mxu1 }
 0x3e2   : > { %v2726_v44 = vadd.f32 %v2725_v36, %v2595_v40 }
 0x3e4   : > { %v2765_v15 = vadd.f32 %v3214_v16, %v2726_v44 }
 0x3e6   : > { %2803 = vst [vmem:[%s4941_s6 + $0x128] sm:$0xff] %v2765_v15 }
 0x3e7   : > { %3392 = shalt.err (!%p3389_p2)
}
 0x3e8   : > { %s3452_s29 = smov 128   ;;  %s3453_s14 = smov 8  }
 0x3e9   : > { %3013 = dma.vmem_to_hbm [thread:$0]  (%p3585_p7), %s2818_s10, 4864, %s2820_s13, %s2805_s9, %s3452_s29, %s3452_s29, %s3453_s14  }
 0x3ea PF: > { %s2834_s4 = sand.u32 1, %s3431_s27   ;;  %p5701_p12 = scmp.ge.s32.totalorder %s3443_s30, 2 }
 0x3eb   : > { %s2835_s6 = scalar_lea.sflag [#allocation4], %s2834_s4 }
 0x3ec   : > { %p3033_p13 = pnand %p5701_p12, %p3534_p6 }
 0x3ee   : > { %p3034_p0 = pneg %p3033_p13 }
 0x3f0   : > { %3426 = dma.done.wait (%p3034_p0), %s2835_s6, 4864  }
 0x3f1   : > { %3428 = vsyncadd (%p3034_p0), %s2835_s6, 4294962432  ;;  %s5702_s30 = sld [smem:[#allocation19_spill]]  ;;  %s5705_s27 = smov %s3435_s28 }
 0x3f2   : > { %s5703_s17 = sld [smem:[#allocation17_spill]] }
 0x3f3   : > { %s5704_s29 = sld [smem:[#allocation20_spill]] }
 0x3f7   : > { %p25_p3 = scmp.ge.s32.totalorder %s5702_s30, 4  }
 0x3f8   : > { %s5706_s28 = smov %s5703_s17 }
 0x3f9   :  { %27 = sbr.rel (!%p25_p3) target bundleno = 12 (0xc), region = 122 }
 0x3fe   :  { %2841 = vsyncpa [#allocation3], 1 }
 0x3ff   :  { %2843 = vsyncpa [#allocation3 + $0x1], 1 }
 0x400   :  { %2844 = vsyncpa [#allocation6], 1 }
 0x401   :  { %2846 = vsyncpa [#allocation6 + $0x1], 1 }
 0x402   :  { %2847 = vsyncpa [#allocation9], 1 }
 0x403   :  { %2848 = vsyncpa [#allocation4], 1 }
 0x404   :  { %2850 = vsyncpa [#allocation4 + $0x1], 1 }

</bundles_post_ra>
